<compile_context>
chip_gen: v6e
topology: v6e:2x2x1
jax: 0.10.0
libtpu: 0.0.40
codegen_flags: <defaults>
</compile_context>

<pallas_src>
import jax
import jax.numpy as jnp
from jax.experimental import pallas as pl
from jax.experimental.pallas import tpu as pltpu


# ----------------------------------------------------------------------------
# Weight packing: one (sum(Cout), max_Cin + 1) f32 slab, bias in the last column.
# E2E/E2N epilogue factors and both torch.cat ops are folded in here (weight-only
# precompute; nothing input-dependent is hoisted out of the kernel).
# ----------------------------------------------------------------------------
def _pack_weights(params):
    f32 = jnp.float32

    c0 = params["E1_w"].shape[1]
    c1 = params["E2_w"].shape[1]
    c2 = params["E3_w"].shape[1]
    c3 = params["E13_w"].shape[1]
    c4 = params["N1_w"].shape[1]
    c5 = params["N24_w"].shape[1]
    c6 = params["G1_w"].shape[1]
    ch = (c0, c1, c2, c3, c4, c5, c6)

    # per-layer input widths: 1, c0, c1, c0, c2+c3, c1, c4+c5
    max_cin = max(1, c0, c1, c2 + c3, c4 + c5)
    width = max_cin + 1                       # last column holds the (scaled) bias

    def blk(wname, bname, wscale, bscale):
        w_t = (wscale * params[wname].astype(f32)).T            # (Cout, Cin)
        b = (bscale * params[bname].astype(f32)).reshape(-1, 1)  # (Cout, 1)
        cout, cin = w_t.shape
        pad = jnp.zeros((cout, width - 1 - cin), f32)
        return jnp.concatenate([w_t, pad, b], axis=1)

    # E2E(conv(sym)) == 2*(sym@W + b); first layer's E2E absorbs into xs=x+x^T, so only
    # its bias doubles.  E2N(conv(sym)) == 2*(sym@W + b).  G1 has no epilogue.
    slab = jnp.concatenate([
        blk("E1_w",  "E1_b",  1.0, 2.0),     # E2E(E1(x))
        blk("E2_w",  "E2_b",  2.0, 2.0),     # E2E(E2(.))
        blk("E3_w",  "E3_b",  2.0, 2.0),     # E2E(E3(.))
        blk("E13_w", "E13_b", 2.0, 2.0),     # E2E(E1_3(.))
        blk("N1_w",  "N1_b",  2.0, 2.0),     # E2N(N1(cat))  — cat folded into weight cols
        blk("N24_w", "N24_b", 2.0, 2.0),     # E2N(N2_4(.))
        blk("G1_w",  "G1_b",  1.0, 1.0),     # G1(cat)
    ], axis=0)
    return slab, ch, max_cin                  # bias column index == max_cin


# ----------------------------------------------------------------------------
# Kernel 1: fully fused conv stack, channel-major (C in sublanes, H*W in lanes).
# One grid step == one batch element; everything stays VMEM-resident.
# ----------------------------------------------------------------------------
def _build_conv_stack_kernel(ch, hw, bias_col):
    c0, c1, c2, c3, c4, c5, c6 = ch
    r_e1 = 0
    r_e2 = r_e1 + c0
    r_e3 = r_e2 + c1
    r_e13 = r_e3 + c2
    r_n1 = r_e13 + c3
    r_n24 = r_n1 + c4
    r_g1 = r_n24 + c5

    def kernel(xs_ref, w_ref, o_ref):
        w = w_ref[...]                                     # (64, 25) slab, tiny

        def affine(row, cout, *acts):
            # out(cout, HW) = bias + sum_ci W_t[:, ci] (x) act[ci, :]  — VPU broadcast-FMA,
            # no MXU pushes for these K<=24 contractions.
            acc = None
            col = 0
            for a in acts:
                for ci in range(a.shape[0]):
                    term = w[row:row + cout, col:col + 1] * a[ci:ci + 1, :]
                    acc = term if acc is None else acc + term
                    col += 1
            return acc + w[row:row + cout, bias_col:bias_col + 1]

        xs = xs_ref[0]                        # (1, HW): x + x^T (symmetric) for this elem
        l1 = affine(r_e1, c0, xs)             # E2E(E1(x))
        l2 = affine(r_e2, c1, l1)             # E2E(E2(layer1))
        l3 = affine(r_e3, c2, l2)             # E2E(E3(layer2))
        l4 = affine(r_e13, c3, l1)            # E2E(E1_3(layer1))
        l5 = affine(r_n1, c4, l3, l4)         # E2N(N1(cat([l3, l4], ch)))
        l6 = affine(r_n24, c5, l2)            # E2N(N2_4(layer2))
        l7 = affine(r_g1, c6, l5, l6)         # G1(cat([l5, l6], ch))
        o_ref[0] = l7.astype(o_ref.dtype)     # (c7, HW) — lane-dense, contiguous writeback

    return kernel


def conv_stack(x_nchw, params):
    """x_nchw: (N, 1, H, W) f32 -> layer7 in NCHW-contiguous form: (N, c7, H*W)."""
    N, cin, H, W = x_nchw.shape
    assert cin == 1 and H == W
    hw = H * W

    x_hw = x_nchw[:, 0].astype(jnp.float32)
    xs = (x_hw + jnp.swapaxes(x_hw, 1, 2)).reshape(N, 1, hw)   # tiny XLA glue (2 KB/elem)

    wslab, ch, bias_col = _pack_weights(params)
    c7 = ch[-1]
    kernel = _build_conv_stack_kernel(ch, hw, bias_col)

    return pl.pallas_call(
        kernel,
        out_shape=jax.ShapeDtypeStruct((N, c7, hw), jnp.float32),
        grid_spec=pltpu.PrefetchScalarGridSpec(
            num_scalar_prefetch=0,
            grid=(N,),
            in_specs=[
                pl.BlockSpec((1, 1, hw), lambda n: (n, 0, 0)),       # xs row: dense 1 KB DMA
                pl.BlockSpec(wslab.shape, lambda n: (0, 0)),         # whole slab, fetched once
            ],
            out_specs=pl.BlockSpec((1, c7, hw), lambda n: (n, 0, 0)),
        ),
        compiler_params=pltpu.CompilerParams(dimension_semantics=("parallel",)),
    )(xs, wslab)


# ----------------------------------------------------------------------------
# Kernel 2: fc2 head (Linear -> ReLU -> Linear -> softmax over the 2 classes)
# ----------------------------------------------------------------------------
def _fc_softmax_kernel(z_ref, w1_ref, b1_ref, w2_ref, b2_ref, o_ref):
    h = jnp.dot(z_ref[...], w1_ref[...], preferred_element_type=jnp.float32) + b1_ref[...]
    h = jnp.maximum(h, 0.0)
    logits = jnp.dot(h, w2_ref[...], preferred_element_type=jnp.float32) + b2_ref[...]
    m = jnp.max(logits, axis=-1, keepdims=True)
    e = jnp.exp(logits - m)
    s = jnp.sum(e, axis=-1, keepdims=True)
    o_ref[...] = (e * pl.reciprocal(s, approx=False)).astype(o_ref.dtype)


def fc2_softmax(z, w1, b1, w2, b2):
    """z: (M, Cin).  Returns softmax(fc2(z)) of shape (M, 2)."""
    M, cin = z.shape
    hd = w1.shape[1]
    # 2 parallel blocks keep both v7x TensorCores busy; falls back to 1 if M is ragged
    # (single-TC v5e/v6e only pay ~0.35 us for the extra step).
    nblk = 2 if (M % 2 == 0 and (M // 2) % 8 == 0) else 1
    tm = M // nblk

    return pl.pallas_call(
        _fc_softmax_kernel,
        out_shape=jax.ShapeDtypeStruct((M, 2), jnp.float32),
        grid_spec=pltpu.PrefetchScalarGridSpec(
            num_scalar_prefetch=0,
            grid=(nblk,),
            in_specs=[
                pl.BlockSpec((tm, cin), lambda i: (i, 0)),
                pl.BlockSpec((cin, hd), lambda i: (0, 0)),
                pl.BlockSpec((1, hd), lambda i: (0, 0)),
                pl.BlockSpec((hd, 2), lambda i: (0, 0)),
                pl.BlockSpec((1, 2), lambda i: (0, 0)),
            ],
            out_specs=pl.BlockSpec((tm, 2), lambda i: (i, 0)),
        ),
        compiler_params=pltpu.CompilerParams(dimension_semantics=("parallel",)),
    )(
        z.astype(jnp.float32),
        w1.astype(jnp.float32),
        b1.reshape(1, hd).astype(jnp.float32),
        w2.astype(jnp.float32),
        b2.reshape(1, 2).astype(jnp.float32),
    )


# ----------------------------------------------------------------------------
# NetworkESS forward (eval mode: dropout == identity)
# ----------------------------------------------------------------------------
def network_ess_forward(params, x_nchw):
    l7 = conv_stack(x_nchw, params)          # (N, c7, H*W)  == NCHW-contiguous layer7
    c7 = l7.shape[1]
    # literal PyTorch `layer7.view(-1, out_size)`: with the channel-major layout this
    # is a FREE reshape (no relayout / transpose between the two pallas_calls).
    z = l7.reshape(-1, c7)
    return fc2_softmax(z, params["FC1_w"], params["FC1_b"],
                       params["FC2_w"], params["FC2_b"])


def init_params(key):
    # channel plan (list_arch[i][4]): E1=8, E2=8, E3=8, E1_3=8, N1=16, N2_4=8, G1=8
    # FC: list_arch[7] = (2, hidden=16)  -> fc2 head with 2 output classes.
    c0, c1, c2, c3, c4, c5, c6, hidden = 8, 8, 8, 8, 16, 8, 8, 16
    shapes = {
        "E1_w": (1, c0), "E1_b": (c0,),
        "E2_w": (c0, c1), "E2_b": (c1,),
        "E3_w": (c1, c2), "E3_b": (c2,),
        "E13_w": (c0, c3), "E13_b": (c3,),
        "N1_w": (c2 + c3, c4), "N1_b": (c4,),
        "N24_w": (c1, c5), "N24_b": (c5,),
        "G1_w": (c4 + c5, c6), "G1_b": (c6,),
        "FC1_w": (c6, hidden), "FC1_b": (hidden,),
        "FC2_w": (hidden, 2), "FC2_b": (2,),
    }
    params = {}
    keys = jax.random.split(key, len(shapes))
    for k_rng, (name, shp) in zip(keys, sorted(shapes.items())):
        scale = 0.1 if name.endswith("_w") else 0.01
        params[name] = scale * jax.random.normal(k_rng, shp, dtype=jnp.float32)
    return params


if __name__ == "__main__":
    key = jax.random.PRNGKey(0)
    pkey, xkey = jax.random.split(key)
    params = init_params(pkey)

    # PyTorch-style input: NCHW with a single input channel (connectivity matrix).
    x = jax.random.normal(xkey, (2, 1, 16, 16), dtype=jnp.float32)

    fwd = jax.jit(network_ess_forward)
    out = fwd(params, x)
    out = jax.block_until_ready(out)

    assert out.shape == (2 * 16 * 16, 2)
    assert bool(jnp.all(jnp.isfinite(out)))
    # softmax rows must sum to 1
    assert bool(jnp.allclose(jnp.sum(out, axis=1), 1.0, atol=1e-5))
    print("KERNEL_OK")
</pallas_src>

<mosaic_0001>
module attributes {stable_mosaic.version = 11 : i64} {
  func.func @_fc_softmax_kernel(%arg0: i32, %arg1: memref<256x8xf32, #tpu.memory_space<vmem>>, %arg2: memref<8x16xf32, #tpu.memory_space<vmem>>, %arg3: memref<1x16xf32, #tpu.memory_space<vmem>>, %arg4: memref<16x2xf32, #tpu.memory_space<vmem>>, %arg5: memref<1x2xf32, #tpu.memory_space<vmem>>, %arg6: memref<256x2xf32, #tpu.memory_space<vmem>>) attributes {dimension_semantics = [#tpu.dimension_semantics<parallel>], iteration_bounds = array<i64: 2>, scalar_prefetch = 0 : i64, scratch_operands = 0 : i64, tpu.core_type = #tpu.core_type<tc>, window_params = [{transform_indices = @transform_0, window_bounds = array<i64: 256, 8>}, {pipeline_mode = #tpu.pipeline_mode<synchronous>, transform_indices = @transform_1, window_bounds = array<i64: 8, 16>}, {pipeline_mode = #tpu.pipeline_mode<synchronous>, transform_indices = @transform_2, window_bounds = array<i64: 1, 16>}, {pipeline_mode = #tpu.pipeline_mode<synchronous>, transform_indices = @transform_3, window_bounds = array<i64: 16, 2>}, {pipeline_mode = #tpu.pipeline_mode<synchronous>, transform_indices = @transform_4, window_bounds = array<i64: 1, 2>}, {transform_indices = @transform_5, window_bounds = array<i64: 256, 2>}]} {
    %c0 = arith.constant 0 : index
    %c0_0 = arith.constant 0 : index
    %0 = vector.load %arg1[%c0, %c0_0] : memref<256x8xf32, #tpu.memory_space<vmem>>, vector<256x8xf32>
    %c0_1 = arith.constant 0 : index
    %c0_2 = arith.constant 0 : index
    %1 = vector.load %arg2[%c0_1, %c0_2] : memref<8x16xf32, #tpu.memory_space<vmem>>, vector<8x16xf32>
    %cst = arith.constant dense<0.000000e+00> : vector<256x16xf32>
    %2 = tpu.matmul %0, %1, %cst {dimension_numbers = #tpu.dot_dimension_numbers<[1], [0], [0], [1], [0, 0, 1, 1], [], []>} : vector<256x8xf32>, vector<8x16xf32>, vector<256x16xf32> -> vector<256x16xf32>
    %c0_3 = arith.constant 0 : index
    %c0_4 = arith.constant 0 : index
    %3 = vector.load %arg3[%c0_3, %c0_4] : memref<1x16xf32, #tpu.memory_space<vmem>>, vector<1x16xf32>
    %4 = vector.broadcast %3 : vector<1x16xf32> to vector<256x16xf32>
    %5 = arith.addf %2, %4 : vector<256x16xf32>
    %cst_5 = arith.constant 0.000000e+00 : f32
    %6 = vector.broadcast %cst_5 : f32 to vector<256x16xf32>
    %7 = arith.maximumf %5, %6 : vector<256x16xf32>
    %c0_6 = arith.constant 0 : index
    %c0_7 = arith.constant 0 : index
    %8 = vector.load %arg4[%c0_6, %c0_7] : memref<16x2xf32, #tpu.memory_space<vmem>>, vector<16x2xf32>
    %cst_8 = arith.constant dense<0.000000e+00> : vector<256x2xf32>
    %9 = tpu.matmul %7, %8, %cst_8 {dimension_numbers = #tpu.dot_dimension_numbers<[1], [0], [0], [1], [0, 0, 1, 1], [], []>} : vector<256x16xf32>, vector<16x2xf32>, vector<256x2xf32> -> vector<256x2xf32>
    %c0_9 = arith.constant 0 : index
    %c0_10 = arith.constant 0 : index
    %10 = vector.load %arg5[%c0_9, %c0_10] : memref<1x2xf32, #tpu.memory_space<vmem>>, vector<1x2xf32>
    %11 = vector.broadcast %10 : vector<1x2xf32> to vector<256x2xf32>
    %12 = arith.addf %9, %11 : vector<256x2xf32>
    %cst_11 = arith.constant dense<0xFF800000> : vector<256xf32>
    %13 = vector.multi_reduction <maximumf>, %12, %cst_11 [1] : vector<256x2xf32> to vector<256xf32>
    %14 = vector.shape_cast %13 : vector<256xf32> to vector<256x1xf32>
    %15 = vector.broadcast %14 : vector<256x1xf32> to vector<256x2xf32>
    %16 = arith.subf %12, %15 : vector<256x2xf32>
    %17 = math.exp %16 : vector<256x2xf32>
    %cst_12 = arith.constant dense<0.000000e+00> : vector<256xf32>
    %18 = vector.multi_reduction <add>, %17, %cst_12 [1] : vector<256x2xf32> to vector<256xf32>
    %19 = vector.shape_cast %18 : vector<256xf32> to vector<256x1xf32>
    %20 = tpu.reciprocal %19 : vector<256x1xf32> -> vector<256x1xf32>
    %21 = vector.broadcast %20 : vector<256x1xf32> to vector<256x2xf32>
    %22 = arith.mulf %17, %21 : vector<256x2xf32>
    %c0_13 = arith.constant 0 : index
    %c0_14 = arith.constant 0 : index
    %23 = vector.load %arg6[%c0_13, %c0_14] : memref<256x2xf32, #tpu.memory_space<vmem>>, vector<256x2xf32>
    tpu.vector_store %arg6[%c0_13, %c0_14], %22 {strides = array<i32>} : memref<256x2xf32, #tpu.memory_space<vmem>>, vector<256x2xf32>,
    return
  }
  func.func @transform_0(%arg0: i32) -> (i32, i32) {
    %c0_i32 = arith.constant 0 : i32
    %c0_i32_0 = arith.constant 0 : i32
    return %arg0, %c0_i32 : i32, i32
  }
  func.func @transform_1(%arg0: i32) -> (i32, i32) {
    %c0_i32 = arith.constant 0 : i32
    %c0_i32_0 = arith.constant 0 : i32
    %c0_i32_1 = arith.constant 0 : i32
    return %c0_i32, %c0_i32_0 : i32, i32
  }
  func.func @transform_2(%arg0: i32) -> (i32, i32) {
    %c0_i32 = arith.constant 0 : i32
    %c0_i32_0 = arith.constant 0 : i32
    %c0_i32_1 = arith.constant 0 : i32
    return %c0_i32, %c0_i32_0 : i32, i32
  }
  func.func @transform_3(%arg0: i32) -> (i32, i32) {
    %c0_i32 = arith.constant 0 : i32
    %c0_i32_0 = arith.constant 0 : i32
    %c0_i32_1 = arith.constant 0 : i32
    return %c0_i32, %c0_i32_0 : i32, i32
  }
  func.func @transform_4(%arg0: i32) -> (i32, i32) {
    %c0_i32 = arith.constant 0 : i32
    %c0_i32_0 = arith.constant 0 : i32
    %c0_i32_1 = arith.constant 0 : i32
    return %c0_i32, %c0_i32_0 : i32, i32
  }
  func.func @transform_5(%arg0: i32) -> (i32, i32) {
    %c0_i32 = arith.constant 0 : i32
    %c0_i32_0 = arith.constant 0 : i32
    return %arg0, %c0_i32 : i32, i32
  }
}

module attributes {stable_mosaic.version = 11 : i64} {
  func.func @kernel(%arg0: i32, %arg1: memref<1x1x256xf32, #tpu.memory_space<vmem>>, %arg2: memref<64x25xf32, #tpu.memory_space<vmem>>, %arg3: memref<1x8x256xf32, #tpu.memory_space<vmem>>) attributes {dimension_semantics = [#tpu.dimension_semantics<parallel>], iteration_bounds = array<i64: 2>, scalar_prefetch = 0 : i64, scratch_operands = 0 : i64, tpu.core_type = #tpu.core_type<tc>, window_params = [{transform_indices = @transform_0, window_bounds = array<i64: 1, 1, 256>}, {pipeline_mode = #tpu.pipeline_mode<synchronous>, transform_indices = @transform_1, window_bounds = array<i64: 64, 25>}, {transform_indices = @transform_2, window_bounds = array<i64: 1, 8, 256>}]} {
    %c0 = arith.constant 0 : index
    %c0_0 = arith.constant 0 : index
    %0 = vector.load %arg2[%c0, %c0_0] : memref<64x25xf32, #tpu.memory_space<vmem>>, vector<64x25xf32>
    %c0_1 = arith.constant 0 : index
    %c0_2 = arith.constant 0 : index
    %c0_3 = arith.constant 0 : index
    %1 = vector.load %arg1[%c0_1, %c0_2, %c0_3] : memref<1x1x256xf32, #tpu.memory_space<vmem>>, vector<1x1x256xf32>
    %2 = vector.shape_cast %1 : vector<1x1x256xf32> to vector<1x256xf32>
    %3 = vector.extract_strided_slice %0 {offsets = [0, 0], sizes = [8, 1], strides = [1, 1]} : vector<64x25xf32> to vector<8x1xf32>
    %4 = vector.broadcast %3 : vector<8x1xf32> to vector<8x256xf32>
    %5 = vector.broadcast %2 : vector<1x256xf32> to vector<8x256xf32>
    %6 = arith.mulf %4, %5 : vector<8x256xf32>
    %7 = vector.extract_strided_slice %0 {offsets = [0, 24], sizes = [8, 1], strides = [1, 1]} : vector<64x25xf32> to vector<8x1xf32>
    %8 = vector.broadcast %7 : vector<8x1xf32> to vector<8x256xf32>
    %9 = arith.addf %6, %8 : vector<8x256xf32>
    %10 = vector.extract_strided_slice %0 {offsets = [8, 0], sizes = [8, 1], strides = [1, 1]} : vector<64x25xf32> to vector<8x1xf32>
    %11 = vector.extract_strided_slice %9 {offsets = [0, 0], sizes = [1, 256], strides = [1, 1]} : vector<8x256xf32> to vector<1x256xf32>
    %12 = vector.broadcast %10 : vector<8x1xf32> to vector<8x256xf32>
    %13 = vector.broadcast %11 : vector<1x256xf32> to vector<8x256xf32>
    %14 = arith.mulf %12, %13 : vector<8x256xf32>
    %15 = vector.extract_strided_slice %0 {offsets = [8, 1], sizes = [8, 1], strides = [1, 1]} : vector<64x25xf32> to vector<8x1xf32>
    %16 = vector.extract_strided_slice %9 {offsets = [1, 0], sizes = [1, 256], strides = [1, 1]} : vector<8x256xf32> to vector<1x256xf32>
    %17 = vector.broadcast %15 : vector<8x1xf32> to vector<8x256xf32>
    %18 = vector.broadcast %16 : vector<1x256xf32> to vector<8x256xf32>
    %19 = arith.mulf %17, %18 : vector<8x256xf32>
    %20 = arith.addf %14, %19 : vector<8x256xf32>
    %21 = vector.extract_strided_slice %0 {offsets = [8, 2], sizes = [8, 1], strides = [1, 1]} : vector<64x25xf32> to vector<8x1xf32>
    %22 = vector.extract_strided_slice %9 {offsets = [2, 0], sizes = [1, 256], strides = [1, 1]} : vector<8x256xf32> to vector<1x256xf32>
    %23 = vector.broadcast %21 : vector<8x1xf32> to vector<8x256xf32>
    %24 = vector.broadcast %22 : vector<1x256xf32> to vector<8x256xf32>
    %25 = arith.mulf %23, %24 : vector<8x256xf32>
    %26 = arith.addf %20, %25 : vector<8x256xf32>
    %27 = vector.extract_strided_slice %0 {offsets = [8, 3], sizes = [8, 1], strides = [1, 1]} : vector<64x25xf32> to vector<8x1xf32>
    %28 = vector.extract_strided_slice %9 {offsets = [3, 0], sizes = [1, 256], strides = [1, 1]} : vector<8x256xf32> to vector<1x256xf32>
    %29 = vector.broadcast %27 : vector<8x1xf32> to vector<8x256xf32>
    %30 = vector.broadcast %28 : vector<1x256xf32> to vector<8x256xf32>
    %31 = arith.mulf %29, %30 : vector<8x256xf32>
    %32 = arith.addf %26, %31 : vector<8x256xf32>
    %33 = vector.extract_strided_slice %0 {offsets = [8, 4], sizes = [8, 1], strides = [1, 1]} : vector<64x25xf32> to vector<8x1xf32>
    %34 = vector.extract_strided_slice %9 {offsets = [4, 0], sizes = [1, 256], strides = [1, 1]} : vector<8x256xf32> to vector<1x256xf32>
    %35 = vector.broadcast %33 : vector<8x1xf32> to vector<8x256xf32>
    %36 = vector.broadcast %34 : vector<1x256xf32> to vector<8x256xf32>
    %37 = arith.mulf %35, %36 : vector<8x256xf32>
    %38 = arith.addf %32, %37 : vector<8x256xf32>
    %39 = vector.extract_strided_slice %0 {offsets = [8, 5], sizes = [8, 1], strides = [1, 1]} : vector<64x25xf32> to vector<8x1xf32>
    %40 = vector.extract_strided_slice %9 {offsets = [5, 0], sizes = [1, 256], strides = [1, 1]} : vector<8x256xf32> to vector<1x256xf32>
    %41 = vector.broadcast %39 : vector<8x1xf32> to vector<8x256xf32>
    %42 = vector.broadcast %40 : vector<1x256xf32> to vector<8x256xf32>
    %43 = arith.mulf %41, %42 : vector<8x256xf32>
    %44 = arith.addf %38, %43 : vector<8x256xf32>
    %45 = vector.extract_strided_slice %0 {offsets = [8, 6], sizes = [8, 1], strides = [1, 1]} : vector<64x25xf32> to vector<8x1xf32>
    %46 = vector.extract_strided_slice %9 {offsets = [6, 0], sizes = [1, 256], strides = [1, 1]} : vector<8x256xf32> to vector<1x256xf32>
    %47 = vector.broadcast %45 : vector<8x1xf32> to vector<8x256xf32>
    %48 = vector.broadcast %46 : vector<1x256xf32> to vector<8x256xf32>
    %49 = arith.mulf %47, %48 : vector<8x256xf32>
    %50 = arith.addf %44, %49 : vector<8x256xf32>
    %51 = vector.extract_strided_slice %0 {offsets = [8, 7], sizes = [8, 1], strides = [1, 1]} : vector<64x25xf32> to vector<8x1xf32>
    %52 = vector.extract_strided_slice %9 {offsets = [7, 0], sizes = [1, 256], strides = [1, 1]} : vector<8x256xf32> to vector<1x256xf32>
    %53 = vector.broadcast %51 : vector<8x1xf32> to vector<8x256xf32>
    %54 = vector.broadcast %52 : vector<1x256xf32> to vector<8x256xf32>
    %55 = arith.mulf %53, %54 : vector<8x256xf32>
    %56 = arith.addf %50, %55 : vector<8x256xf32>
    %57 = vector.extract_strided_slice %0 {offsets = [8, 24], sizes = [8, 1], strides = [1, 1]} : vector<64x25xf32> to vector<8x1xf32>
    %58 = vector.broadcast %57 : vector<8x1xf32> to vector<8x256xf32>
    %59 = arith.addf %56, %58 : vector<8x256xf32>
    %60 = vector.extract_strided_slice %0 {offsets = [16, 0], sizes = [8, 1], strides = [1, 1]} : vector<64x25xf32> to vector<8x1xf32>
    %61 = vector.extract_strided_slice %59 {offsets = [0, 0], sizes = [1, 256], strides = [1, 1]} : vector<8x256xf32> to vector<1x256xf32>
    %62 = vector.broadcast %60 : vector<8x1xf32> to vector<8x256xf32>
    %63 = vector.broadcast %61 : vector<1x256xf32> to vector<8x256xf32>
    %64 = arith.mulf %62, %63 : vector<8x256xf32>
    %65 = vector.extract_strided_slice %0 {offsets = [16, 1], sizes = [8, 1], strides = [1, 1]} : vector<64x25xf32> to vector<8x1xf32>
    %66 = vector.extract_strided_slice %59 {offsets = [1, 0], sizes = [1, 256], strides = [1, 1]} : vector<8x256xf32> to vector<1x256xf32>
    %67 = vector.broadcast %65 : vector<8x1xf32> to vector<8x256xf32>
    %68 = vector.broadcast %66 : vector<1x256xf32> to vector<8x256xf32>
    %69 = arith.mulf %67, %68 : vector<8x256xf32>
    %70 = arith.addf %64, %69 : vector<8x256xf32>
    %71 = vector.extract_strided_slice %0 {offsets = [16, 2], sizes = [8, 1], strides = [1, 1]} : vector<64x25xf32> to vector<8x1xf32>
    %72 = vector.extract_strided_slice %59 {offsets = [2, 0], sizes = [1, 256], strides = [1, 1]} : vector<8x256xf32> to vector<1x256xf32>
    %73 = vector.broadcast %71 : vector<8x1xf32> to vector<8x256xf32>
    %74 = vector.broadcast %72 : vector<1x256xf32> to vector<8x256xf32>
    %75 = arith.mulf %73, %74 : vector<8x256xf32>
    %76 = arith.addf %70, %75 : vector<8x256xf32>
    %77 = vector.extract_strided_slice %0 {offsets = [16, 3], sizes = [8, 1], strides = [1, 1]} : vector<64x25xf32> to vector<8x1xf32>
    %78 = vector.extract_strided_slice %59 {offsets = [3, 0], sizes = [1, 256], strides = [1, 1]} : vector<8x256xf32> to vector<1x256xf32>
    %79 = vector.broadcast %77 : vector<8x1xf32> to vector<8x256xf32>
    %80 = vector.broadcast %78 : vector<1x256xf32> to vector<8x256xf32>
    %81 = arith.mulf %79, %80 : vector<8x256xf32>
    %82 = arith.addf %76, %81 : vector<8x256xf32>
    %83 = vector.extract_strided_slice %0 {offsets = [16, 4], sizes = [8, 1], strides = [1, 1]} : vector<64x25xf32> to vector<8x1xf32>
    %84 = vector.extract_strided_slice %59 {offsets = [4, 0], sizes = [1, 256], strides = [1, 1]} : vector<8x256xf32> to vector<1x256xf32>
    %85 = vector.broadcast %83 : vector<8x1xf32> to vector<8x256xf32>
    %86 = vector.broadcast %84 : vector<1x256xf32> to vector<8x256xf32>
    %87 = arith.mulf %85, %86 : vector<8x256xf32>
    %88 = arith.addf %82, %87 : vector<8x256xf32>
    %89 = vector.extract_strided_slice %0 {offsets = [16, 5], sizes = [8, 1], strides = [1, 1]} : vector<64x25xf32> to vector<8x1xf32>
    %90 = vector.extract_strided_slice %59 {offsets = [5, 0], sizes = [1, 256], strides = [1, 1]} : vector<8x256xf32> to vector<1x256xf32>
    %91 = vector.broadcast %89 : vector<8x1xf32> to vector<8x256xf32>
    %92 = vector.broadcast %90 : vector<1x256xf32> to vector<8x256xf32>
    %93 = arith.mulf %91, %92 : vector<8x256xf32>
    %94 = arith.addf %88, %93 : vector<8x256xf32>
    %95 = vector.extract_strided_slice %0 {offsets = [16, 6], sizes = [8, 1], strides = [1, 1]} : vector<64x25xf32> to vector<8x1xf32>
    %96 = vector.extract_strided_slice %59 {offsets = [6, 0], sizes = [1, 256], strides = [1, 1]} : vector<8x256xf32> to vector<1x256xf32>
    %97 = vector.broadcast %95 : vector<8x1xf32> to vector<8x256xf32>
    %98 = vector.broadcast %96 : vector<1x256xf32> to vector<8x256xf32>
    %99 = arith.mulf %97, %98 : vector<8x256xf32>
    %100 = arith.addf %94, %99 : vector<8x256xf32>
    %101 = vector.extract_strided_slice %0 {offsets = [16, 7], sizes = [8, 1], strides = [1, 1]} : vector<64x25xf32> to vector<8x1xf32>
    %102 = vector.extract_strided_slice %59 {offsets = [7, 0], sizes = [1, 256], strides = [1, 1]} : vector<8x256xf32> to vector<1x256xf32>
    %103 = vector.broadcast %101 : vector<8x1xf32> to vector<8x256xf32>
    %104 = vector.broadcast %102 : vector<1x256xf32> to vector<8x256xf32>
    %105 = arith.mulf %103, %104 : vector<8x256xf32>
    %106 = arith.addf %100, %105 : vector<8x256xf32>
    %107 = vector.extract_strided_slice %0 {offsets = [16, 24], sizes = [8, 1], strides = [1, 1]} : vector<64x25xf32> to vector<8x1xf32>
    %108 = vector.broadcast %107 : vector<8x1xf32> to vector<8x256xf32>
    %109 = arith.addf %106, %108 : vector<8x256xf32>
    %110 = vector.extract_strided_slice %0 {offsets = [24, 0], sizes = [8, 1], strides = [1, 1]} : vector<64x25xf32> to vector<8x1xf32>
    %111 = vector.extract_strided_slice %9 {offsets = [0, 0], sizes = [1, 256], strides = [1, 1]} : vector<8x256xf32> to vector<1x256xf32>
    %112 = vector.broadcast %110 : vector<8x1xf32> to vector<8x256xf32>
    %113 = vector.broadcast %111 : vector<1x256xf32> to vector<8x256xf32>
    %114 = arith.mulf %112, %113 : vector<8x256xf32>
    %115 = vector.extract_strided_slice %0 {offsets = [24, 1], sizes = [8, 1], strides = [1, 1]} : vector<64x25xf32> to vector<8x1xf32>
    %116 = vector.extract_strided_slice %9 {offsets = [1, 0], sizes = [1, 256], strides = [1, 1]} : vector<8x256xf32> to vector<1x256xf32>
    %117 = vector.broadcast %115 : vector<8x1xf32> to vector<8x256xf32>
    %118 = vector.broadcast %116 : vector<1x256xf32> to vector<8x256xf32>
    %119 = arith.mulf %117, %118 : vector<8x256xf32>
    %120 = arith.addf %114, %119 : vector<8x256xf32>
    %121 = vector.extract_strided_slice %0 {offsets = [24, 2], sizes = [8, 1], strides = [1, 1]} : vector<64x25xf32> to vector<8x1xf32>
    %122 = vector.extract_strided_slice %9 {offsets = [2, 0], sizes = [1, 256], strides = [1, 1]} : vector<8x256xf32> to vector<1x256xf32>
    %123 = vector.broadcast %121 : vector<8x1xf32> to vector<8x256xf32>
    %124 = vector.broadcast %122 : vector<1x256xf32> to vector<8x256xf32>
    %125 = arith.mulf %123, %124 : vector<8x256xf32>
    %126 = arith.addf %120, %125 : vector<8x256xf32>
    %127 = vector.extract_strided_slice %0 {offsets = [24, 3], sizes = [8, 1], strides = [1, 1]} : vector<64x25xf32> to vector<8x1xf32>
    %128 = vector.extract_strided_slice %9 {offsets = [3, 0], sizes = [1, 256], strides = [1, 1]} : vector<8x256xf32> to vector<1x256xf32>
    %129 = vector.broadcast %127 : vector<8x1xf32> to vector<8x256xf32>
    %130 = vector.broadcast %128 : vector<1x256xf32> to vector<8x256xf32>
    %131 = arith.mulf %129, %130 : vector<8x256xf32>
    %132 = arith.addf %126, %131 : vector<8x256xf32>
    %133 = vector.extract_strided_slice %0 {offsets = [24, 4], sizes = [8, 1], strides = [1, 1]} : vector<64x25xf32> to vector<8x1xf32>
    %134 = vector.extract_strided_slice %9 {offsets = [4, 0], sizes = [1, 256], strides = [1, 1]} : vector<8x256xf32> to vector<1x256xf32>
    %135 = vector.broadcast %133 : vector<8x1xf32> to vector<8x256xf32>
    %136 = vector.broadcast %134 : vector<1x256xf32> to vector<8x256xf32>
    %137 = arith.mulf %135, %136 : vector<8x256xf32>
    %138 = arith.addf %132, %137 : vector<8x256xf32>
    %139 = vector.extract_strided_slice %0 {offsets = [24, 5], sizes = [8, 1], strides = [1, 1]} : vector<64x25xf32> to vector<8x1xf32>
    %140 = vector.extract_strided_slice %9 {offsets = [5, 0], sizes = [1, 256], strides = [1, 1]} : vector<8x256xf32> to vector<1x256xf32>
    %141 = vector.broadcast %139 : vector<8x1xf32> to vector<8x256xf32>
    %142 = vector.broadcast %140 : vector<1x256xf32> to vector<8x256xf32>
    %143 = arith.mulf %141, %142 : vector<8x256xf32>
    %144 = arith.addf %138, %143 : vector<8x256xf32>
    %145 = vector.extract_strided_slice %0 {offsets = [24, 6], sizes = [8, 1], strides = [1, 1]} : vector<64x25xf32> to vector<8x1xf32>
    %146 = vector.extract_strided_slice %9 {offsets = [6, 0], sizes = [1, 256], strides = [1, 1]} : vector<8x256xf32> to vector<1x256xf32>
    %147 = vector.broadcast %145 : vector<8x1xf32> to vector<8x256xf32>
    %148 = vector.broadcast %146 : vector<1x256xf32> to vector<8x256xf32>
    %149 = arith.mulf %147, %148 : vector<8x256xf32>
    %150 = arith.addf %144, %149 : vector<8x256xf32>
    %151 = vector.extract_strided_slice %0 {offsets = [24, 7], sizes = [8, 1], strides = [1, 1]} : vector<64x25xf32> to vector<8x1xf32>
    %152 = vector.extract_strided_slice %9 {offsets = [7, 0], sizes = [1, 256], strides = [1, 1]} : vector<8x256xf32> to vector<1x256xf32>
    %153 = vector.broadcast %151 : vector<8x1xf32> to vector<8x256xf32>
    %154 = vector.broadcast %152 : vector<1x256xf32> to vector<8x256xf32>
    %155 = arith.mulf %153, %154 : vector<8x256xf32>
    %156 = arith.addf %150, %155 : vector<8x256xf32>
    %157 = vector.extract_strided_slice %0 {offsets = [24, 24], sizes = [8, 1], strides = [1, 1]} : vector<64x25xf32> to vector<8x1xf32>
    %158 = vector.broadcast %157 : vector<8x1xf32> to vector<8x256xf32>
    %159 = arith.addf %156, %158 : vector<8x256xf32>
    %160 = vector.extract_strided_slice %0 {offsets = [32, 0], sizes = [16, 1], strides = [1, 1]} : vector<64x25xf32> to vector<16x1xf32>
    %161 = vector.extract_strided_slice %109 {offsets = [0, 0], sizes = [1, 256], strides = [1, 1]} : vector<8x256xf32> to vector<1x256xf32>
    %162 = vector.broadcast %160 : vector<16x1xf32> to vector<16x256xf32>
    %163 = vector.broadcast %161 : vector<1x256xf32> to vector<16x256xf32>
    %164 = arith.mulf %162, %163 : vector<16x256xf32>
    %165 = vector.extract_strided_slice %0 {offsets = [32, 1], sizes = [16, 1], strides = [1, 1]} : vector<64x25xf32> to vector<16x1xf32>
    %166 = vector.extract_strided_slice %109 {offsets = [1, 0], sizes = [1, 256], strides = [1, 1]} : vector<8x256xf32> to vector<1x256xf32>
    %167 = vector.broadcast %165 : vector<16x1xf32> to vector<16x256xf32>
    %168 = vector.broadcast %166 : vector<1x256xf32> to vector<16x256xf32>
    %169 = arith.mulf %167, %168 : vector<16x256xf32>
    %170 = arith.addf %164, %169 : vector<16x256xf32>
    %171 = vector.extract_strided_slice %0 {offsets = [32, 2], sizes = [16, 1], strides = [1, 1]} : vector<64x25xf32> to vector<16x1xf32>
    %172 = vector.extract_strided_slice %109 {offsets = [2, 0], sizes = [1, 256], strides = [1, 1]} : vector<8x256xf32> to vector<1x256xf32>
    %173 = vector.broadcast %171 : vector<16x1xf32> to vector<16x256xf32>
    %174 = vector.broadcast %172 : vector<1x256xf32> to vector<16x256xf32>
    %175 = arith.mulf %173, %174 : vector<16x256xf32>
    %176 = arith.addf %170, %175 : vector<16x256xf32>
    %177 = vector.extract_strided_slice %0 {offsets = [32, 3], sizes = [16, 1], strides = [1, 1]} : vector<64x25xf32> to vector<16x1xf32>
    %178 = vector.extract_strided_slice %109 {offsets = [3, 0], sizes = [1, 256], strides = [1, 1]} : vector<8x256xf32> to vector<1x256xf32>
    %179 = vector.broadcast %177 : vector<16x1xf32> to vector<16x256xf32>
    %180 = vector.broadcast %178 : vector<1x256xf32> to vector<16x256xf32>
    %181 = arith.mulf %179, %180 : vector<16x256xf32>
    %182 = arith.addf %176, %181 : vector<16x256xf32>
    %183 = vector.extract_strided_slice %0 {offsets = [32, 4], sizes = [16, 1], strides = [1, 1]} : vector<64x25xf32> to vector<16x1xf32>
    %184 = vector.extract_strided_slice %109 {offsets = [4, 0], sizes = [1, 256], strides = [1, 1]} : vector<8x256xf32> to vector<1x256xf32>
    %185 = vector.broadcast %183 : vector<16x1xf32> to vector<16x256xf32>
    %186 = vector.broadcast %184 : vector<1x256xf32> to vector<16x256xf32>
    %187 = arith.mulf %185, %186 : vector<16x256xf32>
    %188 = arith.addf %182, %187 : vector<16x256xf32>
    %189 = vector.extract_strided_slice %0 {offsets = [32, 5], sizes = [16, 1], strides = [1, 1]} : vector<64x25xf32> to vector<16x1xf32>
    %190 = vector.extract_strided_slice %109 {offsets = [5, 0], sizes = [1, 256], strides = [1, 1]} : vector<8x256xf32> to vector<1x256xf32>
    %191 = vector.broadcast %189 : vector<16x1xf32> to vector<16x256xf32>
    %192 = vector.broadcast %190 : vector<1x256xf32> to vector<16x256xf32>
    %193 = arith.mulf %191, %192 : vector<16x256xf32>
    %194 = arith.addf %188, %193 : vector<16x256xf32>
    %195 = vector.extract_strided_slice %0 {offsets = [32, 6], sizes = [16, 1], strides = [1, 1]} : vector<64x25xf32> to vector<16x1xf32>
    %196 = vector.extract_strided_slice %109 {offsets = [6, 0], sizes = [1, 256], strides = [1, 1]} : vector<8x256xf32> to vector<1x256xf32>
    %197 = vector.broadcast %195 : vector<16x1xf32> to vector<16x256xf32>
    %198 = vector.broadcast %196 : vector<1x256xf32> to vector<16x256xf32>
    %199 = arith.mulf %197, %198 : vector<16x256xf32>
    %200 = arith.addf %194, %199 : vector<16x256xf32>
    %201 = vector.extract_strided_slice %0 {offsets = [32, 7], sizes = [16, 1], strides = [1, 1]} : vector<64x25xf32> to vector<16x1xf32>
    %202 = vector.extract_strided_slice %109 {offsets = [7, 0], sizes = [1, 256], strides = [1, 1]} : vector<8x256xf32> to vector<1x256xf32>
    %203 = vector.broadcast %201 : vector<16x1xf32> to vector<16x256xf32>
    %204 = vector.broadcast %202 : vector<1x256xf32> to vector<16x256xf32>
    %205 = arith.mulf %203, %204 : vector<16x256xf32>
    %206 = arith.addf %200, %205 : vector<16x256xf32>
    %207 = vector.extract_strided_slice %0 {offsets = [32, 8], sizes = [16, 1], strides = [1, 1]} : vector<64x25xf32> to vector<16x1xf32>
    %208 = vector.extract_strided_slice %159 {offsets = [0, 0], sizes = [1, 256], strides = [1, 1]} : vector<8x256xf32> to vector<1x256xf32>
    %209 = vector.broadcast %207 : vector<16x1xf32> to vector<16x256xf32>
    %210 = vector.broadcast %208 : vector<1x256xf32> to vector<16x256xf32>
    %211 = arith.mulf %209, %210 : vector<16x256xf32>
    %212 = arith.addf %206, %211 : vector<16x256xf32>
    %213 = vector.extract_strided_slice %0 {offsets = [32, 9], sizes = [16, 1], strides = [1, 1]} : vector<64x25xf32> to vector<16x1xf32>
    %214 = vector.extract_strided_slice %159 {offsets = [1, 0], sizes = [1, 256], strides = [1, 1]} : vector<8x256xf32> to vector<1x256xf32>
    %215 = vector.broadcast %213 : vector<16x1xf32> to vector<16x256xf32>
    %216 = vector.broadcast %214 : vector<1x256xf32> to vector<16x256xf32>
    %217 = arith.mulf %215, %216 : vector<16x256xf32>
    %218 = arith.addf %212, %217 : vector<16x256xf32>
    %219 = vector.extract_strided_slice %0 {offsets = [32, 10], sizes = [16, 1], strides = [1, 1]} : vector<64x25xf32> to vector<16x1xf32>
    %220 = vector.extract_strided_slice %159 {offsets = [2, 0], sizes = [1, 256], strides = [1, 1]} : vector<8x256xf32> to vector<1x256xf32>
    %221 = vector.broadcast %219 : vector<16x1xf32> to vector<16x256xf32>
    %222 = vector.broadcast %220 : vector<1x256xf32> to vector<16x256xf32>
    %223 = arith.mulf %221, %222 : vector<16x256xf32>
    %224 = arith.addf %218, %223 : vector<16x256xf32>
    %225 = vector.extract_strided_slice %0 {offsets = [32, 11], sizes = [16, 1], strides = [1, 1]} : vector<64x25xf32> to vector<16x1xf32>
    %226 = vector.extract_strided_slice %159 {offsets = [3, 0], sizes = [1, 256], strides = [1, 1]} : vector<8x256xf32> to vector<1x256xf32>
    %227 = vector.broadcast %225 : vector<16x1xf32> to vector<16x256xf32>
    %228 = vector.broadcast %226 : vector<1x256xf32> to vector<16x256xf32>
    %229 = arith.mulf %227, %228 : vector<16x256xf32>
    %230 = arith.addf %224, %229 : vector<16x256xf32>
    %231 = vector.extract_strided_slice %0 {offsets = [32, 12], sizes = [16, 1], strides = [1, 1]} : vector<64x25xf32> to vector<16x1xf32>
    %232 = vector.extract_strided_slice %159 {offsets = [4, 0], sizes = [1, 256], strides = [1, 1]} : vector<8x256xf32> to vector<1x256xf32>
    %233 = vector.broadcast %231 : vector<16x1xf32> to vector<16x256xf32>
    %234 = vector.broadcast %232 : vector<1x256xf32> to vector<16x256xf32>
    %235 = arith.mulf %233, %234 : vector<16x256xf32>
    %236 = arith.addf %230, %235 : vector<16x256xf32>
    %237 = vector.extract_strided_slice %0 {offsets = [32, 13], sizes = [16, 1], strides = [1, 1]} : vector<64x25xf32> to vector<16x1xf32>
    %238 = vector.extract_strided_slice %159 {offsets = [5, 0], sizes = [1, 256], strides = [1, 1]} : vector<8x256xf32> to vector<1x256xf32>
    %239 = vector.broadcast %237 : vector<16x1xf32> to vector<16x256xf32>
    %240 = vector.broadcast %238 : vector<1x256xf32> to vector<16x256xf32>
    %241 = arith.mulf %239, %240 : vector<16x256xf32>
    %242 = arith.addf %236, %241 : vector<16x256xf32>
    %243 = vector.extract_strided_slice %0 {offsets = [32, 14], sizes = [16, 1], strides = [1, 1]} : vector<64x25xf32> to vector<16x1xf32>
    %244 = vector.extract_strided_slice %159 {offsets = [6, 0], sizes = [1, 256], strides = [1, 1]} : vector<8x256xf32> to vector<1x256xf32>
    %245 = vector.broadcast %243 : vector<16x1xf32> to vector<16x256xf32>
    %246 = vector.broadcast %244 : vector<1x256xf32> to vector<16x256xf32>
    %247 = arith.mulf %245, %246 : vector<16x256xf32>
    %248 = arith.addf %242, %247 : vector<16x256xf32>
    %249 = vector.extract_strided_slice %0 {offsets = [32, 15], sizes = [16, 1], strides = [1, 1]} : vector<64x25xf32> to vector<16x1xf32>
    %250 = vector.extract_strided_slice %159 {offsets = [7, 0], sizes = [1, 256], strides = [1, 1]} : vector<8x256xf32> to vector<1x256xf32>
    %251 = vector.broadcast %249 : vector<16x1xf32> to vector<16x256xf32>
    %252 = vector.broadcast %250 : vector<1x256xf32> to vector<16x256xf32>
    %253 = arith.mulf %251, %252 : vector<16x256xf32>
    %254 = arith.addf %248, %253 : vector<16x256xf32>
    %255 = vector.extract_strided_slice %0 {offsets = [32, 24], sizes = [16, 1], strides = [1, 1]} : vector<64x25xf32> to vector<16x1xf32>
    %256 = vector.broadcast %255 : vector<16x1xf32> to vector<16x256xf32>
    %257 = arith.addf %254, %256 : vector<16x256xf32>
    %258 = vector.extract_strided_slice %0 {offsets = [48, 0], sizes = [8, 1], strides = [1, 1]} : vector<64x25xf32> to vector<8x1xf32>
    %259 = vector.extract_strided_slice %59 {offsets = [0, 0], sizes = [1, 256], strides = [1, 1]} : vector<8x256xf32> to vector<1x256xf32>
    %260 = vector.broadcast %258 : vector<8x1xf32> to vector<8x256xf32>
    %261 = vector.broadcast %259 : vector<1x256xf32> to vector<8x256xf32>
    %262 = arith.mulf %260, %261 : vector<8x256xf32>
    %263 = vector.extract_strided_slice %0 {offsets = [48, 1], sizes = [8, 1], strides = [1, 1]} : vector<64x25xf32> to vector<8x1xf32>
    %264 = vector.extract_strided_slice %59 {offsets = [1, 0], sizes = [1, 256], strides = [1, 1]} : vector<8x256xf32> to vector<1x256xf32>
    %265 = vector.broadcast %263 : vector<8x1xf32> to vector<8x256xf32>
    %266 = vector.broadcast %264 : vector<1x256xf32> to vector<8x256xf32>
    %267 = arith.mulf %265, %266 : vector<8x256xf32>
    %268 = arith.addf %262, %267 : vector<8x256xf32>
    %269 = vector.extract_strided_slice %0 {offsets = [48, 2], sizes = [8, 1], strides = [1, 1]} : vector<64x25xf32> to vector<8x1xf32>
    %270 = vector.extract_strided_slice %59 {offsets = [2, 0], sizes = [1, 256], strides = [1, 1]} : vector<8x256xf32> to vector<1x256xf32>
    %271 = vector.broadcast %269 : vector<8x1xf32> to vector<8x256xf32>
    %272 = vector.broadcast %270 : vector<1x256xf32> to vector<8x256xf32>
    %273 = arith.mulf %271, %272 : vector<8x256xf32>
    %274 = arith.addf %268, %273 : vector<8x256xf32>
    %275 = vector.extract_strided_slice %0 {offsets = [48, 3], sizes = [8, 1], strides = [1, 1]} : vector<64x25xf32> to vector<8x1xf32>
    %276 = vector.extract_strided_slice %59 {offsets = [3, 0], sizes = [1, 256], strides = [1, 1]} : vector<8x256xf32> to vector<1x256xf32>
    %277 = vector.broadcast %275 : vector<8x1xf32> to vector<8x256xf32>
    %278 = vector.broadcast %276 : vector<1x256xf32> to vector<8x256xf32>
    %279 = arith.mulf %277, %278 : vector<8x256xf32>
    %280 = arith.addf %274, %279 : vector<8x256xf32>
    %281 = vector.extract_strided_slice %0 {offsets = [48, 4], sizes = [8, 1], strides = [1, 1]} : vector<64x25xf32> to vector<8x1xf32>
    %282 = vector.extract_strided_slice %59 {offsets = [4, 0], sizes = [1, 256], strides = [1, 1]} : vector<8x256xf32> to vector<1x256xf32>
    %283 = vector.broadcast %281 : vector<8x1xf32> to vector<8x256xf32>
    %284 = vector.broadcast %282 : vector<1x256xf32> to vector<8x256xf32>
    %285 = arith.mulf %283, %284 : vector<8x256xf32>
    %286 = arith.addf %280, %285 : vector<8x256xf32>
    %287 = vector.extract_strided_slice %0 {offsets = [48, 5], sizes = [8, 1], strides = [1, 1]} : vector<64x25xf32> to vector<8x1xf32>
    %288 = vector.extract_strided_slice %59 {offsets = [5, 0], sizes = [1, 256], strides = [1, 1]} : vector<8x256xf32> to vector<1x256xf32>
    %289 = vector.broadcast %287 : vector<8x1xf32> to vector<8x256xf32>
    %290 = vector.broadcast %288 : vector<1x256xf32> to vector<8x256xf32>
    %291 = arith.mulf %289, %290 : vector<8x256xf32>
    %292 = arith.addf %286, %291 : vector<8x256xf32>
    %293 = vector.extract_strided_slice %0 {offsets = [48, 6], sizes = [8, 1], strides = [1, 1]} : vector<64x25xf32> to vector<8x1xf32>
    %294 = vector.extract_strided_slice %59 {offsets = [6, 0], sizes = [1, 256], strides = [1, 1]} : vector<8x256xf32> to vector<1x256xf32>
    %295 = vector.broadcast %293 : vector<8x1xf32> to vector<8x256xf32>
    %296 = vector.broadcast %294 : vector<1x256xf32> to vector<8x256xf32>
    %297 = arith.mulf %295, %296 : vector<8x256xf32>
    %298 = arith.addf %292, %297 : vector<8x256xf32>
    %299 = vector.extract_strided_slice %0 {offsets = [48, 7], sizes = [8, 1], strides = [1, 1]} : vector<64x25xf32> to vector<8x1xf32>
    %300 = vector.extract_strided_slice %59 {offsets = [7, 0], sizes = [1, 256], strides = [1, 1]} : vector<8x256xf32> to vector<1x256xf32>
    %301 = vector.broadcast %299 : vector<8x1xf32> to vector<8x256xf32>
    %302 = vector.broadcast %300 : vector<1x256xf32> to vector<8x256xf32>
    %303 = arith.mulf %301, %302 : vector<8x256xf32>
    %304 = arith.addf %298, %303 : vector<8x256xf32>
    %305 = vector.extract_strided_slice %0 {offsets = [48, 24], sizes = [8, 1], strides = [1, 1]} : vector<64x25xf32> to vector<8x1xf32>
    %306 = vector.broadcast %305 : vector<8x1xf32> to vector<8x256xf32>
    %307 = arith.addf %304, %306 : vector<8x256xf32>
    %308 = vector.extract_strided_slice %0 {offsets = [56, 0], sizes = [8, 1], strides = [1, 1]} : vector<64x25xf32> to vector<8x1xf32>
    %309 = vector.extract_strided_slice %257 {offsets = [0, 0], sizes = [1, 256], strides = [1, 1]} : vector<16x256xf32> to vector<1x256xf32>
    %310 = vector.broadcast %308 : vector<8x1xf32> to vector<8x256xf32>
    %311 = vector.broadcast %309 : vector<1x256xf32> to vector<8x256xf32>
    %312 = arith.mulf %310, %311 : vector<8x256xf32>
    %313 = vector.extract_strided_slice %0 {offsets = [56, 1], sizes = [8, 1], strides = [1, 1]} : vector<64x25xf32> to vector<8x1xf32>
    %314 = vector.extract_strided_slice %257 {offsets = [1, 0], sizes = [1, 256], strides = [1, 1]} : vector<16x256xf32> to vector<1x256xf32>
    %315 = vector.broadcast %313 : vector<8x1xf32> to vector<8x256xf32>
    %316 = vector.broadcast %314 : vector<1x256xf32> to vector<8x256xf32>
    %317 = arith.mulf %315, %316 : vector<8x256xf32>
    %318 = arith.addf %312, %317 : vector<8x256xf32>
    %319 = vector.extract_strided_slice %0 {offsets = [56, 2], sizes = [8, 1], strides = [1, 1]} : vector<64x25xf32> to vector<8x1xf32>
    %320 = vector.extract_strided_slice %257 {offsets = [2, 0], sizes = [1, 256], strides = [1, 1]} : vector<16x256xf32> to vector<1x256xf32>
    %321 = vector.broadcast %319 : vector<8x1xf32> to vector<8x256xf32>
    %322 = vector.broadcast %320 : vector<1x256xf32> to vector<8x256xf32>
    %323 = arith.mulf %321, %322 : vector<8x256xf32>
    %324 = arith.addf %318, %323 : vector<8x256xf32>
    %325 = vector.extract_strided_slice %0 {offsets = [56, 3], sizes = [8, 1], strides = [1, 1]} : vector<64x25xf32> to vector<8x1xf32>
    %326 = vector.extract_strided_slice %257 {offsets = [3, 0], sizes = [1, 256], strides = [1, 1]} : vector<16x256xf32> to vector<1x256xf32>
    %327 = vector.broadcast %325 : vector<8x1xf32> to vector<8x256xf32>
    %328 = vector.broadcast %326 : vector<1x256xf32> to vector<8x256xf32>
    %329 = arith.mulf %327, %328 : vector<8x256xf32>
    %330 = arith.addf %324, %329 : vector<8x256xf32>
    %331 = vector.extract_strided_slice %0 {offsets = [56, 4], sizes = [8, 1], strides = [1, 1]} : vector<64x25xf32> to vector<8x1xf32>
    %332 = vector.extract_strided_slice %257 {offsets = [4, 0], sizes = [1, 256], strides = [1, 1]} : vector<16x256xf32> to vector<1x256xf32>
    %333 = vector.broadcast %331 : vector<8x1xf32> to vector<8x256xf32>
    %334 = vector.broadcast %332 : vector<1x256xf32> to vector<8x256xf32>
    %335 = arith.mulf %333, %334 : vector<8x256xf32>
    %336 = arith.addf %330, %335 : vector<8x256xf32>
    %337 = vector.extract_strided_slice %0 {offsets = [56, 5], sizes = [8, 1], strides = [1, 1]} : vector<64x25xf32> to vector<8x1xf32>
    %338 = vector.extract_strided_slice %257 {offsets = [5, 0], sizes = [1, 256], strides = [1, 1]} : vector<16x256xf32> to vector<1x256xf32>
    %339 = vector.broadcast %337 : vector<8x1xf32> to vector<8x256xf32>
    %340 = vector.broadcast %338 : vector<1x256xf32> to vector<8x256xf32>
    %341 = arith.mulf %339, %340 : vector<8x256xf32>
    %342 = arith.addf %336, %341 : vector<8x256xf32>
    %343 = vector.extract_strided_slice %0 {offsets = [56, 6], sizes = [8, 1], strides = [1, 1]} : vector<64x25xf32> to vector<8x1xf32>
    %344 = vector.extract_strided_slice %257 {offsets = [6, 0], sizes = [1, 256], strides = [1, 1]} : vector<16x256xf32> to vector<1x256xf32>
    %345 = vector.broadcast %343 : vector<8x1xf32> to vector<8x256xf32>
    %346 = vector.broadcast %344 : vector<1x256xf32> to vector<8x256xf32>
    %347 = arith.mulf %345, %346 : vector<8x256xf32>
    %348 = arith.addf %342, %347 : vector<8x256xf32>
    %349 = vector.extract_strided_slice %0 {offsets = [56, 7], sizes = [8, 1], strides = [1, 1]} : vector<64x25xf32> to vector<8x1xf32>
    %350 = vector.extract_strided_slice %257 {offsets = [7, 0], sizes = [1, 256], strides = [1, 1]} : vector<16x256xf32> to vector<1x256xf32>
    %351 = vector.broadcast %349 : vector<8x1xf32> to vector<8x256xf32>
    %352 = vector.broadcast %350 : vector<1x256xf32> to vector<8x256xf32>
    %353 = arith.mulf %351, %352 : vector<8x256xf32>
    %354 = arith.addf %348, %353 : vector<8x256xf32>
    %355 = vector.extract_strided_slice %0 {offsets = [56, 8], sizes = [8, 1], strides = [1, 1]} : vector<64x25xf32> to vector<8x1xf32>
    %356 = vector.extract_strided_slice %257 {offsets = [8, 0], sizes = [1, 256], strides = [1, 1]} : vector<16x256xf32> to vector<1x256xf32>
    %357 = vector.broadcast %355 : vector<8x1xf32> to vector<8x256xf32>
    %358 = vector.broadcast %356 : vector<1x256xf32> to vector<8x256xf32>
    %359 = arith.mulf %357, %358 : vector<8x256xf32>
    %360 = arith.addf %354, %359 : vector<8x256xf32>
    %361 = vector.extract_strided_slice %0 {offsets = [56, 9], sizes = [8, 1], strides = [1, 1]} : vector<64x25xf32> to vector<8x1xf32>
    %362 = vector.extract_strided_slice %257 {offsets = [9, 0], sizes = [1, 256], strides = [1, 1]} : vector<16x256xf32> to vector<1x256xf32>
    %363 = vector.broadcast %361 : vector<8x1xf32> to vector<8x256xf32>
    %364 = vector.broadcast %362 : vector<1x256xf32> to vector<8x256xf32>
    %365 = arith.mulf %363, %364 : vector<8x256xf32>
    %366 = arith.addf %360, %365 : vector<8x256xf32>
    %367 = vector.extract_strided_slice %0 {offsets = [56, 10], sizes = [8, 1], strides = [1, 1]} : vector<64x25xf32> to vector<8x1xf32>
    %368 = vector.extract_strided_slice %257 {offsets = [10, 0], sizes = [1, 256], strides = [1, 1]} : vector<16x256xf32> to vector<1x256xf32>
    %369 = vector.broadcast %367 : vector<8x1xf32> to vector<8x256xf32>
    %370 = vector.broadcast %368 : vector<1x256xf32> to vector<8x256xf32>
    %371 = arith.mulf %369, %370 : vector<8x256xf32>
    %372 = arith.addf %366, %371 : vector<8x256xf32>
    %373 = vector.extract_strided_slice %0 {offsets = [56, 11], sizes = [8, 1], strides = [1, 1]} : vector<64x25xf32> to vector<8x1xf32>
    %374 = vector.extract_strided_slice %257 {offsets = [11, 0], sizes = [1, 256], strides = [1, 1]} : vector<16x256xf32> to vector<1x256xf32>
    %375 = vector.broadcast %373 : vector<8x1xf32> to vector<8x256xf32>
    %376 = vector.broadcast %374 : vector<1x256xf32> to vector<8x256xf32>
    %377 = arith.mulf %375, %376 : vector<8x256xf32>
    %378 = arith.addf %372, %377 : vector<8x256xf32>
    %379 = vector.extract_strided_slice %0 {offsets = [56, 12], sizes = [8, 1], strides = [1, 1]} : vector<64x25xf32> to vector<8x1xf32>
    %380 = vector.extract_strided_slice %257 {offsets = [12, 0], sizes = [1, 256], strides = [1, 1]} : vector<16x256xf32> to vector<1x256xf32>
    %381 = vector.broadcast %379 : vector<8x1xf32> to vector<8x256xf32>
    %382 = vector.broadcast %380 : vector<1x256xf32> to vector<8x256xf32>
    %383 = arith.mulf %381, %382 : vector<8x256xf32>
    %384 = arith.addf %378, %383 : vector<8x256xf32>
    %385 = vector.extract_strided_slice %0 {offsets = [56, 13], sizes = [8, 1], strides = [1, 1]} : vector<64x25xf32> to vector<8x1xf32>
    %386 = vector.extract_strided_slice %257 {offsets = [13, 0], sizes = [1, 256], strides = [1, 1]} : vector<16x256xf32> to vector<1x256xf32>
    %387 = vector.broadcast %385 : vector<8x1xf32> to vector<8x256xf32>
    %388 = vector.broadcast %386 : vector<1x256xf32> to vector<8x256xf32>
    %389 = arith.mulf %387, %388 : vector<8x256xf32>
    %390 = arith.addf %384, %389 : vector<8x256xf32>
    %391 = vector.extract_strided_slice %0 {offsets = [56, 14], sizes = [8, 1], strides = [1, 1]} : vector<64x25xf32> to vector<8x1xf32>
    %392 = vector.extract_strided_slice %257 {offsets = [14, 0], sizes = [1, 256], strides = [1, 1]} : vector<16x256xf32> to vector<1x256xf32>
    %393 = vector.broadcast %391 : vector<8x1xf32> to vector<8x256xf32>
    %394 = vector.broadcast %392 : vector<1x256xf32> to vector<8x256xf32>
    %395 = arith.mulf %393, %394 : vector<8x256xf32>
    %396 = arith.addf %390, %395 : vector<8x256xf32>
    %397 = vector.extract_strided_slice %0 {offsets = [56, 15], sizes = [8, 1], strides = [1, 1]} : vector<64x25xf32> to vector<8x1xf32>
    %398 = vector.extract_strided_slice %257 {offsets = [15, 0], sizes = [1, 256], strides = [1, 1]} : vector<16x256xf32> to vector<1x256xf32>
    %399 = vector.broadcast %397 : vector<8x1xf32> to vector<8x256xf32>
    %400 = vector.broadcast %398 : vector<1x256xf32> to vector<8x256xf32>
    %401 = arith.mulf %399, %400 : vector<8x256xf32>
    %402 = arith.addf %396, %401 : vector<8x256xf32>
    %403 = vector.extract_strided_slice %0 {offsets = [56, 16], sizes = [8, 1], strides = [1, 1]} : vector<64x25xf32> to vector<8x1xf32>
    %404 = vector.extract_strided_slice %307 {offsets = [0, 0], sizes = [1, 256], strides = [1, 1]} : vector<8x256xf32> to vector<1x256xf32>
    %405 = vector.broadcast %403 : vector<8x1xf32> to vector<8x256xf32>
    %406 = vector.broadcast %404 : vector<1x256xf32> to vector<8x256xf32>
    %407 = arith.mulf %405, %406 : vector<8x256xf32>
    %408 = arith.addf %402, %407 : vector<8x256xf32>
    %409 = vector.extract_strided_slice %0 {offsets = [56, 17], sizes = [8, 1], strides = [1, 1]} : vector<64x25xf32> to vector<8x1xf32>
    %410 = vector.extract_strided_slice %307 {offsets = [1, 0], sizes = [1, 256], strides = [1, 1]} : vector<8x256xf32> to vector<1x256xf32>
    %411 = vector.broadcast %409 : vector<8x1xf32> to vector<8x256xf32>
    %412 = vector.broadcast %410 : vector<1x256xf32> to vector<8x256xf32>
    %413 = arith.mulf %411, %412 : vector<8x256xf32>
    %414 = arith.addf %408, %413 : vector<8x256xf32>
    %415 = vector.extract_strided_slice %0 {offsets = [56, 18], sizes = [8, 1], strides = [1, 1]} : vector<64x25xf32> to vector<8x1xf32>
    %416 = vector.extract_strided_slice %307 {offsets = [2, 0], sizes = [1, 256], strides = [1, 1]} : vector<8x256xf32> to vector<1x256xf32>
    %417 = vector.broadcast %415 : vector<8x1xf32> to vector<8x256xf32>
    %418 = vector.broadcast %416 : vector<1x256xf32> to vector<8x256xf32>
    %419 = arith.mulf %417, %418 : vector<8x256xf32>
    %420 = arith.addf %414, %419 : vector<8x256xf32>
    %421 = vector.extract_strided_slice %0 {offsets = [56, 19], sizes = [8, 1], strides = [1, 1]} : vector<64x25xf32> to vector<8x1xf32>
    %422 = vector.extract_strided_slice %307 {offsets = [3, 0], sizes = [1, 256], strides = [1, 1]} : vector<8x256xf32> to vector<1x256xf32>
    %423 = vector.broadcast %421 : vector<8x1xf32> to vector<8x256xf32>
    %424 = vector.broadcast %422 : vector<1x256xf32> to vector<8x256xf32>
    %425 = arith.mulf %423, %424 : vector<8x256xf32>
    %426 = arith.addf %420, %425 : vector<8x256xf32>
    %427 = vector.extract_strided_slice %0 {offsets = [56, 20], sizes = [8, 1], strides = [1, 1]} : vector<64x25xf32> to vector<8x1xf32>
    %428 = vector.extract_strided_slice %307 {offsets = [4, 0], sizes = [1, 256], strides = [1, 1]} : vector<8x256xf32> to vector<1x256xf32>
    %429 = vector.broadcast %427 : vector<8x1xf32> to vector<8x256xf32>
    %430 = vector.broadcast %428 : vector<1x256xf32> to vector<8x256xf32>
    %431 = arith.mulf %429, %430 : vector<8x256xf32>
    %432 = arith.addf %426, %431 : vector<8x256xf32>
    %433 = vector.extract_strided_slice %0 {offsets = [56, 21], sizes = [8, 1], strides = [1, 1]} : vector<64x25xf32> to vector<8x1xf32>
    %434 = vector.extract_strided_slice %307 {offsets = [5, 0], sizes = [1, 256], strides = [1, 1]} : vector<8x256xf32> to vector<1x256xf32>
    %435 = vector.broadcast %433 : vector<8x1xf32> to vector<8x256xf32>
    %436 = vector.broadcast %434 : vector<1x256xf32> to vector<8x256xf32>
    %437 = arith.mulf %435, %436 : vector<8x256xf32>
    %438 = arith.addf %432, %437 : vector<8x256xf32>
    %439 = vector.extract_strided_slice %0 {offsets = [56, 22], sizes = [8, 1], strides = [1, 1]} : vector<64x25xf32> to vector<8x1xf32>
    %440 = vector.extract_strided_slice %307 {offsets = [6, 0], sizes = [1, 256], strides = [1, 1]} : vector<8x256xf32> to vector<1x256xf32>
    %441 = vector.broadcast %439 : vector<8x1xf32> to vector<8x256xf32>
    %442 = vector.broadcast %440 : vector<1x256xf32> to vector<8x256xf32>
    %443 = arith.mulf %441, %442 : vector<8x256xf32>
    %444 = arith.addf %438, %443 : vector<8x256xf32>
    %445 = vector.extract_strided_slice %0 {offsets = [56, 23], sizes = [8, 1], strides = [1, 1]} : vector<64x25xf32> to vector<8x1xf32>
    %446 = vector.extract_strided_slice %307 {offsets = [7, 0], sizes = [1, 256], strides = [1, 1]} : vector<8x256xf32> to vector<1x256xf32>
    %447 = vector.broadcast %445 : vector<8x1xf32> to vector<8x256xf32>
    %448 = vector.broadcast %446 : vector<1x256xf32> to vector<8x256xf32>
    %449 = arith.mulf %447, %448 : vector<8x256xf32>
    %450 = arith.addf %444, %449 : vector<8x256xf32>
    %451 = vector.extract_strided_slice %0 {offsets = [56, 24], sizes = [8, 1], strides = [1, 1]} : vector<64x25xf32> to vector<8x1xf32>
    %452 = vector.broadcast %451 : vector<8x1xf32> to vector<8x256xf32>
    %453 = arith.addf %450, %452 : vector<8x256xf32>
    %c0_4 = arith.constant 0 : index
    %c0_5 = arith.constant 0 : index
    %c0_6 = arith.constant 0 : index
    %454 = vector.load %arg3[%c0_4, %c0_5, %c0_6] : memref<1x8x256xf32, #tpu.memory_space<vmem>>, vector<1x8x256xf32>
    %455 = vector.shape_cast %454 : vector<1x8x256xf32> to vector<8x256xf32>
    %456 = vector.shape_cast %453 : vector<8x256xf32> to vector<1x8x256xf32>
    tpu.vector_store %arg3[%c0_4, %c0_5, %c0_6], %456 {strides = array<i32>} : memref<1x8x256xf32, #tpu.memory_space<vmem>>, vector<1x8x256xf32>,
    return
  }
  func.func @transform_0(%arg0: i32) -> (i32, i32, i32) {
    %c0_i32 = arith.constant 0 : i32
    %c0_i32_0 = arith.constant 0 : i32
    %c0_i32_1 = arith.constant 0 : i32
    return %arg0, %c0_i32, %c0_i32_0 : i32, i32, i32
  }
  func.func @transform_1(%arg0: i32) -> (i32, i32) {
    %c0_i32 = arith.constant 0 : i32
    %c0_i32_0 = arith.constant 0 : i32
    %c0_i32_1 = arith.constant 0 : i32
    return %c0_i32, %c0_i32_0 : i32, i32
  }
  func.func @transform_2(%arg0: i32) -> (i32, i32, i32) {
    %c0_i32 = arith.constant 0 : i32
    %c0_i32_0 = arith.constant 0 : i32
    %c0_i32_1 = arith.constant 0 : i32
    return %arg0, %c0_i32, %c0_i32_0 : i32, i32, i32
  }
}

</mosaic_0001>

<bundles_post_ra>
// kernel: network_ess_forward.3
= control target key start
LH: loop header
LB: loop body
LE: loop exit
PB: predicated region body
PF: predicated region fallthrough
CT: control target
= control target key end

     0   :  { %s1814_s18 = smov 0   ;;  %s2405_s0 = inlined_call_operand.vmem [shape: f32[512,8], index: 0, kind: input, shape index: {}]   ;;  %s2406_s1 = inlined_call_operand.vmem [shape: f32[8,16], index: 1, kind: input, shape index: {}]   ;;  %s2407_s2 = inlined_call_operand.vmem [shape: f32[1,16], index: 2, kind: input, shape index: {}]   ;;  %s2408_s3 = inlined_call_operand.vmem [shape: f32[16,2], index: 3, kind: input, shape index: {}]   ;;  %s2409_s4 = inlined_call_operand.vmem [shape: f32[1,2], index: 4, kind: input, shape index: {}]   ;;  %s2410_s5 = inlined_call_operand.vmem [shape: f32[512,2], index: 5, kind: output, shape index: {}]  }
   0x1 LB: > { %s1394_s19 = sadd.s32 4294967295, %s1782_s18   ;;  %p1398_p0 = scmp.ge.s32.totalorder %s1782_s18, 1  ;;  %s1782_s18 = sphi %s1814_s18, %s15_s18  }
   0x2   : > { %p188_p1 = scmp.lt.s32.totalorder %s1782_s18, 3 }
   0x4   : > { %p189_p2 = pnand %p1398_p0, %p188_p1 }
   0x5   : > { %s1399_s22 = sshll.u32 (!%p189_p2), %s1394_s19, 5 }
   0x6   : > { %192 = sbr.rel (%p189_p2) target bundleno = 789 (0x315), region = 40  ;;  %p217_p3 = scmp.lt.s32.totalorder (!%p189_p2), %s1399_s22, 63 }
   0xb   : > { %v260_v0 = vld [vmem:[%s2406_s1] sm:$0xff]  ;;  %s2412_s22 = smov (!%p217_p3, %s1399_s22), 63  ;;  %vm268_vm0 = vcmask 64512   ;;  %v623_v33 = vld [vmem:[%s2408_s3 + $0x8] sm:$0xff]  ;;  %vm631_vm1 = vcmask 130048   ;;  %vm953_vm2 = vcmask 15360  }
   0xc   : > { %1538 = vmatprep.subr.mxu0 %v260_v0  ;;  %s1400_s23 = sshll.u32 %s2412_s22, 3  ;;  %1588 = vmatprep.subr.mxu1 %v623_v33  ;;  %v622_v34 = vld [vmem:[%s2408_s3] sm:$0xff] }
   0xd   : > { %1539 = vmatpush3.msra.mxu0 %v260_v0  ;;  %s1833_s26 = scalar_lea.vmem %s2405_s0, %s1400_s23  ;;  %1589 = vmatpush3.msra.mxu1 %v623_v33  ;;  %v1908_v35 = vld [vmem:[%s2407_s2] ss:$0 sm:$0xff]  ;;  %s2304_s12 = scalar_lea.vmem %s2410_s5, %s1400_s23 }
   0xe   : > { %v228_v1 = vld [vmem:[%s1833_s26] sm:$0xff]  ;;  %v229_v2 = vld [vmem:[%s1833_s26 + $0x8] sm:$0xff]  ;;  %v230_v3 = vld [vmem:[%s1833_s26 + $0x10] sm:$0xff]  ;;  %1590 = vmatprep.subr.mxu1 %v622_v34 }
   0xf   : > { %1540 = vmatprep.mubr.msk.f32.mxu0 %vm268_vm0, %v228_v1  ;;  %v231_v4 = vld [vmem:[%s1833_s26 + $0x18] sm:$0xff]  ;;  %v232_v5 = vld [vmem:[%s1833_s26 + $0x20] sm:$0xff]  ;;  %v233_v6 = vld [vmem:[%s1833_s26 + $0x28] sm:$0xff]  ;;  %1591 = vmatpush3.msra.mxu1 %v622_v34 }
  0x10   : > { %1541 = vmatmul.mubr.msk.f32.vlgmr.msra.gmra.mxu0 %vm268_vm0, %v229_v2  ;;  %v234_v7 = vld [vmem:[%s1833_s26 + $0x30] sm:$0xff]  ;;  %v235_v8 = vld [vmem:[%s1833_s26 + $0x38] sm:$0xff]  ;;  %v236_v9 = vld [vmem:[%s1833_s26 + $0x40] sm:$0xff] }
  0x11   : > { %1543 = vmatprep.mubr.msk.f32.mxu0 %vm268_vm0, %v230_v3  ;;  %v237_v10 = vld [vmem:[%s1833_s26 + $0x48] sm:$0xff]  ;;  %v238_v11 = vld [vmem:[%s1833_s26 + $0x50] sm:$0xff]  ;;  %v239_v12 = vld [vmem:[%s1833_s26 + $0x58] sm:$0xff] }
  0x12   : > { %v240_v13 = vld [vmem:[%s1833_s26 + $0x60] sm:$0xff]  ;;  %v241_v14 = vld [vmem:[%s1833_s26 + $0x68] sm:$0xff]  ;;  %v242_v15 = vld [vmem:[%s1833_s26 + $0x70] sm:$0xff] }
  0x13   : > { %v243_v16 = vld [vmem:[%s1833_s26 + $0x78] sm:$0xff]  ;;  %v244_v17 = vld [vmem:[%s1833_s26 + $0x80] sm:$0xff]  ;;  %v245_v18 = vld [vmem:[%s1833_s26 + $0x88] sm:$0xff] }
  0x14   : > { %1544 = vmatmul.mubr.msk.f32.gmra.mxu0 %vm268_vm0, %v231_v4  ;;  %v246_v19 = vld [vmem:[%s1833_s26 + $0x90] sm:$0xff]  ;;  %v247_v20 = vld [vmem:[%s1833_s26 + $0x98] sm:$0xff]  ;;  %v248_v21 = vld [vmem:[%s1833_s26 + $0xa0] sm:$0xff] }
  0x15   : > { %1546 = vmatprep.mubr.msk.f32.mxu0 %vm268_vm0, %v232_v5  ;;  %v249_v22 = vld [vmem:[%s1833_s26 + $0xa8] sm:$0xff]  ;;  %v250_v23 = vld [vmem:[%s1833_s26 + $0xb0] sm:$0xff]  ;;  %v251_v24 = vld [vmem:[%s1833_s26 + $0xb8] sm:$0xff] }
  0x16   : > { %v252_v25 = vld [vmem:[%s1833_s26 + $0xc0] sm:$0xff]  ;;  %v253_v26 = vld [vmem:[%s1833_s26 + $0xc8] sm:$0xff]  ;;  %v254_v27 = vld [vmem:[%s1833_s26 + $0xd0] sm:$0xff] }
  0x17   : > { %v255_v28 = vld [vmem:[%s1833_s26 + $0xd8] sm:$0xff]  ;;  %v256_v29 = vld [vmem:[%s1833_s26 + $0xe0] sm:$0xff]  ;;  %v257_v30 = vld [vmem:[%s1833_s26 + $0xe8] sm:$0xff] }
  0x18   : > { %1547 = vmatmul.mubr.msk.f32.gmra.mxu0 %vm268_vm0, %v233_v6  ;;  %v258_v31 = vld [vmem:[%s1833_s26 + $0xf0] sm:$0xff]  ;;  %v259_v32 = vld [vmem:[%s1833_s26 + $0xf8] sm:$0xff] }
  0x19   : > { %1549 = vmatprep.mubr.msk.f32.mxu0 %vm268_vm0, %v234_v7 }
  0x1c   : > { %1550 = vmatmul.mubr.msk.f32.gmra.mxu0 %vm268_vm0, %v235_v8 }
  0x1d   : > { %1552 = vmatprep.mubr.msk.f32.mxu0 %vm268_vm0, %v236_v9 }
  0x20   : > { %1553 = vmatmul.mubr.msk.f32.gmra.mxu0 %vm268_vm0, %v237_v10 }
  0x21   : > { %1555 = vmatprep.mubr.msk.f32.mxu0 %vm268_vm0, %v238_v11 }
  0x24   : > { %1556 = vmatmul.mubr.msk.f32.gmra.mxu0 %vm268_vm0, %v239_v12 }
  0x25   : > { %1558 = vmatprep.mubr.msk.f32.mxu0 %vm268_vm0, %v240_v13 }
  0x28   : > { %1559 = vmatmul.mubr.msk.f32.gmra.mxu0 %vm268_vm0, %v241_v14 }
  0x29   : > { %1561 = vmatprep.mubr.msk.f32.mxu0 %vm268_vm0, %v242_v15 }
  0x2c   : > { %1562 = vmatmul.mubr.msk.f32.gmra.mxu0 %vm268_vm0, %v243_v16 }
  0x2d   : > { %1564 = vmatprep.mubr.msk.f32.mxu0 %vm268_vm0, %v244_v17 }
  0x30   : > { %1565 = vmatmul.mubr.msk.f32.gmra.mxu0 %vm268_vm0, %v245_v18 }
  0x31   : > { %1567 = vmatprep.mubr.msk.f32.mxu0 %vm268_vm0, %v246_v19 }
  0x34   : > { %1568 = vmatmul.mubr.msk.f32.gmra.mxu0 %vm268_vm0, %v247_v20 }
  0x35   : > { %1570 = vmatprep.mubr.msk.f32.mxu0 %vm268_vm0, %v248_v21 }
  0x38   : > { %1571 = vmatmul.mubr.msk.f32.gmra.mxu0 %vm268_vm0, %v249_v22 }
  0x39   : > { %1573 = vmatprep.mubr.msk.f32.mxu0 %vm268_vm0, %v250_v23 }
  0x3c   : > { %1574 = vmatmul.mubr.msk.f32.gmra.mxu0 %vm268_vm0, %v251_v24 }
  0x3d   : > { %1576 = vmatprep.mubr.msk.f32.mxu0 %vm268_vm0, %v252_v25 }
  0x40   : > { %1577 = vmatmul.mubr.msk.f32.gmra.mxu0 %vm268_vm0, %v253_v26 }
  0x41   : > { %1579 = vmatprep.mubr.msk.f32.mxu0 %vm268_vm0, %v254_v27 }
  0x44   : > { %1580 = vmatmul.mubr.msk.f32.gmra.mxu0 %vm268_vm0, %v255_v28 }
  0x45   : > { %1582 = vmatprep.mubr.msk.f32.mxu0 %vm268_vm0, %v256_v29 }
  0x48   : > { %1583 = vmatmul.mubr.msk.f32.gmra.mxu0 %vm268_vm0, %v257_v30 }
  0x49   : > { %1585 = vmatprep.mubr.msk.f32.mxu0 %vm268_vm0, %v258_v31 }
  0x4c   : > { %1586 = vmatmul.mubr.msk.f32.gmra.mxu0 %vm268_vm0, %v259_v32 }
  0xd0   : > { %v1542_v36 = vpop.f32.mrf.mxu0 }
  0xd1   : > { %v437_v37 = vadd.f32 %v1542_v36, %v1908_v35 }
  0xd2   : > { %v431_v38 = vpop.f32.mrf.mxu0 }
  0xd3   : > { %v432_v39 = vadd.f32 %v1908_v35, %v431_v38  ;;  %v591_v42 = vmax.f32 %v437_v37, 0.0 }
  0xd4   : > { %v1545_v40 = vpop.f32.mrf.mxu0 }
  0xd5   : > { %v590_v41 = vmax.f32 %v432_v39, 0.0  ;;  %v447_v43 = vadd.f32 %v1545_v40, %v1908_v35 }
  0xd6   : > { %v441_v44 = vpop.f32.mrf.mxu0 }
  0xd7   : > { %v442_v45 = vadd.f32 %v1908_v35, %v441_v44  ;;  %1592 = vmatprep.mubr.msk.f32.mxu1 %vm631_vm1, %v590_v41  ;;  %v593_v49 = vmax.f32 %v447_v43, 0.0 }
  0xd8   : > { %v1548_v46 = vpop.f32.mrf.mxu0  ;;  %1593 = vmatmul.mubr.msk.f32.vlgmr.msra.gmra.mxu1 %vm631_vm1, %v591_v42 }
  0xd9   : > { %v592_v47 = vmax.f32 %v442_v45, 0.0  ;;  %v457_v48 = vadd.f32 %v1548_v46, %v1908_v35 }
  0xda   : > { %v451_v50 = vpop.f32.mrf.mxu0 }
  0xdb   : > { %v452_v51 = vadd.f32 %v1908_v35, %v451_v50  ;;  %1595 = vmatprep.mubr.msk.f32.mxu1 %vm631_vm1, %v592_v47  ;;  %v595_v52 = vmax.f32 %v457_v48, 0.0 }
  0xdc   : > { %v1551_v53 = vpop.f32.mrf.mxu0  ;;  %1596 = vmatmul.mubr.msk.f32.gmra.mxu1 %vm631_vm1, %v593_v49 }
  0xdd   : > { %v594_v54 = vmax.f32 %v452_v51, 0.0  ;;  %v467_v55 = vadd.f32 %v1551_v53, %v1908_v35 }
  0xde   : > { %v461_v56 = vpop.f32.mrf.mxu0 }
  0xdf   : > { %v462_v57 = vadd.f32 %v1908_v35, %v461_v56  ;;  %1598 = vmatprep.mubr.msk.f32.mxu1 %vm631_vm1, %v594_v54  ;;  %v597_v58 = vmax.f32 %v467_v55, 0.0 }
  0xe0   : > { %v1554_v59 = vpop.f32.mrf.mxu0  ;;  %1599 = vmatmul.mubr.msk.f32.gmra.mxu1 %vm631_vm1, %v595_v52 }
  0xe1   : > { %v596_v60 = vmax.f32 %v462_v57, 0.0  ;;  %v477_v61 = vadd.f32 %v1554_v59, %v1908_v35 }
  0xe2   : > { %v471_v62 = vpop.f32.mrf.mxu0 }
  0xe3   : > { %v472_v63 = vadd.f32 %v1908_v35, %v471_v62  ;;  %1601 = vmatprep.mubr.msk.f32.mxu1 %vm631_vm1, %v596_v60  ;;  %v599_v0 = vmax.f32 %v477_v61, 0.0 }
  0xe4   : > { %v1557_v1 = vpop.f32.mrf.mxu0  ;;  %1602 = vmatmul.mubr.msk.f32.gmra.mxu1 %vm631_vm1, %v597_v58 }
  0xe5   : > { %v598_v2 = vmax.f32 %v472_v63, 0.0  ;;  %v487_v3 = vadd.f32 %v1557_v1, %v1908_v35 }
  0xe6   : > { %v481_v4 = vpop.f32.mrf.mxu0 }
  0xe7   : > { %v482_v5 = vadd.f32 %v1908_v35, %v481_v4  ;;  %1604 = vmatprep.mubr.msk.f32.mxu1 %vm631_vm1, %v598_v2  ;;  %v601_v6 = vmax.f32 %v487_v3, 0.0 }
  0xe8   : > { %v1560_v7 = vpop.f32.mrf.mxu0  ;;  %1605 = vmatmul.mubr.msk.f32.gmra.mxu1 %vm631_vm1, %v599_v0 }
  0xe9   : > { %v600_v8 = vmax.f32 %v482_v5, 0.0  ;;  %v497_v9 = vadd.f32 %v1560_v7, %v1908_v35  ;;  %v1977_v5 = vld [vmem:[%s2409_s4] ss:$0 sm:$0xff] }
  0xea   : > { %v491_v10 = vpop.f32.mrf.mxu0 }
  0xeb   : > { %v492_v11 = vadd.f32 %v1908_v35, %v491_v10  ;;  %1607 = vmatprep.mubr.msk.f32.mxu1 %vm631_vm1, %v600_v8  ;;  %v603_v12 = vmax.f32 %v497_v9, 0.0 }
  0xec   : > { %v1563_v13 = vpop.f32.mrf.mxu0  ;;  %1608 = vmatmul.mubr.msk.f32.gmra.mxu1 %vm631_vm1, %v601_v6 }
  0xed   : > { %v602_v14 = vmax.f32 %v492_v11, 0.0  ;;  %v507_v15 = vadd.f32 %v1563_v13, %v1908_v35 }
  0xee   : > { %v501_v16 = vpop.f32.mrf.mxu0 }
  0xef   : > { %v502_v17 = vadd.f32 %v1908_v35, %v501_v16  ;;  %1610 = vmatprep.mubr.msk.f32.mxu1 %vm631_vm1, %v602_v14  ;;  %v605_v18 = vmax.f32 %v507_v15, 0.0 }
  0xf0   : > { %v1566_v19 = vpop.f32.mrf.mxu0  ;;  %1611 = vmatmul.mubr.msk.f32.gmra.mxu1 %vm631_vm1, %v603_v12 }
  0xf1   : > { %v604_v20 = vmax.f32 %v502_v17, 0.0  ;;  %v517_v21 = vadd.f32 %v1566_v19, %v1908_v35 }
  0xf2   : > { %v511_v22 = vpop.f32.mrf.mxu0 }
  0xf3   : > { %v512_v23 = vadd.f32 %v1908_v35, %v511_v22  ;;  %1613 = vmatprep.mubr.msk.f32.mxu1 %vm631_vm1, %v604_v20  ;;  %v607_v24 = vmax.f32 %v517_v21, 0.0 }
  0xf4   : > { %v1569_v25 = vpop.f32.mrf.mxu0  ;;  %1614 = vmatmul.mubr.msk.f32.gmra.mxu1 %vm631_vm1, %v605_v18 }
  0xf5   : > { %v606_v26 = vmax.f32 %v512_v23, 0.0  ;;  %v527_v27 = vadd.f32 %v1569_v25, %v1908_v35 }
  0xf6   : > { %v521_v28 = vpop.f32.mrf.mxu0 }
  0xf7   : > { %v522_v29 = vadd.f32 %v1908_v35, %v521_v28  ;;  %1616 = vmatprep.mubr.msk.f32.mxu1 %vm631_vm1, %v606_v26  ;;  %v609_v30 = vmax.f32 %v527_v27, 0.0 }
  0xf8   : > { %v1572_v31 = vpop.f32.mrf.mxu0  ;;  %1617 = vmatmul.mubr.msk.f32.gmra.mxu1 %vm631_vm1, %v607_v24 }
  0xf9   : > { %v608_v32 = vmax.f32 %v522_v29, 0.0  ;;  %v537_v33 = vadd.f32 %v1572_v31, %v1908_v35 }
  0xfa   : > { %v531_v34 = vpop.f32.mrf.mxu0 }
  0xfb   : > { %v532_v36 = vadd.f32 %v1908_v35, %v531_v34  ;;  %1619 = vmatprep.mubr.msk.f32.mxu1 %vm631_vm1, %v608_v32  ;;  %v611_v37 = vmax.f32 %v537_v33, 0.0 }
  0xfc   : > { %v1575_v38 = vpop.f32.mrf.mxu0  ;;  %1620 = vmatmul.mubr.msk.f32.gmra.mxu1 %vm631_vm1, %v609_v30 }
  0xfd   : > { %v610_v39 = vmax.f32 %v532_v36, 0.0  ;;  %v547_v40 = vadd.f32 %v1575_v38, %v1908_v35 }
  0xfe   : > { %v541_v41 = vpop.f32.mrf.mxu0 }
  0xff   : > { %v542_v42 = vadd.f32 %v1908_v35, %v541_v41  ;;  %1622 = vmatprep.mubr.msk.f32.mxu1 %vm631_vm1, %v610_v39  ;;  %v613_v43 = vmax.f32 %v547_v40, 0.0 }
 0x100   : > { %v1578_v44 = vpop.f32.mrf.mxu0  ;;  %1623 = vmatmul.mubr.msk.f32.gmra.mxu1 %vm631_vm1, %v611_v37 }
 0x101   : > { %v612_v45 = vmax.f32 %v542_v42, 0.0  ;;  %v557_v46 = vadd.f32 %v1578_v44, %v1908_v35 }
 0x102   : > { %v551_v47 = vpop.f32.mrf.mxu0 }
 0x103   : > { %v552_v48 = vadd.f32 %v1908_v35, %v551_v47  ;;  %1625 = vmatprep.mubr.msk.f32.mxu1 %vm631_vm1, %v612_v45  ;;  %v615_v49 = vmax.f32 %v557_v46, 0.0 }
 0x104   : > { %v1581_v50 = vpop.f32.mrf.mxu0  ;;  %1626 = vmatmul.mubr.msk.f32.gmra.mxu1 %vm631_vm1, %v613_v43 }
 0x105   : > { %v614_v51 = vmax.f32 %v552_v48, 0.0  ;;  %v567_v52 = vadd.f32 %v1581_v50, %v1908_v35 }
 0x106   : > { %v561_v53 = vpop.f32.mrf.mxu0 }
 0x107   : > { %v562_v54 = vadd.f32 %v1908_v35, %v561_v53  ;;  %1628 = vmatprep.mubr.msk.f32.mxu1 %vm631_vm1, %v614_v51  ;;  %v617_v55 = vmax.f32 %v567_v52, 0.0 }
 0x108   : > { %v1584_v56 = vpop.f32.mrf.mxu0  ;;  %1629 = vmatmul.mubr.msk.f32.gmra.mxu1 %vm631_vm1, %v615_v49 }
 0x109   : > { %v616_v57 = vmax.f32 %v562_v54, 0.0  ;;  %v577_v58 = vadd.f32 %v1584_v56, %v1908_v35 }
 0x10a   : > { %v571_v59 = vpop.f32.mrf.mxu0 }
 0x10b   : > { %v572_v60 = vadd.f32 %v1908_v35, %v571_v59  ;;  %1631 = vmatprep.mubr.msk.f32.mxu1 %vm631_vm1, %v616_v57  ;;  %v619_v61 = vmax.f32 %v577_v58, 0.0 }
 0x10c   : > { %v1587_v62 = vpop.f32.mrf.mxu0  ;;  %1632 = vmatmul.mubr.msk.f32.gmra.mxu1 %vm631_vm1, %v617_v55 }
 0x10d   : > { %v618_v63 = vmax.f32 %v572_v60, 0.0  ;;  %v587_v0 = vadd.f32 %v1587_v62, %v1908_v35 }
 0x10e   : > { %v581_v1 = vpop.f32.mrf.mxu0 }
 0x10f   : > { %v582_v2 = vadd.f32 %v1908_v35, %v581_v1  ;;  %1634 = vmatprep.mubr.msk.f32.mxu1 %vm631_vm1, %v618_v63  ;;  %v621_v3 = vmax.f32 %v587_v0, 0.0 }
 0x110   : > { %1635 = vmatmul.mubr.msk.f32.gmra.mxu1 %vm631_vm1, %v619_v61 }
 0x111   : > { %v620_v4 = vmax.f32 %v582_v2, 0.0 }
 0x113   : > { %1637 = vmatprep.mubr.msk.f32.mxu1 %vm631_vm1, %v620_v4 }
 0x114   : > { %1638 = vmatmul.mubr.msk.f32.gmra.mxu1 %vm631_vm1, %v621_v3 }
 0x198   : > { %v1594_v6 = vpop.f32.mrf.mxu1 }
 0x199   : > { %v1980_v7 = vadd.f32 %v1594_v6, %v1977_v5 }
 0x19a   : > { %v794_v35 = vpop.f32.mrf.mxu1 }
 0x19b   : > { %v1983_v8 = vadd.f32 %v1977_v5, %v794_v35  ;;  %v957_v9 = vsel %vm953_vm2, %v1980_v7, -inf }
 0x19c   : > { %958 = vmax.xlane.f32.xlu0 %v957_v9  ;;  %v1597_v10 = vpop.f32.mrf.mxu1 }
 0x19d   : > { %v1988_v11 = vadd.f32 %v1597_v10, %v1977_v5  ;;  %v954_v15 = vsel %vm953_vm2, %v1983_v8, -inf }
 0x19e   : > { %v804_v12 = vpop.f32.mrf.mxu1 }
 0x19f   : > { %v1991_v13 = vadd.f32 %v1977_v5, %v804_v12  ;;  %v963_v14 = vsel %vm953_vm2, %v1988_v11, -inf }
 0x1a0   : > { %964 = vmax.xlane.f32.xlu1 %v963_v14  ;;  %v1600_v16 = vpop.f32.mrf.mxu1  ;;  %955 = vmax.xlane.f32.xlu0 %v954_v15 }
 0x1a1   : > { %v1998_v18 = vadd.f32 %v1600_v16, %v1977_v5  ;;  %v960_v20 = vsel %vm953_vm2, %v1991_v13, -inf }
 0x1a2   : > { %v814_v17 = vpop.f32.mrf.mxu1 }
 0x1a3   : > { %v2001_v19 = vadd.f32 %v1977_v5, %v814_v17  ;;  %v969_v26 = vsel %vm953_vm2, %v1998_v18, -inf }
 0x1a4   : > { %v1603_v21 = vpop.f32.mrf.mxu1  ;;  %961 = vmax.xlane.f32.xlu1 %v960_v20 }
 0x1a5   : > { %v966_v22 = vsel %vm953_vm2, %v2001_v19, -inf  ;;  %v2008_v24 = vadd.f32 %v1603_v21, %v1977_v5 }
 0x1a6   : > { %v824_v23 = vpop.f32.mrf.mxu1  ;;  %967 = vmax.xlane.f32.xlu0 %v966_v22 }
 0x1a7   : > { %v2011_v25 = vadd.f32 %v1977_v5, %v824_v23  ;;  %v975_v32 = vsel %vm953_vm2, %v2008_v24, -inf }
 0x1a8   : > { %v1606_v27 = vpop.f32.mrf.mxu1  ;;  %970 = vmax.xlane.f32.xlu1 %v969_v26 }
 0x1a9   : > { %v972_v28 = vsel %vm953_vm2, %v2011_v25, -inf  ;;  %v2018_v30 = vadd.f32 %v1606_v27, %v1977_v5 }
 0x1aa   : > { %v834_v29 = vpop.f32.mrf.mxu1  ;;  %973 = vmax.xlane.f32.xlu0 %v972_v28 }
 0x1ab   : > { %v2021_v31 = vadd.f32 %v1977_v5, %v834_v29  ;;  %v981_v39 = vsel %vm953_vm2, %v2018_v30, -inf }
 0x1ac   : > { %v1609_v33 = vpop.f32.mrf.mxu1  ;;  %976 = vmax.xlane.f32.xlu1 %v975_v32 }
 0x1ad   : > { %v978_v34 = vsel %vm953_vm2, %v2021_v31, -inf  ;;  %v2028_v37 = vadd.f32 %v1609_v33, %v1977_v5 }
 0x1ae   : > { %v844_v36 = vpop.f32.mrf.mxu1  ;;  %979 = vmax.xlane.f32.xlu0 %v978_v34 }
 0x1af   : > { %v2031_v38 = vadd.f32 %v1977_v5, %v844_v36  ;;  %v987_v45 = vsel %vm953_vm2, %v2028_v37, -inf }
 0x1b0   : > { %v1612_v40 = vpop.f32.mrf.mxu1  ;;  %982 = vmax.xlane.f32.xlu1 %v981_v39 }
 0x1b1   : > { %v984_v41 = vsel %vm953_vm2, %v2031_v38, -inf  ;;  %v2038_v43 = vadd.f32 %v1612_v40, %v1977_v5 }
 0x1b2   : > { %v854_v42 = vpop.f32.mrf.mxu1  ;;  %985 = vmax.xlane.f32.xlu0 %v984_v41 }
 0x1b3   : > { %v2041_v44 = vadd.f32 %v1977_v5, %v854_v42  ;;  %v993_v51 = vsel %vm953_vm2, %v2038_v43, -inf }
 0x1b4   : > { %v1615_v46 = vpop.f32.mrf.mxu1  ;;  %988 = vmax.xlane.f32.xlu1 %v987_v45 }
 0x1b5   : > { %v990_v47 = vsel %vm953_vm2, %v2041_v44, -inf  ;;  %v2048_v49 = vadd.f32 %v1615_v46, %v1977_v5 }
 0x1b6   : > { %v864_v48 = vpop.f32.mrf.mxu1  ;;  %991 = vmax.xlane.f32.xlu0 %v990_v47 }
 0x1b7   : > { %v2051_v50 = vadd.f32 %v1977_v5, %v864_v48  ;;  %v999_v57 = vsel %vm953_vm2, %v2048_v49, -inf }
 0x1b8   : > { %v1618_v52 = vpop.f32.mrf.mxu1  ;;  %994 = vmax.xlane.f32.xlu1 %v993_v51 }
 0x1b9   : > { %v996_v53 = vsel %vm953_vm2, %v2051_v50, -inf  ;;  %v2058_v55 = vadd.f32 %v1618_v52, %v1977_v5 }
 0x1ba   : > { %v874_v54 = vpop.f32.mrf.mxu1  ;;  %997 = vmax.xlane.f32.xlu0 %v996_v53 }
 0x1bb   : > { %v2061_v56 = vadd.f32 %v1977_v5, %v874_v54  ;;  %v1005_v63 = vsel %vm953_vm2, %v2058_v55, -inf }
 0x1bc   : > { %v1621_v58 = vpop.f32.mrf.mxu1  ;;  %1000 = vmax.xlane.f32.xlu1 %v999_v57 }
 0x1bd   : > { %v1002_v59 = vsel %vm953_vm2, %v2061_v56, -inf  ;;  %v2068_v61 = vadd.f32 %v1621_v58, %v1977_v5 }
 0x1be   : > { %v884_v60 = vpop.f32.mrf.mxu1  ;;  %1003 = vmax.xlane.f32.xlu0 %v1002_v59 }
 0x1bf   : > { %v2071_v62 = vadd.f32 %v1977_v5, %v884_v60  ;;  %v1011_v6 = vsel %vm953_vm2, %v2068_v61, -inf }
 0x1c0   : > { %v1624_v0 = vpop.f32.mrf.mxu1  ;;  %1006 = vmax.xlane.f32.xlu1 %v1005_v63 }
 0x1c1   : > { %v1008_v1 = vsel %vm953_vm2, %v2071_v62, -inf  ;;  %v2078_v3 = vadd.f32 %v1624_v0, %v1977_v5 }
 0x1c2   : > { %v894_v2 = vpop.f32.mrf.mxu1  ;;  %1009 = vmax.xlane.f32.xlu0 %v1008_v1 }
 0x1c3   : > { %v2081_v4 = vadd.f32 %v1977_v5, %v894_v2  ;;  %v1017_v15 = vsel %vm953_vm2, %v2078_v3, -inf }
 0x1c4   : > { %v1627_v35 = vpop.f32.mrf.mxu1  ;;  %1012 = vmax.xlane.f32.xlu1 %v1011_v6 }
 0x1c5   : > { %v1014_v9 = vsel %vm953_vm2, %v2081_v4, -inf  ;;  %v2088_v12 = vadd.f32 %v1627_v35, %v1977_v5 }
 0x1c6   : > { %v904_v10 = vpop.f32.mrf.mxu1  ;;  %1015 = vmax.xlane.f32.xlu0 %v1014_v9 }
 0x1c7   : > { %v2091_v14 = vadd.f32 %v1977_v5, %v904_v10  ;;  %v1023_v23 = vsel %vm953_vm2, %v2088_v12, -inf }
 0x1c8   : > { %v1630_v16 = vpop.f32.mrf.mxu1  ;;  %1018 = vmax.xlane.f32.xlu1 %v1017_v15 }
 0x1c9   : > { %v1020_v17 = vsel %vm953_vm2, %v2091_v14, -inf  ;;  %v2098_v21 = vadd.f32 %v1630_v16, %v1977_v5 }
 0x1ca   : > { %v914_v20 = vpop.f32.mrf.mxu1  ;;  %1021 = vmax.xlane.f32.xlu0 %v1020_v17 }
 0x1cb   : > { %v2101_v22 = vadd.f32 %v1977_v5, %v914_v20  ;;  %v1029_v33 = vsel %vm953_vm2, %v2098_v21, -inf }
 0x1cc   : > { %v1633_v26 = vpop.f32.mrf.mxu1  ;;  %1024 = vmax.xlane.f32.xlu1 %v1023_v23 }
 0x1cd   : > { %v1026_v27 = vsel %vm953_vm2, %v2101_v22, -inf  ;;  %v2108_v29 = vadd.f32 %v1633_v26, %v1977_v5 }
 0x1ce   : > { %v924_v28 = vpop.f32.mrf.mxu1  ;;  %1027 = vmax.xlane.f32.xlu0 %v1026_v27 }
 0x1cf   : > { %v2111_v32 = vadd.f32 %v1977_v5, %v924_v28  ;;  %v1035_v42 = vsel %vm953_vm2, %v2108_v29, -inf }
 0x1d0   : > { %v1636_v34 = vpop.f32.mrf.mxu1  ;;  %1030 = vmax.xlane.f32.xlu1 %v1029_v33 }
 0x1d1   : > { %v1032_v36 = vsel %vm953_vm2, %v2111_v32, -inf  ;;  %v2118_v40 = vadd.f32 %v1636_v34, %v1977_v5 }
 0x1d2   : > { %v934_v39 = vpop.f32.mrf.mxu1  ;;  %1033 = vmax.xlane.f32.xlu0 %v1032_v36 }
 0x1d3   : > { %v2121_v41 = vadd.f32 %v1977_v5, %v934_v39  ;;  %v1041_v52 = vsel %vm953_vm2, %v2118_v40, -inf }
 0x1d4   : > { %v1639_v45 = vpop.f32.mrf.mxu1  ;;  %1036 = vmax.xlane.f32.xlu1 %v1035_v42 }
 0x1d5   : > { %v1038_v46 = vsel %vm953_vm2, %v2121_v41, -inf  ;;  %v2128_v48 = vadd.f32 %v1639_v45, %v1977_v5 }
 0x1d6   : > { %v944_v47 = vpop.f32.mrf.mxu1  ;;  %1039 = vmax.xlane.f32.xlu0 %v1038_v46 }
 0x1d7   : > { %v2131_v51 = vadd.f32 %v1977_v5, %v944_v47  ;;  %v1047_v54 = vsel %vm953_vm2, %v2128_v48, -inf }
 0x1d8   : > { %1042 = vmax.xlane.f32.xlu1 %v1041_v52 }
 0x1d9   : > { %v1044_v53 = vsel %vm953_vm2, %v2131_v51, -inf }
 0x1da   : > { %1045 = vmax.xlane.f32.xlu0 %v1044_v53 }
 0x1dc   : > { %1048 = vmax.xlane.f32.xlu1 %v1047_v54 }
 0x225   : > { %v959_v57 = vpop.xlane.xlu0 %958 }
 0x226   : > { %v1051_v58 = vsub.f32 %v1980_v7, %v959_v57 }
 0x228   : > { %v1084_v59 = vmul.f32 1.442695, %v1051_v58 }
 0x229   : > { %v965_v60 = vpop.xlane.xlu1 %964  ;;  %v956_v63 = vpop.xlane.xlu0 %955 }
 0x22a   : > { %1648 = vpow2.f32 %v1084_v59  ;;  %v1053_v5 = vsub.f32 %v1988_v11, %v965_v60  ;;  %v1050_v0 = vsub.f32 %v1983_v8, %v956_v63 }
 0x22c   : > { %v1088_v1 = vmul.f32 1.442695, %v1053_v5  ;;  %v1082_v2 = vmul.f32 1.442695, %v1050_v0 }
 0x22d   : > { %v962_v6 = vpop.xlane.xlu1 %961 }
 0x22e   : > { %1650 = vpow2.f32 %v1088_v1  ;;  %v1052_v35 = vsub.f32 %v1991_v13, %v962_v6 }
 0x22f   : > { %1652 = vpow2.f32 %v1082_v2  ;;  %v968_v9 = vpop.xlane.xlu0 %967 }
 0x230   : > { %v1086_v10 = vmul.f32 1.442695, %v1052_v35  ;;  %v1054_v15 = vsub.f32 %v2001_v19, %v968_v9 }
 0x231   : > { %v971_v7 = vpop.xlane.xlu1 %970 }
 0x232   : > { %1654 = vpow2.f32 %v1086_v10  ;;  %v1090_v16 = vmul.f32 1.442695, %v1054_v15  ;;  %v1055_v17 = vsub.f32 %v1998_v18, %v971_v7 }
 0x233   : > { %v974_v20 = vpop.xlane.xlu0 %973 }
 0x234   : > { %v1092_v11 = vmul.f32 1.442695, %v1055_v17  ;;  %v1056_v8 = vsub.f32 %v2011_v25, %v974_v20  ;;  %1656 = vpow2.f32 %v1090_v16 }
 0x235   : > { %v977_v23 = vpop.xlane.xlu1 %976 }
 0x236   : > { %1658 = vpow2.f32 %v1092_v11  ;;  %v1094_v26 = vmul.f32 1.442695, %v1056_v8  ;;  %v1057_v13 = vsub.f32 %v2008_v24, %v977_v23 }
 0x237   : > { %v2147_v27 = vpop.eup %1648  ;;  %v980_v28 = vpop.xlane.xlu0 %979 }
 0x238   : > { %v1096_v33 = vmul.f32 1.442695, %v1057_v13  ;;  %v1058_v19 = vsub.f32 %v2021_v31, %v980_v28  ;;  %v1149_v34 = vsel %vm953_vm2, %v2147_v27, 0.0  ;;  %1660 = vpow2.f32 %v1094_v26 }
 0x239   : > { %1150 = vadd.xlane.f32.xlu1 %v1149_v34  ;;  %v983_v18 = vpop.xlane.xlu1 %982 }
 0x23a   : > { %1662 = vpow2.f32 %v1096_v33  ;;  %v1098_v25 = vmul.f32 1.442695, %v1058_v19  ;;  %v1059_v36 = vsub.f32 %v2018_v30, %v983_v18 }
 0x23b   : > { %v2153_v39 = vpop.eup %1650  ;;  %v986_v42 = vpop.xlane.xlu0 %985 }
 0x23c   : > { %v2155_v24 = vpop.eup %1652  ;;  %v1100_v45 = vmul.f32 1.442695, %v1059_v36  ;;  %v1060_v46 = vsub.f32 %v2031_v38, %v986_v42  ;;  %v1155_v31 = vsel %vm953_vm2, %v2153_v39, 0.0  ;;  %1664 = vpow2.f32 %v1098_v25 }
 0x23d   : > { %1156 = vadd.xlane.f32.xlu1 %v1155_v31  ;;  %v989_v47 = vpop.xlane.xlu1 %988  ;;  %v1146_v52 = vsel %vm953_vm2, %v2155_v24, 0.0 }
 0x23e   : > { %1666 = vpow2.f32 %v1100_v45  ;;  %v1102_v53 = vmul.f32 1.442695, %v1060_v46  ;;  %v1061_v30 = vsub.f32 %v2028_v37, %v989_v47  ;;  %1147 = vadd.xlane.f32.xlu0 %v1146_v52 }
 0x23f   : > { %v2163_v54 = vpop.eup %1654  ;;  %v992_v57 = vpop.xlane.xlu0 %991 }
 0x240   : > { %v1104_v58 = vmul.f32 1.442695, %v1061_v30  ;;  %v1062_v38 = vsub.f32 %v2041_v44, %v992_v57  ;;  %v1152_v59 = vsel %vm953_vm2, %v2163_v54, 0.0  ;;  %1668 = vpow2.f32 %v1102_v53 }
 0x241   : > { %v995_v60 = vpop.xlane.xlu1 %994  ;;  %v2168_v63 = vpop.eup %1656 }
 0x242   : > { %1670 = vpow2.f32 %v1104_v58  ;;  %v1106_v5 = vmul.f32 1.442695, %v1062_v38  ;;  %v1063_v0 = vsub.f32 %v2038_v43, %v995_v60  ;;  %1153 = vadd.xlane.f32.xlu0 %v1152_v59  ;;  %v1158_v9 = vsel %vm953_vm2, %v2168_v63, 0.0 }
 0x243   : > { %v2171_v37 = vpop.eup %1658  ;;  %v998_v1 = vpop.xlane.xlu0 %997 }
 0x244   : > { %v1108_v2 = vmul.f32 1.442695, %v1063_v0  ;;  %v1064_v6 = vsub.f32 %v2051_v50, %v998_v1  ;;  %v1161_v44 = vsel %vm953_vm2, %v2171_v37, 0.0  ;;  %1672 = vpow2.f32 %v1106_v5 }
 0x245   : > { %1162 = vadd.xlane.f32.xlu1 %v1161_v44  ;;  %v1001_v35 = vpop.xlane.xlu1 %1000  ;;  %v2178_v10 = vpop.eup %1660 }
 0x246   : > { %1674 = vpow2.f32 %v1108_v2  ;;  %v1110_v43 = vmul.f32 1.442695, %v1064_v6  ;;  %v1065_v15 = vsub.f32 %v2048_v49, %v1001_v35  ;;  %1159 = vadd.xlane.f32.xlu0 %v1158_v9  ;;  %v1164_v8 = vsel %vm953_vm2, %v2178_v10, 0.0 }
 0x247   : > { %v2181_v7 = vpop.eup %1662  ;;  %v1004_v16 = vpop.xlane.xlu0 %1003 }
 0x248   : > { %v1112_v50 = vmul.f32 1.442695, %v1065_v15  ;;  %v1066_v17 = vsub.f32 %v2061_v56, %v1004_v16  ;;  %v1167_v20 = vsel %vm953_vm2, %v2181_v7, 0.0  ;;  %1676 = vpow2.f32 %v1110_v43 }
 0x249   : > { %1168 = vadd.xlane.f32.xlu1 %v1167_v20  ;;  %v1007_v11 = vpop.xlane.xlu1 %1006  ;;  %v2188_v23 = vpop.eup %1664 }
 0x24a   : > { %1678 = vpow2.f32 %v1112_v50  ;;  %v1114_v49 = vmul.f32 1.442695, %v1066_v17  ;;  %v1067_v26 = vsub.f32 %v2058_v55, %v1007_v11  ;;  %1165 = vadd.xlane.f32.xlu0 %v1164_v8  ;;  %v1170_v18 = vsel %vm953_vm2, %v2188_v23, 0.0 }
 0x24b   : > { %v2191_v13 = vpop.eup %1666  ;;  %v1010_v28 = vpop.xlane.xlu0 %1009 }
 0x24c   : > { %v1116_v56 = vmul.f32 1.442695, %v1067_v26  ;;  %v1068_v33 = vsub.f32 %v2071_v62, %v1010_v28  ;;  %v1173_v19 = vsel %vm953_vm2, %v2191_v13, 0.0  ;;  %1680 = vpow2.f32 %v1114_v49 }
 0x24d   : > { %1174 = vadd.xlane.f32.xlu1 %v1173_v19  ;;  %v1013_v34 = vpop.xlane.xlu1 %1012  ;;  %v2198_v25 = vpop.eup %1668 }
 0x24e   : > { %1682 = vpow2.f32 %v1116_v56  ;;  %v1118_v55 = vmul.f32 1.442695, %v1068_v33  ;;  %v1069_v36 = vsub.f32 %v2068_v61, %v1013_v34  ;;  %1171 = vadd.xlane.f32.xlu0 %v1170_v18  ;;  %v1176_v52 = vsel %vm953_vm2, %v2198_v25, 0.0 }
 0x24f   : > { %v2201_v42 = vpop.eup %1670  ;;  %v1016_v45 = vpop.xlane.xlu0 %1015 }
 0x250   : > { %v1120_v62 = vmul.f32 1.442695, %v1069_v36  ;;  %v1070_v46 = vsub.f32 %v2081_v4, %v1016_v45  ;;  %v1179_v31 = vsel %vm953_vm2, %v2201_v42, 0.0  ;;  %1684 = vpow2.f32 %v1118_v55 }
 0x251   : > { %1180 = vadd.xlane.f32.xlu1 %v1179_v31  ;;  %v1019_v47 = vpop.xlane.xlu1 %1018  ;;  %v2208_v53 = vpop.eup %1672 }
 0x252   : > { %1686 = vpow2.f32 %v1120_v62  ;;  %v1122_v61 = vmul.f32 1.442695, %v1070_v46  ;;  %v1071_v30 = vsub.f32 %v2078_v3, %v1019_v47  ;;  %1177 = vadd.xlane.f32.xlu0 %v1176_v52  ;;  %v1182_v5 = vsel %vm953_vm2, %v2208_v53, 0.0 }
 0x253   : > { %v2211_v57 = vpop.eup %1674  ;;  %v1022_v58 = vpop.xlane.xlu0 %1021 }
 0x254   : > { %v1124_v4 = vmul.f32 1.442695, %v1071_v30  ;;  %v1072_v38 = vsub.f32 %v2091_v14, %v1022_v58  ;;  %v1185_v59 = vsel %vm953_vm2, %v2211_v57, 0.0  ;;  %1688 = vpow2.f32 %v1122_v61 }
 0x255   : > { %1186 = vadd.xlane.f32.xlu1 %v1185_v59  ;;  %v1025_v60 = vpop.xlane.xlu1 %1024  ;;  %v2218_v0 = vpop.eup %1676 }
 0x256   : > { %1690 = vpow2.f32 %v1124_v4  ;;  %v1126_v3 = vmul.f32 1.442695, %v1072_v38  ;;  %v1073_v1 = vsub.f32 %v2088_v12, %v1025_v60  ;;  %1183 = vadd.xlane.f32.xlu0 %v1182_v5  ;;  %v1188_v43 = vsel %vm953_vm2, %v2218_v0, 0.0 }
 0x257   : > { %v2221_v2 = vpop.eup %1678  ;;  %v1028_v6 = vpop.xlane.xlu0 %1027 }
 0x258   : > { %v1128_v14 = vmul.f32 1.442695, %v1073_v1  ;;  %v1074_v44 = vsub.f32 %v2101_v22, %v1028_v6  ;;  %v1191_v35 = vsel %vm953_vm2, %v2221_v2, 0.0  ;;  %1692 = vpow2.f32 %v1126_v3 }
 0x259   : > { %1192 = vadd.xlane.f32.xlu1 %v1191_v35  ;;  %v1031_v9 = vpop.xlane.xlu1 %1030  ;;  %v2228_v15 = vpop.eup %1680 }
 0x25a   : > { %1694 = vpow2.f32 %v1128_v14  ;;  %v1130_v12 = vmul.f32 1.442695, %v1074_v44  ;;  %v1075_v16 = vsub.f32 %v2098_v21, %v1031_v9  ;;  %1189 = vadd.xlane.f32.xlu0 %v1188_v43  ;;  %v1194_v49 = vsel %vm953_vm2, %v2228_v15, 0.0 }
 0x25b   : > { %v2231_v50 = vpop.eup %1682  ;;  %v1034_v17 = vpop.xlane.xlu0 %1033 }
 0x25c   : > { %v1132_v22 = vmul.f32 1.442695, %v1075_v16  ;;  %v1076_v20 = vsub.f32 %v2111_v32, %v1034_v17  ;;  %v1197_v11 = vsel %vm953_vm2, %v2231_v50, 0.0  ;;  %1696 = vpow2.f32 %v1130_v12 }
 0x25d   : > { %1198 = vadd.xlane.f32.xlu1 %v1197_v11  ;;  %v1037_v8 = vpop.xlane.xlu1 %1036  ;;  %v2238_v26 = vpop.eup %1684 }
 0x25e   : > { %1698 = vpow2.f32 %v1132_v22  ;;  %v1134_v21 = vmul.f32 1.442695, %v1076_v20  ;;  %v1077_v28 = vsub.f32 %v2108_v29, %v1037_v8  ;;  %1195 = vadd.xlane.f32.xlu0 %v1194_v49  ;;  %v1200_v55 = vsel %vm953_vm2, %v2238_v26, 0.0 }
 0x25f   : > { %v2241_v56 = vpop.eup %1686  ;;  %v1040_v33 = vpop.xlane.xlu0 %1039 }
 0x260   : > { %v1136_v32 = vmul.f32 1.442695, %v1077_v28  ;;  %v1078_v19 = vsub.f32 %v2121_v41, %v1040_v33  ;;  %v1203_v34 = vsel %vm953_vm2, %v2241_v56, 0.0  ;;  %1700 = vpow2.f32 %v1134_v21 }
 0x261   : > { %1204 = vadd.xlane.f32.xlu1 %v1203_v34  ;;  %v1043_v18 = vpop.xlane.xlu1 %1042  ;;  %v2248_v36 = vpop.eup %1688 }
 0x262   : > { %1702 = vpow2.f32 %v1136_v32  ;;  %v1138_v29 = vmul.f32 1.442695, %v1078_v19  ;;  %v1079_v45 = vsub.f32 %v2118_v40, %v1043_v18  ;;  %1201 = vadd.xlane.f32.xlu0 %v1200_v55  ;;  %v1206_v61 = vsel %vm953_vm2, %v2248_v36, 0.0 }
 0x263   : > { %v2251_v62 = vpop.eup %1690  ;;  %v1046_v46 = vpop.xlane.xlu0 %1045 }
 0x264   : > { %v1140_v41 = vmul.f32 1.442695, %v1079_v45  ;;  %v1080_v31 = vsub.f32 %v2131_v51, %v1046_v46  ;;  %v1209_v47 = vsel %vm953_vm2, %v2251_v62, 0.0  ;;  %1704 = vpow2.f32 %v1138_v29 }
 0x265   : > { %1210 = vadd.xlane.f32.xlu1 %v1209_v47  ;;  %v1049_v52 = vpop.xlane.xlu1 %1048  ;;  %v2258_v30 = vpop.eup %1692 }
 0x266   : > { %1706 = vpow2.f32 %v1140_v41  ;;  %v1142_v40 = vmul.f32 1.442695, %v1080_v31  ;;  %v1081_v58 = vsub.f32 %v2128_v48, %v1049_v52  ;;  %1207 = vadd.xlane.f32.xlu0 %v1206_v61  ;;  %v1212_v59 = vsel %vm953_vm2, %v2258_v30, 0.0 }
 0x267   : > { %v2261_v4 = vpop.eup %1694 }
 0x268   : > { %v1144_v38 = vmul.f32 1.442695, %v1081_v58  ;;  %v1215_v51 = vsel %vm953_vm2, %v2261_v4, 0.0  ;;  %1708 = vpow2.f32 %v1142_v40 }
 0x269   : > { %1216 = vadd.xlane.f32.xlu1 %v1215_v51  ;;  %v2267_v60 = vpop.eup %1696 }
 0x26a   : > { %1710 = vpow2.f32 %v1144_v38  ;;  %1213 = vadd.xlane.f32.xlu0 %v1212_v59  ;;  %v1218_v3 = vsel %vm953_vm2, %v2267_v60, 0.0 }
 0x26b   : > { %v2269_v5 = vpop.eup %1698 }
 0x26c   : > { %v1221_v48 = vsel %vm953_vm2, %v2269_v5, 0.0 }
 0x26d   : > { %1222 = vadd.xlane.f32.xlu1 %v1221_v48  ;;  %v2275_v1 = vpop.eup %1700 }
 0x26e   : > { %1219 = vadd.xlane.f32.xlu0 %v1218_v3  ;;  %v1224_v44 = vsel %vm953_vm2, %v2275_v1, 0.0 }
 0x26f   : > { %v2277_v6 = vpop.eup %1702 }
 0x270   : > { %v1227_v14 = vsel %vm953_vm2, %v2277_v6, 0.0 }
 0x271   : > { %1228 = vadd.xlane.f32.xlu1 %v1227_v14  ;;  %v2283_v35 = vpop.eup %1704 }
 0x272   : > { %1225 = vadd.xlane.f32.xlu0 %v1224_v44  ;;  %v1230_v12 = vsel %vm953_vm2, %v2283_v35, 0.0 }
 0x273   : > { %v2285_v9 = vpop.eup %1706 }
 0x274   : > { %v1233_v43 = vsel %vm953_vm2, %v2285_v9, 0.0 }
 0x275   : > { %1234 = vadd.xlane.f32.xlu1 %v1233_v43  ;;  %v2291_v16 = vpop.eup %1708 }
 0x276   : > { %1231 = vadd.xlane.f32.xlu0 %v1230_v12  ;;  %v1236_v20 = vsel %vm953_vm2, %v2291_v16, 0.0 }
 0x277   : > { %v2293_v17 = vpop.eup %1710 }
 0x278   : > { %v1239_v22 = vsel %vm953_vm2, %v2293_v17, 0.0 }
 0x279   : > { %1240 = vadd.xlane.f32.xlu1 %v1239_v22 }
 0x27a   : > { %1237 = vadd.xlane.f32.xlu0 %v1236_v20 }
 0x2c2   : > { %v1151_v11 = vpop.xlane.xlu1 %1150 }
 0x2c3   : > { %1712 = vrcp.f32 %v1151_v11 }
 0x2c6   : > { %v1157_v8 = vpop.xlane.xlu1 %1156 }
 0x2c7   : > { %1714 = vrcp.f32 %v1157_v8  ;;  %v1148_v49 = vpop.xlane.xlu0 %1147 }
 0x2c8   : > { %1716 = vrcp.f32 %v1148_v49 }
 0x2cb   : > { %v1154_v21 = vpop.xlane.xlu0 %1153 }
 0x2cc   : > { %1718 = vrcp.f32 %v1154_v21 }
 0x2ce   : > { %v1163_v28 = vpop.xlane.xlu1 %1162 }
 0x2cf   : > { %1720 = vrcp.f32 %v1163_v28  ;;  %v1160_v33 = vpop.xlane.xlu0 %1159 }
 0x2d0   : > { %v1713_v32 = vpop.eup %1712  ;;  %1722 = vrcp.f32 %v1160_v33 }
 0x2d1   : > { %v1275_v19 = vmul.f32 %v1713_v32, %v2147_v27 }
 0x2d2   : > { %v1169_v34 = vpop.xlane.xlu1 %1168 }
 0x2d3   : > { %1307 = vst.msk [vmem:[%s2304_s12 + $0x8] sm:$0xff] %vm953_vm2, %v1275_v19  ;;  %1724 = vrcp.f32 %v1169_v34  ;;  %v1166_v18 = vpop.xlane.xlu0 %1165 }
 0x2d4   : > { %v1715_v55 = vpop.eup %1714  ;;  %1726 = vrcp.f32 %v1166_v18 }
 0x2d5   : > { %v1717_v29 = vpop.eup %1716  ;;  %v1277_v45 = vmul.f32 %v1715_v55, %v2153_v39 }
 0x2d6   : > { %v1274_v46 = vmul.f32 %v1717_v29, %v2155_v24  ;;  %v1175_v41 = vpop.xlane.xlu1 %1174 }
 0x2d7   : > { %1309 = vst.msk [vmem:[%s2304_s12 + $0x18] sm:$0xff] %vm953_vm2, %v1277_v45  ;;  %1728 = vrcp.f32 %v1175_v41  ;;  %v1172_v31 = vpop.xlane.xlu0 %1171 }
 0x2d8   : > { %1306 = vst.msk [vmem:[%s2304_s12] sm:$0xff] %vm953_vm2, %v1274_v46  ;;  %1730 = vrcp.f32 %v1172_v31 }
 0x2d9   : > { %v1719_v27 = vpop.eup %1718 }
 0x2da   : > { %v1276_v47 = vmul.f32 %v1719_v27, %v2163_v54  ;;  %v1181_v52 = vpop.xlane.xlu1 %1180 }
 0x2db   : > { %1732 = vrcp.f32 %v1181_v52  ;;  %v1178_v61 = vpop.xlane.xlu0 %1177 }
 0x2dc   : > { %v1721_v40 = vpop.eup %1720  ;;  %1308 = vst.msk [vmem:[%s2304_s12 + $0x10] sm:$0xff] %vm953_vm2, %v1276_v47  ;;  %1734 = vrcp.f32 %v1178_v61 }
 0x2dd   : > { %v1723_v39 = vpop.eup %1722  ;;  %v1279_v24 = vmul.f32 %v1721_v40, %v2171_v37 }
 0x2de   : > { %v1278_v58 = vmul.f32 %v1723_v39, %v2168_v63  ;;  %v1187_v38 = vpop.xlane.xlu1 %1186 }
 0x2df   : > { %1311 = vst.msk [vmem:[%s2304_s12 + $0x28] sm:$0xff] %vm953_vm2, %v1279_v24  ;;  %1736 = vrcp.f32 %v1187_v38  ;;  %v1184_v51 = vpop.xlane.xlu0 %1183 }
 0x2e0   : > { %v1725_v54 = vpop.eup %1724  ;;  %1310 = vst.msk [vmem:[%s2304_s12 + $0x20] sm:$0xff] %vm953_vm2, %v1278_v58  ;;  %1738 = vrcp.f32 %v1184_v51 }
 0x2e1   : > { %v1727_v59 = vpop.eup %1726  ;;  %v1281_v48 = vmul.f32 %v1725_v54, %v2181_v7 }
 0x2e2   : > { %v1280_v3 = vmul.f32 %v1727_v59, %v2178_v10  ;;  %v1193_v37 = vpop.xlane.xlu1 %1192 }
 0x2e3   : > { %1313 = vst.msk [vmem:[%s2304_s12 + $0x38] sm:$0xff] %vm953_vm2, %v1281_v48  ;;  %1740 = vrcp.f32 %v1193_v37  ;;  %v1190_v63 = vpop.xlane.xlu0 %1189 }
 0x2e4   : > { %v1729_v14 = vpop.eup %1728  ;;  %1312 = vst.msk [vmem:[%s2304_s12 + $0x30] sm:$0xff] %vm953_vm2, %v1280_v3  ;;  %1742 = vrcp.f32 %v1190_v63 }
 0x2e5   : > { %v1731_v44 = vpop.eup %1730  ;;  %v1283_v43 = vmul.f32 %v1729_v14, %v2191_v13 }
 0x2e6   : > { %v1282_v12 = vmul.f32 %v1731_v44, %v2188_v23  ;;  %v1199_v7 = vpop.xlane.xlu1 %1198 }
 0x2e7   : > { %1315 = vst.msk [vmem:[%s2304_s12 + $0x48] sm:$0xff] %vm953_vm2, %v1283_v43  ;;  %1744 = vrcp.f32 %v1199_v7  ;;  %v1196_v10 = vpop.xlane.xlu0 %1195 }
 0x2e8   : > { %v1733_v22 = vpop.eup %1732  ;;  %1314 = vst.msk [vmem:[%s2304_s12 + $0x40] sm:$0xff] %vm953_vm2, %v1282_v12  ;;  %1746 = vrcp.f32 %v1196_v10 }
 0x2e9   : > { %v1735_v20 = vpop.eup %1734  ;;  %v1285_v11 = vmul.f32 %v1733_v22, %v2201_v42 }
 0x2ea   : > { %v1284_v8 = vmul.f32 %v1735_v20, %v2198_v25  ;;  %v1205_v13 = vpop.xlane.xlu1 %1204 }
 0x2eb   : > { %1317 = vst.msk [vmem:[%s2304_s12 + $0x58] sm:$0xff] %vm953_vm2, %v1285_v11  ;;  %1748 = vrcp.f32 %v1205_v13  ;;  %v1202_v23 = vpop.xlane.xlu0 %1201 }
 0x2ec   : > { %v1737_v49 = vpop.eup %1736  ;;  %1316 = vst.msk [vmem:[%s2304_s12 + $0x50] sm:$0xff] %vm953_vm2, %v1284_v8  ;;  %1750 = vrcp.f32 %v1202_v23 }
 0x2ed   : > { %v1739_v21 = vpop.eup %1738  ;;  %v1287_v28 = vmul.f32 %v1737_v49, %v2211_v57 }
 0x2ee   : > { %v1286_v33 = vmul.f32 %v1739_v21, %v2208_v53  ;;  %v1211_v42 = vpop.xlane.xlu1 %1210 }
 0x2ef   : > { %1319 = vst.msk [vmem:[%s2304_s12 + $0x68] sm:$0xff] %vm953_vm2, %v1287_v28  ;;  %1752 = vrcp.f32 %v1211_v42  ;;  %v1208_v25 = vpop.xlane.xlu0 %1207 }
 0x2f0   : > { %v1741_v32 = vpop.eup %1740  ;;  %1318 = vst.msk [vmem:[%s2304_s12 + $0x60] sm:$0xff] %vm953_vm2, %v1286_v33  ;;  %1754 = vrcp.f32 %v1208_v25 }
 0x2f1   : > { %v1743_v19 = vpop.eup %1742  ;;  %v1289_v34 = vmul.f32 %v1741_v32, %v2221_v2 }
 0x2f2   : > { %v1288_v18 = vmul.f32 %v1743_v19, %v2218_v0  ;;  %v1217_v57 = vpop.xlane.xlu1 %1216 }
 0x2f3   : > { %1321 = vst.msk [vmem:[%s2304_s12 + $0x78] sm:$0xff] %vm953_vm2, %v1289_v34  ;;  %1756 = vrcp.f32 %v1217_v57  ;;  %v1214_v53 = vpop.xlane.xlu0 %1213 }
 0x2f4   : > { %v1745_v55 = vpop.eup %1744  ;;  %1320 = vst.msk [vmem:[%s2304_s12 + $0x70] sm:$0xff] %vm953_vm2, %v1288_v18  ;;  %1758 = vrcp.f32 %v1214_v53 }
 0x2f5   : > { %v1747_v29 = vpop.eup %1746  ;;  %v1291_v45 = vmul.f32 %v1745_v55, %v2231_v50 }
 0x2f6   : > { %v1290_v46 = vmul.f32 %v1747_v29, %v2228_v15  ;;  %v1223_v2 = vpop.xlane.xlu1 %1222 }
 0x2f7   : > { %1323 = vst.msk [vmem:[%s2304_s12 + $0x88] sm:$0xff] %vm953_vm2, %v1291_v45  ;;  %1760 = vrcp.f32 %v1223_v2  ;;  %v1220_v0 = vpop.xlane.xlu0 %1219 }
 0x2f8   : > { %v1749_v41 = vpop.eup %1748  ;;  %1322 = vst.msk [vmem:[%s2304_s12 + $0x80] sm:$0xff] %vm953_vm2, %v1290_v46  ;;  %1762 = vrcp.f32 %v1220_v0 }
 0x2f9   : > { %v1751_v31 = vpop.eup %1750  ;;  %v1293_v27 = vmul.f32 %v1749_v41, %v2241_v56 }
 0x2fa   : > { %v1292_v47 = vmul.f32 %v1751_v31, %v2238_v26  ;;  %v1229_v50 = vpop.xlane.xlu1 %1228 }
 0x2fb   : > { %1325 = vst.msk [vmem:[%s2304_s12 + $0x98] sm:$0xff] %vm953_vm2, %v1293_v27  ;;  %1764 = vrcp.f32 %v1229_v50  ;;  %v1226_v15 = vpop.xlane.xlu0 %1225 }
 0x2fc   : > { %v1753_v52 = vpop.eup %1752  ;;  %1324 = vst.msk [vmem:[%s2304_s12 + $0x90] sm:$0xff] %vm953_vm2, %v1292_v47  ;;  %1766 = vrcp.f32 %v1226_v15 }
 0x2fd   : > { %v1755_v61 = vpop.eup %1754  ;;  %v1295_v40 = vmul.f32 %v1753_v52, %v2251_v62 }
 0x2fe   : > { %v1294_v39 = vmul.f32 %v1755_v61, %v2248_v36  ;;  %v1235_v56 = vpop.xlane.xlu1 %1234 }
 0x2ff   : > { %1327 = vst.msk [vmem:[%s2304_s12 + $0xa8] sm:$0xff] %vm953_vm2, %v1295_v40  ;;  %1768 = vrcp.f32 %v1235_v56  ;;  %v1232_v26 = vpop.xlane.xlu0 %1231 }
 0x300   : > { %v1757_v24 = vpop.eup %1756  ;;  %1326 = vst.msk [vmem:[%s2304_s12 + $0xa0] sm:$0xff] %vm953_vm2, %v1294_v39  ;;  %1770 = vrcp.f32 %v1232_v26 }
 0x301   : > { %v1759_v58 = vpop.eup %1758  ;;  %v1297_v38 = vmul.f32 %v1757_v24, %v2261_v4 }
 0x302   : > { %v1296_v51 = vmul.f32 %v1759_v58, %v2258_v30  ;;  %v1241_v62 = vpop.xlane.xlu1 %1240 }
 0x303   : > { %1329 = vst.msk [vmem:[%s2304_s12 + $0xb8] sm:$0xff] %vm953_vm2, %v1297_v38  ;;  %1772 = vrcp.f32 %v1241_v62  ;;  %v1238_v36 = vpop.xlane.xlu0 %1237 }
 0x304   : > { %v1761_v54 = vpop.eup %1760  ;;  %1328 = vst.msk [vmem:[%s2304_s12 + $0xb0] sm:$0xff] %vm953_vm2, %v1296_v51  ;;  %1774 = vrcp.f32 %v1238_v36 }
 0x305   : > { %v1763_v59 = vpop.eup %1762  ;;  %v1299_v48 = vmul.f32 %v1761_v54, %v2269_v5 }
 0x306   : > { %v1298_v4 = vmul.f32 %v1763_v59, %v2267_v60 }
 0x307   : > { %1331 = vst.msk [vmem:[%s2304_s12 + $0xc8] sm:$0xff] %vm953_vm2, %v1299_v48 }
 0x308   : > { %v1765_v30 = vpop.eup %1764  ;;  %1330 = vst.msk [vmem:[%s2304_s12 + $0xc0] sm:$0xff] %vm953_vm2, %v1298_v4 }
 0x309   : > { %v1767_v3 = vpop.eup %1766  ;;  %v1301_v37 = vmul.f32 %v1765_v30, %v2277_v6 }
 0x30a   : > { %v1300_v63 = vmul.f32 %v1767_v3, %v2275_v1 }
 0x30b   : > { %1333 = vst.msk [vmem:[%s2304_s12 + $0xd8] sm:$0xff] %vm953_vm2, %v1301_v37 }
 0x30c   : > { %v1769_v14 = vpop.eup %1768  ;;  %1332 = vst.msk [vmem:[%s2304_s12 + $0xd0] sm:$0xff] %vm953_vm2, %v1300_v63 }
 0x30d   : > { %v1771_v5 = vpop.eup %1770  ;;  %v1303_v60 = vmul.f32 %v1769_v14, %v2285_v9 }
 0x30e   : > { %v1302_v44 = vmul.f32 %v1771_v5, %v2283_v35 }
 0x30f   : > { %1335 = vst.msk [vmem:[%s2304_s12 + $0xe8] sm:$0xff] %vm953_vm2, %v1303_v60 }
 0x310   : > { %v1773_v43 = vpop.eup %1772  ;;  %1334 = vst.msk [vmem:[%s2304_s12 + $0xe0] sm:$0xff] %vm953_vm2, %v1302_v44 }
 0x311   : > { %v1775_v12 = vpop.eup %1774  ;;  %v1305_v6 = vmul.f32 %v1773_v43, %v2293_v17 }
 0x312   : > { %v1304_v1 = vmul.f32 %v1775_v12, %v2291_v16 }
 0x313   : > { %1337 = vst.msk [vmem:[%s2304_s12 + $0xf8] sm:$0xff] %vm953_vm2, %v1305_v6 }
 0x314   : > { %1336 = vst.msk [vmem:[%s2304_s12 + $0xf0] sm:$0xff] %vm953_vm2, %v1304_v1 }
 0x315 PF: > { %s15_s18 = sadd.s32 1, %s1782_s18  }
 0x316   : > { %p12_p4 = scmp.ge.s32.totalorder %s15_s18, 4  }
 0x318   :  { %14 = sbr.rel (!%p12_p4) target bundleno = 1 (0x1), region = 70 }

// kernel: network_ess_forward.2
= control target key start
LH: loop header
LB: loop body
LE: loop exit
PB: predicated region body
PF: predicated region fallthrough
CT: control target
= control target key end

     0   :  { %s1592_s9 = smov 0   ;;  %s2264_s0 = inlined_call_operand.vmem [shape: f32[2,1,256], index: 0, kind: input, shape index: {}]   ;;  %s2265_s1 = inlined_call_operand.vmem [shape: f32[64,25], index: 1, kind: input, shape index: {}]   ;;  %s2266_s2 = inlined_call_operand.vmem [shape: f32[2,8,256], index: 2, kind: output, shape index: {}]  }
   0x1 LB: > { %s1418_s10 = sadd.s32 4294967295, %s1550_s9   ;;  %p1422_p0 = scmp.ge.s32.totalorder %s1550_s9, 1  ;;  %s1550_s9 = sphi %s1592_s9, %s12_s9  }
   0x2   : > { %p111_p1 = scmp.lt.s32.totalorder %s1550_s9, 3 }
   0x4   : > { %p112_p2 = pnand %p1422_p0, %p111_p1 }
   0x6   : > { %115 = sbr.rel (%p112_p2) target bundleno = 451 (0x1c3), region = 28 }
   0xb   : > { %v142_v0 = vld [vmem:[%s2265_s1 + $0x8] sm:$0xff]  ;;  %v141_v1 = vld [vmem:[%s2265_s1] sm:$0xff]  ;;  %v2282_v2 = vmov 24   ;;  %v2280_v3 = vmov 0   ;;  %v2278_v4 = vmov 1   ;;  %v143_v5 = vld [vmem:[%s2265_s1 + $0x10] sm:$0xff]  ;;  %v156_v25 = vlaneseq }
   0xc   : > { %1462 = vset.pattern.permute.xlu0 %v2282_v2  ;;  %1464 = vset.pattern.permute.xlu1 %v2280_v3  ;;  %v1555_v6 = vmov 2   ;;  %v1617_v7 = vld [vmem:[%s2265_s1 + $0x18] sm:$0xff]  ;;  %v2274_v8 = vmov 4   ;;  %v1624_v9 = vld [vmem:[%s2265_s1 + $0x20] sm:$0xff]  ;;  %v1557_v10 = vmov 5   ;;  %v1631_v11 = vld [vmem:[%s2265_s1 + $0x28] sm:$0xff] }
   0xd   : > { %176 = vperm.xlu1 %1464, %v142_v0   ;;  %169 = vperm.xlu0 %1462, %v141_v1   ;;  %v2270_v12 = vmov 7   ;;  %v2276_v13 = vmov 3   ;;  %v2273_v14 = vmov 6   ;;  %v2269_v15 = vmov 9   ;;  %v1682_v20 = vld [vmem:[%s2265_s1 + $0x30] sm:$0xff]  ;;  %v1691_v21 = vld [vmem:[%s2265_s1 + $0x38] sm:$0xff] }
   0xe   : > { %v2268_v16 = vmov 10   ;;  %v1563_v17 = vmov 12   ;;  %v2272_v18 = vmov 13   ;;  %v2284_v19 = vmov 15   ;;  %p132_p3 = scmp.lt.s32.totalorder %s1418_s10, 1 }
   0xf   : > { %v1566_v22 = vmov 8   ;;  %v1721_v28 = vshrl.u32 %v156_v25, 7  ;;  %v1567_v31 = vmov 14   ;;  %v1568_v40 = vmov 17  }
  0x10   : > { %s2305_s10 = smov (!%p132_p3, %s1418_s10), 1  ;;  %v1569_v47 = vmov 20   ;;  %v1570_v55 = vmov 23  }
  0x11   : > { %1465 = vset.pattern.permute.xlu1 %v2278_v4  ;;  %1463 = vset.pattern.permute.xlu0 %v2280_v3  ;;  %s1423_s27 = sshll.u32 %s2305_s10, 1  ;;  %v1732_v32 = vsub.s32 0, %v1721_v28  ;;  %v1735_v33 = vsub.s32 1, %v1721_v28  ;;  %v1780_v54 = vsub.s32 2, %v1721_v28  ;;  %v1784_v56 = vsub.s32 3, %v1721_v28  ;;  %s1428_s3 = sshll.u32 %s2305_s10, 4 }
  0x12   : > { %190 = vperm.xlu1 %1465, %v142_v0   ;;  %152 = vperm.xlu0 %1463, %v141_v1   ;;  %s135_s30 = scalar_lea.vmem %s2264_s0, %s1423_s27  ;;  %s140_s6 = scalar_lea.vmem %s2266_s2, %s1428_s3 }
  0x13   : > { %v149_v34 = vld [vmem:[%s135_s30] sm:$0x3] }
  0x14   : > { %v159_v37 = vrot.slane %v149_v34, %v1732_v32  ;;  %v163_v38 = vrot.slane %v149_v34, %v1735_v33  ;;  %v2267_v34 = vmov 11  }
  0x16   : > { %1466 = vset.pattern.permute.xlu1 %v1555_v6  ;;  %309 = vperm.xlu0 %1463, %v143_v5  }
  0x17   : > { %206 = vperm.xlu1 %1466, %v142_v0  }
  0x1a   : > { %442 = vperm.xlu0 %1463, %v1617_v7  }
  0x1b   : > { %1467 = vset.pattern.permute.xlu1 %v2274_v8 }
  0x1c   : > { %238 = vperm.xlu1 %1467, %v142_v0  }
  0x1e   : > { %511 = vperm.xlu0 %1463, %v1624_v9  }
  0x20   : > { %1468 = vset.pattern.permute.xlu1 %v1557_v10 }
  0x21   : > { %254 = vperm.xlu1 %1468, %v142_v0  }
  0x22   : > { %1485 = vset.pattern.permute.xlu0 %v2278_v4 }
  0x23   : > { %536 = vperm.xlu0 %1485, %v1631_v11  }
  0x25   : > { %1469 = vset.pattern.permute.xlu1 %v2270_v12 }
  0x26   : > { %286 = vperm.xlu1 %1469, %v142_v0  }
  0x27   : > { %1486 = vset.pattern.permute.xlu0 %v2276_v13 }
  0x28   : > { %222 = vperm.xlu0 %1486, %v142_v0  }
  0x2a   : > { %1470 = vset.pattern.permute.xlu1 %v2282_v2 }
  0x2b   : > { %302 = vperm.xlu1 %1470, %v142_v0  }
  0x2c   : > { %355 = vperm.xlu0 %1486, %v143_v5  }
  0x2f   : > { %1471 = vset.pattern.permute.xlu1 %v2278_v4 }
  0x30   : > { %323 = vperm.xlu1 %1471, %v143_v5   ;;  %464 = vperm.xlu0 %1486, %v1617_v7  }
  0x34   : > { %1472 = vset.pattern.permute.xlu1 %v1555_v6  ;;  %580 = vperm.xlu0 %1486, %v1624_v9  }
  0x35   : > { %339 = vperm.xlu1 %1472, %v143_v5  }
  0x38   : > { %1490 = vset.pattern.permute.xlu0 %v2274_v8 }
  0x39   : > { %1473 = vset.pattern.permute.xlu1 %v2274_v8  ;;  %608 = vperm.xlu0 %1490, %v1631_v11  }
  0x3a   : > { %371 = vperm.xlu1 %1473, %v143_v5  }
  0x3d   : > { %1491 = vset.pattern.permute.xlu0 %v2273_v14 }
  0x3e   : > { %1474 = vset.pattern.permute.xlu1 %v1557_v10  ;;  %270 = vperm.xlu0 %1491, %v142_v0  }
  0x3f   : > { %387 = vperm.xlu1 %1474, %v143_v5  }
  0x42   : > { %403 = vperm.xlu0 %1491, %v143_v5  }
  0x43   : > { %1475 = vset.pattern.permute.xlu1 %v2270_v12 }
  0x44   : > { %419 = vperm.xlu1 %1475, %v143_v5  }
  0x46   : > { %488 = vperm.xlu0 %1491, %v1617_v7  }
  0x48   : > { %1476 = vset.pattern.permute.xlu1 %v2282_v2 }
  0x49   : > { %435 = vperm.xlu1 %1476, %v143_v5  }
  0x4a   : > { %652 = vperm.xlu0 %1491, %v1624_v9  }
  0x4d   : > { %1477 = vset.pattern.permute.xlu1 %v2278_v4 }
  0x4e   : > { %448 = vperm.xlu1 %1477, %v1617_v7   ;;  %1495 = vset.pattern.permute.xlu0 %v2270_v12 }
  0x4f   : > { %680 = vperm.xlu0 %1495, %v1631_v11  }
  0x52   : > { %1478 = vset.pattern.permute.xlu1 %v1555_v6 }
  0x53   : > { %456 = vperm.xlu1 %1478, %v1617_v7   ;;  %1497 = vset.pattern.permute.xlu0 %v2269_v15 }
  0x54   : > { %724 = vperm.xlu0 %1497, %v1624_v9  }
  0x57   : > { %1479 = vset.pattern.permute.xlu1 %v2274_v8 }
  0x58   : > { %472 = vperm.xlu1 %1479, %v1617_v7   ;;  %1500 = vset.pattern.permute.xlu0 %v2268_v16 }
  0x59   : > { %752 = vperm.xlu0 %1500, %v1631_v11  }
  0x5c   : > { %1480 = vset.pattern.permute.xlu1 %v1557_v10 }
  0x5d   : > { %480 = vperm.xlu1 %1480, %v1617_v7   ;;  %1502 = vset.pattern.permute.xlu0 %v1563_v17 }
  0x5e   : > { %796 = vperm.xlu0 %1502, %v1624_v9  }
  0x61   : > { %1481 = vset.pattern.permute.xlu1 %v2270_v12 }
  0x62   : > { %496 = vperm.xlu1 %1481, %v1617_v7   ;;  %1505 = vset.pattern.permute.xlu0 %v2272_v18 }
  0x63   : > { %824 = vperm.xlu0 %1505, %v1631_v11  }
  0x66   : > { %1482 = vset.pattern.permute.xlu1 %v2282_v2 }
  0x67   : > { %504 = vperm.xlu1 %1482, %v1617_v7   ;;  %1507 = vset.pattern.permute.xlu0 %v2284_v19 }
  0x68   : > { %868 = vperm.xlu0 %1507, %v1624_v9  }
  0x6b   : > { %1483 = vset.pattern.permute.xlu1 %v2280_v3 }
  0x6c   : > { %516 = vperm.xlu1 %1483, %v1631_v11   ;;  %1510 = vset.pattern.permute.xlu0 %v2282_v2 }
  0x6d   : > { %896 = vperm.xlu0 %1510, %v1631_v11  }
  0x70   : > { %1484 = vset.pattern.permute.xlu1 %v2278_v4 }
  0x71   : > { %532 = vperm.xlu1 %1484, %v1624_v9   ;;  %1513 = vset.pattern.permute.xlu0 %v1555_v6 }
  0x72   : > { %919 = vperm.xlu0 %1513, %v1682_v20  }
  0x75   : > { %1487 = vset.pattern.permute.xlu1 %v1555_v6 }
  0x76   : > { %556 = vperm.xlu1 %1487, %v1624_v9   ;;  %1004 = vperm.xlu0 %1513, %v1691_v21  }
  0x7a   : > { %560 = vperm.xlu1 %1487, %v1631_v11   ;;  %1518 = vset.pattern.permute.xlu0 %v1557_v10 }
  0x7b   : > { %943 = vperm.xlu0 %1518, %v1682_v20  }
  0x7e   : > { %1488 = vset.pattern.permute.xlu1 %v2276_v13 }
  0x7f   : > { %584 = vperm.xlu1 %1488, %v1631_v11   ;;  %1052 = vperm.xlu0 %1518, %v1691_v21  }
  0x83   : > { %1489 = vset.pattern.permute.xlu1 %v2274_v8  ;;  %1523 = vset.pattern.permute.xlu0 %v1566_v22 }
  0x84   : > { %604 = vperm.xlu1 %1489, %v1624_v9   ;;  %1100 = vperm.xlu0 %1523, %v1691_v21  }
  0x88   : > { %1492 = vset.pattern.permute.xlu1 %v1557_v10  ;;  %v1708_v23 = vpop.permute.xlu1 %176  ;;  %1526 = vset.pattern.permute.xlu0 %v2273_v14  ;;  %v170_v24 = vpop.permute.xlu0 %169  ;;  %v1821_v10 = vsub.s32 4, %v1721_v28 }
  0x89   : > { %628 = vperm.xlu1 %1492, %v1624_v9   ;;  %951 = vperm.xlu0 %1526, %v1682_v20  }
  0x8d   : > { %632 = vperm.xlu1 %1492, %v1631_v11   ;;  %v191_v26 = vpop.permute.xlu1 %190  ;;  %v153_v27 = vpop.permute.xlu0 %152  ;;  %1529 = vset.pattern.permute.xlu0 %v1563_v17 }
  0x8e   : > { %1164 = vperm.xlu0 %1529, %v1691_v21   ;;  %v166_v41 = vmul.f32 %v159_v37, %v153_v27  ;;  %v167_v42 = vmul.f32 %v163_v38, %v153_v27  ;;  %v1829_v37 = vsub.s32 5, %v1721_v28 }
  0x90   : > { %v1754_v45 = vadd.f32 %v170_v24, %v166_v41  ;;  %v1756_v46 = vadd.f32 %v170_v24, %v167_v42 }
  0x91   : > { %1493 = vset.pattern.permute.xlu1 %v2273_v14  ;;  %v1724_v29 = vpop.permute.xlu0 %309 }
  0x92   : > { %656 = vperm.xlu1 %1493, %v1631_v11   ;;  %v207_v30 = vpop.permute.xlu1 %206  ;;  %1532 = vset.pattern.permute.xlu0 %v1567_v31  ;;  %v1764_v50 = vrot.slane %v1754_v45, %v1732_v32  ;;  %v1768_v51 = vrot.slane %v1756_v46, %v1732_v32  ;;  %v1772_v52 = vrot.slane %v1754_v45, %v1735_v33 }
  0x93   : > { %1196 = vperm.xlu0 %1532, %v1691_v21   ;;  %v1776_v53 = vrot.slane %v1756_v46, %v1735_v33  ;;  %v1799_v63 = vrot.slane %v1754_v45, %v1780_v54  ;;  %v1804_v0 = vrot.slane %v1756_v46, %v1780_v54  ;;  %v1808_v1 = vrot.slane %v1754_v45, %v1784_v56 }
  0x94   : > { %v187_v59 = vmul.f32 %v1764_v50, %v1708_v23  ;;  %v188_v60 = vmul.f32 %v1768_v51, %v1708_v23  ;;  %v201_v61 = vmul.f32 %v1772_v52, %v191_v26  ;;  %v1812_v5 = vrot.slane %v1756_v46, %v1784_v56 }
  0x95   : > { %v1738_v35 = vpop.permute.xlu0 %442  ;;  %v202_v62 = vmul.f32 %v1776_v53, %v191_v26  ;;  %v217_v24 = vmul.f32 %v1799_v63, %v207_v30  ;;  %v218_v25 = vmul.f32 %v1804_v0, %v207_v30  ;;  %v1840_v30 = vrot.slane %v1756_v46, %v1821_v10 }
  0x96   : > { %1494 = vset.pattern.permute.xlu1 %v2270_v12 }
  0x97   : > { %676 = vperm.xlu1 %1494, %v1624_v9   ;;  %v1742_v36 = vpop.permute.xlu1 %238  ;;  %1535 = vset.pattern.permute.xlu0 %v1568_v40  ;;  %v204_v23 = vadd.f32 %v202_v62, %v188_v60  ;;  %v1836_v40 = vrot.slane %v1754_v45, %v1821_v10  ;;  %v1846_v60 = vsub.s32 7, %v1721_v28 }
  0x98   : > { %1244 = vperm.xlu0 %1535, %v1691_v21   ;;  %v250_v62 = vmul.f32 %v1840_v30, %v1742_v36 }
  0x99   : > { %v1746_v39 = vpop.permute.xlu0 %511  ;;  %v220_v42 = vadd.f32 %v218_v25, %v204_v23  ;;  %v1859_v23 = vrot.slane %v1756_v46, %v1829_v37 }
  0x9b   : > { %1496 = vset.pattern.permute.xlu1 %v1566_v22  ;;  %v203_v22 = vadd.f32 %v201_v61, %v187_v59  ;;  %v1843_v59 = vsub.s32 6, %v1721_v28  ;;  %v249_v61 = vmul.f32 %v1836_v40, %v1742_v36 }
  0x9c   : > { %700 = vperm.xlu1 %1496, %v1624_v9   ;;  %v1749_v43 = vpop.permute.xlu1 %254  ;;  %1538 = vset.pattern.permute.xlu0 %v1569_v47 }
  0x9d   : > { %1292 = vperm.xlu0 %1538, %v1691_v21   ;;  %v219_v41 = vadd.f32 %v217_v24, %v203_v22  ;;  %v1855_v22 = vrot.slane %v1754_v45, %v1829_v37  ;;  %v1871_v36 = vrot.slane %v1756_v46, %v1843_v59 }
  0x9e   : > { %v1752_v44 = vpop.permute.xlu0 %536 }
  0xa0   : > { %704 = vperm.xlu1 %1496, %v1631_v11  }
  0xa1   : > { %v1759_v48 = vpop.permute.xlu1 %286  ;;  %1541 = vset.pattern.permute.xlu0 %v1570_v55 }
  0xa2   : > { %1340 = vperm.xlu0 %1541, %v1691_v21  }
  0xa3   : > { %v223_v49 = vpop.permute.xlu0 %222 }
  0xa4   : > { %1498 = vset.pattern.permute.xlu1 %v2269_v15  ;;  %v233_v26 = vmul.f32 %v1808_v1, %v223_v49  ;;  %v234_v27 = vmul.f32 %v1812_v5, %v223_v49 }
  0xa5   : > { %728 = vperm.xlu1 %1498, %v1631_v11  }
  0xa6   : > { %v1786_v57 = vpop.permute.xlu1 %302  ;;  %1543 = vset.pattern.permute.xlu0 %v2282_v2  ;;  %v235_v49 = vadd.f32 %v233_v26, %v219_v41  ;;  %v236_v55 = vadd.f32 %v234_v27, %v220_v42  ;;  %v1867_v27 = vrot.slane %v1754_v45, %v1843_v59  ;;  %v265_v41 = vmul.f32 %v1855_v22, %v1749_v43 }
  0xa7   : > { %v1789_v58 = vpop.permute.xlu0 %355  ;;  %v266_v42 = vmul.f32 %v1859_v23, %v1749_v43 }
  0xa8   : > { %v251_v25 = vadd.f32 %v249_v61, %v235_v49  ;;  %v252_v26 = vadd.f32 %v250_v62, %v236_v55  ;;  %v1880_v49 = vrot.slane %v1754_v45, %v1846_v60  ;;  %v1884_v55 = vrot.slane %v1756_v46, %v1846_v60 }
  0xa9   : > { %1499 = vset.pattern.permute.xlu1 %v2268_v16 }
  0xaa   : > { %748 = vperm.xlu1 %1499, %v1624_v9   ;;  %v267_v62 = vadd.f32 %v265_v41, %v251_v25  ;;  %v297_v43 = vmul.f32 %v1880_v49, %v1759_v48  ;;  %v298_v45 = vmul.f32 %v1884_v55, %v1759_v48 }
  0xab   : > { %v1816_v6 = vpop.permute.xlu1 %323  ;;  %v1818_v7 = vpop.permute.xlu0 %464 }
  0xae   : > { %1501 = vset.pattern.permute.xlu1 %v2267_v34  ;;  %v268_v34 = vadd.f32 %v266_v42, %v252_v26 }
  0xaf   : > { %772 = vperm.xlu1 %1501, %v1624_v9   ;;  %v1832_v38 = vpop.permute.xlu0 %580 }
  0xb0   : > { %v340_v47 = vpop.permute.xlu1 %339 }
  0xb3   : > { %776 = vperm.xlu1 %1501, %v1631_v11  }
  0xb4   : > { %v1861_v24 = vpop.permute.xlu0 %608 }
  0xb5   : > { %v1863_v28 = vpop.permute.xlu1 %371 }
  0xb7   : > { %1503 = vset.pattern.permute.xlu1 %v1563_v17 }
  0xb8   : > { %800 = vperm.xlu1 %1503, %v1631_v11  }
  0xb9   : > { %v271_v61 = vpop.permute.xlu0 %270 }
  0xba   : > { %v281_v17 = vmul.f32 %v1867_v27, %v271_v61  ;;  %v282_v16 = vmul.f32 %v1871_v36, %v271_v61  ;;  %v1889_v15 = vpop.permute.xlu1 %387 }
  0xbc   : > { %v283_v12 = vadd.f32 %v281_v17, %v267_v62  ;;  %v284_v46 = vadd.f32 %v282_v16, %v268_v34  ;;  %1504 = vset.pattern.permute.xlu1 %v2272_v18 }
  0xbd   : > { %820 = vperm.xlu1 %1504, %v1624_v9  }
  0xbe   : > { %v299_v25 = vadd.f32 %v297_v43, %v283_v12  ;;  %v300_v26 = vadd.f32 %v298_v45, %v284_v46 }
  0xbf   : > { %v1897_v41 = vpop.permute.xlu1 %419 }
  0xc0   : > { %v1900_v42 = vadd.f32 %v1786_v57, %v299_v25  ;;  %v1903_v61 = vadd.f32 %v1786_v57, %v300_v26 }
  0xc1   : > { %1506 = vset.pattern.permute.xlu1 %v1567_v31 }
  0xc2   : > { %844 = vperm.xlu1 %1506, %v1624_v9   ;;  %v1909_v16 = vrot.slane %v1900_v42, %v1732_v32  ;;  %v1913_v12 = vrot.slane %v1903_v61, %v1732_v32  ;;  %v1917_v48 = vrot.slane %v1900_v42, %v1735_v33  ;;  %v1921_v57 = vrot.slane %v1903_v61, %v1735_v33 }
  0xc3   : > { %v1935_v45 = vrot.slane %v1900_v42, %v1780_v54  ;;  %v1939_v46 = vrot.slane %v1903_v61, %v1780_v54  ;;  %v1943_v25 = vrot.slane %v1900_v42, %v1784_v56  ;;  %v1954_v8 = vrot.slane %v1900_v42, %v1821_v10 }
  0xc4   : > { %v1923_v34 = vpop.permute.xlu1 %435  ;;  %v320_v31 = vmul.f32 %v1909_v16, %v1724_v29  ;;  %v321_v62 = vmul.f32 %v1913_v12, %v1724_v29  ;;  %v334_v17 = vmul.f32 %v1917_v48, %v1816_v6  ;;  %v335_v43 = vmul.f32 %v1921_v57, %v1816_v6 }
  0xc5   : > { %2288 = vst [vmem:[#allocation2_spill] sm:$0xff] %v1939_v46  ;;  %v1947_v29 = vrot.slane %v1903_v61, %v1784_v56  ;;  %v350_v18 = vmul.f32 %v1935_v45, %v340_v47  ;;  %v351_v14 = vmul.f32 %v1939_v46, %v340_v47  ;;  %v1958_v13 = vrot.slane %v1903_v61, %v1821_v10 }
  0xc6   : > { %848 = vperm.xlu1 %1506, %v1631_v11   ;;  %v336_v26 = vadd.f32 %v334_v17, %v320_v31  ;;  %v337_v6 = vadd.f32 %v335_v43, %v321_v62  ;;  %v366_v19 = vmul.f32 %v1943_v25, %v1789_v58  ;;  %v2290_v62 = vmov 15  }
  0xc7   : > { %2289 = vst [vmem:[#allocation3_spill] sm:$0xff] %v1958_v13  ;;  %v367_v31 = vmul.f32 %v1947_v29, %v1789_v58  ;;  %v445_v47 = vmul.f32 %v1738_v35, %v1764_v50  ;;  %v446_v17 = vmul.f32 %v1738_v35, %v1768_v51  ;;  %v1978_v58 = vrot.slane %v1903_v61, %v1829_v37 }
  0xc8   : > { %v352_v3 = vadd.f32 %v350_v18, %v336_v26  ;;  %v353_v2 = vadd.f32 %v351_v14, %v337_v6  ;;  %v1974_v26 = vrot.slane %v1900_v42, %v1829_v37  ;;  %v382_v50 = vmul.f32 %v1954_v8, %v1863_v28 }
  0xc9   : > { %v449_v4 = vpop.permute.xlu1 %448  ;;  %v383_v35 = vmul.f32 %v1958_v13, %v1863_v28  ;;  %v467_v6 = vmul.f32 %v1818_v7, %v1808_v1  ;;  %v404_v1 = vpop.permute.xlu0 %403 }
  0xca   : > { %1508 = vset.pattern.permute.xlu1 %v2290_v62  ;;  %v451_v43 = vmul.f32 %v449_v4, %v1772_v52  ;;  %v452_v46 = vmul.f32 %v449_v4, %v1776_v53  ;;  %v368_v14 = vadd.f32 %v366_v19, %v352_v3  ;;  %v369_v18 = vadd.f32 %v367_v31, %v353_v2 }
  0xcb   : > { %872 = vperm.xlu1 %1508, %v1631_v11   ;;  %v2291_v11 = vmov 24   ;;  %v468_v31 = vmul.f32 %v1818_v7, %v1812_v5  ;;  %v2292_v7 = vmov 0  }
  0xcc   : > { %v453_v4 = vadd.f32 %v451_v43, %v445_v47  ;;  %v454_v52 = vadd.f32 %v452_v46, %v446_v17  ;;  %v384_v19 = vadd.f32 %v382_v50, %v368_v14  ;;  %v385_v53 = vadd.f32 %v383_v35, %v369_v18 }
  0xcd   : > { %v398_v46 = vmul.f32 %v1974_v26, %v1889_v15  ;;  %v2010_v50 = vrot.slane %v1900_v42, %v1846_v60  ;;  %v2014_v35 = vrot.slane %v1903_v61, %v1846_v60 }
  0xce   : > { %v457_v51 = vpop.permute.xlu1 %456 }
  0xcf   : > { %v459_v3 = vmul.f32 %v457_v51, %v1799_v63  ;;  %v460_v2 = vmul.f32 %v457_v51, %v1804_v0  ;;  %1509 = vset.pattern.permute.xlu1 %v2291_v11  ;;  %v399_v63 = vmul.f32 %v1978_v58, %v1889_v15  ;;  %v1998_v0 = vrot.slane %v1900_v42, %v1843_v59 }
  0xd0   : > { %892 = vperm.xlu1 %1509, %v1624_v9   ;;  %v2002_v9 = vrot.slane %v1903_v61, %v1843_v59  ;;  %v400_v17 = vadd.f32 %v398_v46, %v384_v19  ;;  %v2293_v61 = vmov 1  }
  0xd1   : > { %v461_v28 = vadd.f32 %v459_v3, %v453_v4  ;;  %v462_v13 = vadd.f32 %v460_v2, %v454_v52  ;;  %v401_v5 = vadd.f32 %v399_v63, %v385_v53  ;;  %v414_v51 = vmul.f32 %v1998_v0, %v404_v1  ;;  %v489_v52 = vpop.permute.xlu0 %488 }
  0xd2   : > { %v415_v4 = vmul.f32 %v2002_v9, %v404_v1 }
  0xd3   : > { %v473_v47 = vpop.permute.xlu1 %472  ;;  %v469_v43 = vadd.f32 %v467_v6, %v461_v28  ;;  %v470_v14 = vadd.f32 %v468_v31, %v462_v13  ;;  %v416_v13 = vadd.f32 %v414_v51, %v400_v17  ;;  %v430_v31 = vmul.f32 %v2010_v50, %v1897_v41 }
  0xd4   : > { %1511 = vset.pattern.permute.xlu1 %v2292_v7  ;;  %v475_v18 = vmul.f32 %v473_v47, %v1836_v40  ;;  %v476_v15 = vmul.f32 %v473_v47, %v1840_v30  ;;  %v417_v3 = vadd.f32 %v415_v4, %v401_v5  ;;  %v491_v40 = vmul.f32 %v489_v52, %v1867_v27 }
  0xd5   : > { %905 = vperm.xlu1 %1511, %v1682_v20   ;;  %v492_v30 = vmul.f32 %v489_v52, %v1871_v36  ;;  %v431_v28 = vmul.f32 %v2014_v35, %v1897_v41  ;;  %v432_v36 = vadd.f32 %v430_v31, %v416_v13  ;;  %v2294_v5 = vmov 3  }
  0xd6   : > { %v477_v19 = vadd.f32 %v475_v18, %v469_v43  ;;  %v478_v53 = vadd.f32 %v476_v15, %v470_v14 }
  0xd7   : > { %v433_v63 = vadd.f32 %v431_v28, %v417_v3  ;;  %v2033_v43 = vadd.f32 %v1923_v34, %v432_v36 }
  0xd8   : > { %v481_v2 = vpop.permute.xlu1 %480 }
  0xd9   : > { %v483_v42 = vmul.f32 %v481_v2, %v1855_v22  ;;  %v484_v6 = vmul.f32 %v481_v2, %v1859_v23  ;;  %1512 = vset.pattern.permute.xlu1 %v2293_v61  ;;  %v2036_v41 = vadd.f32 %v1923_v34, %v433_v63  ;;  %v522_v34 = vrot.slane %v2033_v43, %v1732_v32 }
  0xda   : > { %911 = vperm.xlu1 %1512, %v1682_v20  }
  0xdb   : > { %v485_v27 = vadd.f32 %v483_v42, %v477_v19  ;;  %v486_v46 = vadd.f32 %v484_v6, %v478_v53  ;;  %v546_v52 = vrot.slane %v2036_v41, %v1735_v33  ;;  %v526_v13 = vrot.slane %v2036_v41, %v1732_v32 }
  0xdd   : > { %v497_v1 = vpop.permute.xlu1 %496  ;;  %v493_v47 = vadd.f32 %v491_v40, %v485_v27  ;;  %v494_v17 = vadd.f32 %v492_v30, %v486_v46  ;;  %v550_v19 = vmul.f32 %v546_v52, %v1752_v44  ;;  %v527_v27 = vmul.f32 %v522_v34, %v1746_v39 }
  0xde   : > { %v499_v22 = vmul.f32 %v497_v1, %v1880_v49  ;;  %v500_v23 = vmul.f32 %v497_v1, %v1884_v55  ;;  %1514 = vset.pattern.permute.xlu1 %v2294_v5  ;;  %v2295_v49 = vmov 4   ;;  %v542_v55 = vrot.slane %v2033_v43, %v1735_v33 }
  0xdf   : > { %927 = vperm.xlu1 %1514, %v1682_v20   ;;  %v528_v46 = vmul.f32 %v526_v13, %v1746_v39 }
  0xe0   : > { %v501_v14 = vadd.f32 %v499_v22, %v493_v47  ;;  %v502_v18 = vadd.f32 %v500_v23, %v494_v17  ;;  %v549_v2 = vmul.f32 %v542_v55, %v1752_v44  ;;  %v566_v44 = vrot.slane %v2033_v43, %v1780_v54 }
  0xe2   : > { %v505_v15 = vpop.permute.xlu1 %504 }
  0xe3   : > { %v2038_v51 = vadd.f32 %v505_v15, %v501_v14  ;;  %v2040_v4 = vadd.f32 %v505_v15, %v502_v18  ;;  %1515 = vset.pattern.permute.xlu1 %v2295_v49 }
  0xe4   : > { %935 = vperm.xlu1 %1515, %v1682_v20  }
  0xe7   : > { %v517_v3 = vpop.permute.xlu1 %516 }
  0xe8   : > { %v529_v40 = vmul.f32 %v522_v34, %v517_v3  ;;  %v530_v30 = vmul.f32 %v526_v13, %v517_v3  ;;  %1516 = vset.pattern.permute.xlu1 %v2292_v7  ;;  %v570_v7 = vrot.slane %v2036_v41, %v1780_v54  ;;  %v2296_v3 = vmov 6  }
  0xe9   : > { %974 = vperm.xlu1 %1516, %v1691_v21  }
  0xea   : > { %v553_v53 = vadd.f32 %v549_v2, %v529_v40  ;;  %v554_v42 = vadd.f32 %v550_v19, %v530_v30  ;;  %v614_v19 = vrot.slane %v2033_v43, %v1821_v10 }
  0xec   : > { %v533_v6 = vpop.permute.xlu1 %532 }
  0xed   : > { %1517 = vset.pattern.permute.xlu1 %v2293_v61  ;;  %v547_v31 = vmul.f32 %v542_v55, %v533_v6  ;;  %v548_v28 = vmul.f32 %v546_v52, %v533_v6  ;;  %v590_v55 = vrot.slane %v2033_v43, %v1784_v56  ;;  %v594_v52 = vrot.slane %v2036_v41, %v1784_v56 }
  0xee   : > { %988 = vperm.xlu1 %1517, %v1691_v21  }
  0xef   : > { %v551_v63 = vadd.f32 %v547_v31, %v527_v27  ;;  %v552_v1 = vadd.f32 %v548_v28, %v528_v46  ;;  %v596_v2 = vmul.f32 %v594_v52, %v1832_v38  ;;  %v2297_v46 = vmov 7  }
  0xf1   : > { %v557_v36 = vpop.permute.xlu1 %556 }
  0xf2   : > { %v571_v47 = vmul.f32 %v566_v44, %v557_v36  ;;  %v572_v17 = vmul.f32 %v570_v7, %v557_v36  ;;  %1519 = vset.pattern.permute.xlu1 %v2294_v5  ;;  %v642_v36 = vrot.slane %v2036_v41, %v1829_v37 }
  0xf3   : > { %1020 = vperm.xlu1 %1519, %v1691_v21  }
  0xf4   : > { %v575_v61 = vadd.f32 %v571_v47, %v551_v63  ;;  %v576_v22 = vadd.f32 %v572_v17, %v552_v1  ;;  %v2298_v17 = vmov 9  }
  0xf5   : > { %v561_v23 = vpop.permute.xlu1 %560 }
  0xf6   : > { %v573_v14 = vmul.f32 %v566_v44, %v561_v23  ;;  %v574_v39 = vmul.f32 %v570_v7, %v561_v23  ;;  %v600_v31 = vadd.f32 %v596_v2, %v576_v22 }
  0xf7   : > { %1520 = vset.pattern.permute.xlu1 %v2295_v49  ;;  %v595_v49 = vmul.f32 %v590_v55, %v1832_v38  ;;  %v638_v38 = vrot.slane %v2033_v43, %v1829_v37 }
  0xf8   : > { %v577_v18 = vadd.f32 %v573_v14, %v553_v53  ;;  %v578_v15 = vadd.f32 %v574_v39, %v554_v42  ;;  %1036 = vperm.xlu1 %1520, %v1691_v21   ;;  %v618_v53 = vrot.slane %v2036_v41, %v1821_v10 }
  0xf9   : > { %v599_v6 = vadd.f32 %v595_v49, %v575_v61  ;;  %v621_v61 = vmul.f32 %v614_v19, %v1861_v24  ;;  %v666_v49 = vrot.slane %v2036_v41, %v1843_v59 }
  0xfa   : > { %v585_v5 = vpop.permute.xlu1 %584  ;;  %v622_v22 = vmul.f32 %v618_v53, %v1861_v24  ;;  %v653_v24 = vpop.permute.xlu0 %652 }
  0xfb   : > { %v597_v34 = vmul.f32 %v590_v55, %v585_v5  ;;  %v598_v13 = vmul.f32 %v594_v52, %v585_v5 }
  0xfc   : > { %1521 = vset.pattern.permute.xlu1 %v2296_v3  ;;  %v662_v3 = vrot.slane %v2033_v43, %v1843_v59 }
  0xfd   : > { %v601_v40 = vadd.f32 %v597_v34, %v577_v18  ;;  %v602_v30 = vadd.f32 %v598_v13, %v578_v15  ;;  %1068 = vperm.xlu1 %1521, %v1691_v21   ;;  %v2299_v13 = vmov 10  }
  0xff   : > { %v605_v42 = vpop.permute.xlu1 %604  ;;  %v625_v18 = vadd.f32 %v621_v61, %v601_v40  ;;  %v626_v15 = vadd.f32 %v622_v22, %v602_v30  ;;  %v734_v61 = vrot.slane %v2038_v51, %v1735_v33  ;;  %v738_v22 = vrot.slane %v2040_v4, %v1735_v33 }
 0x100   : > { %v619_v28 = vmul.f32 %v614_v19, %v605_v42  ;;  %v620_v27 = vmul.f32 %v618_v53, %v605_v42  ;;  %v2300_v42 = vmov 11  }
 0x101   : > { %1522 = vset.pattern.permute.xlu1 %v2297_v46 }
 0x102   : > { %v623_v44 = vadd.f32 %v619_v28, %v599_v6  ;;  %v624_v7 = vadd.f32 %v620_v27, %v600_v31  ;;  %1084 = vperm.xlu1 %1522, %v1691_v21   ;;  %v667_v6 = vmul.f32 %v662_v3, %v653_v24  ;;  %v668_v31 = vmul.f32 %v666_v49, %v653_v24 }
 0x103   : > { %v686_v28 = vrot.slane %v2033_v43, %v1846_v60  ;;  %v690_v27 = vrot.slane %v2036_v41, %v1846_v60  ;;  %v710_v43 = vrot.slane %v2038_v51, %v1732_v32  ;;  %v714_v41 = vrot.slane %v2040_v4, %v1732_v32 }
 0x104   : > { %v629_v63 = vpop.permute.xlu1 %628 }
 0x105   : > { %v643_v1 = vmul.f32 %v638_v38, %v629_v63  ;;  %v644_v47 = vmul.f32 %v642_v36, %v629_v63 }
 0x106   : > { %1524 = vset.pattern.permute.xlu1 %v2298_v17 }
 0x107   : > { %v647_v23 = vadd.f32 %v643_v1, %v623_v44  ;;  %v648_v14 = vadd.f32 %v644_v47, %v624_v7  ;;  %1116 = vperm.xlu1 %1524, %v1691_v21   ;;  %v681_v7 = vpop.permute.xlu0 %680 }
 0x108   : > { %v633_v39 = vpop.permute.xlu1 %632 }
 0x109   : > { %v645_v55 = vmul.f32 %v638_v38, %v633_v39  ;;  %v646_v52 = vmul.f32 %v642_v36, %v633_v39  ;;  %v671_v38 = vadd.f32 %v667_v6, %v647_v23  ;;  %v672_v36 = vadd.f32 %v668_v31, %v648_v14 }
 0x10b   : > { %v649_v5 = vadd.f32 %v645_v55, %v625_v18  ;;  %v650_v34 = vadd.f32 %v646_v52, %v626_v15  ;;  %1525 = vset.pattern.permute.xlu1 %v2299_v13  ;;  %v693_v18 = vmul.f32 %v686_v28, %v681_v7  ;;  %v694_v15 = vmul.f32 %v690_v27, %v681_v7 }
 0x10c   : > { %1132 = vperm.xlu1 %1525, %v1691_v21  }
 0x10d   : > { %v657_v2 = vpop.permute.xlu1 %656 }
 0x10e   : > { %v669_v19 = vmul.f32 %v662_v3, %v657_v2  ;;  %v670_v53 = vmul.f32 %v666_v49, %v657_v2 }
 0x110   : > { %v673_v40 = vadd.f32 %v669_v19, %v649_v5  ;;  %v674_v30 = vadd.f32 %v670_v53, %v650_v34  ;;  %1527 = vset.pattern.permute.xlu1 %v2300_v42  ;;  %v2301_v5 = vmov 13  }
 0x111   : > { %1148 = vperm.xlu1 %1527, %v1691_v21  }
 0x112   : > { %v677_v44 = vpop.permute.xlu1 %676  ;;  %v697_v49 = vadd.f32 %v693_v18, %v673_v40  ;;  %v698_v24 = vadd.f32 %v694_v15, %v674_v30  ;;  %v810_v18 = vrot.slane %v2040_v4, %v1821_v10 }
 0x113   : > { %v691_v63 = vmul.f32 %v686_v28, %v677_v44  ;;  %v692_v1 = vmul.f32 %v690_v27, %v677_v44  ;;  %v758_v28 = vrot.slane %v2038_v51, %v1780_v54  ;;  %v762_v27 = vrot.slane %v2040_v4, %v1780_v54 }
 0x115   : > { %v695_v47 = vadd.f32 %v691_v63, %v671_v38  ;;  %v696_v17 = vadd.f32 %v692_v1, %v672_v36  ;;  %1528 = vset.pattern.permute.xlu1 %v2297_v46  ;;  %v725_v46 = vpop.permute.xlu0 %724 }
 0x116   : > { %959 = vperm.xlu1 %1528, %v1682_v20   ;;  %v739_v34 = vmul.f32 %v734_v61, %v725_v46  ;;  %v740_v13 = vmul.f32 %v738_v22, %v725_v46 }
 0x117   : > { %v701_v23 = vpop.permute.xlu1 %700 }
 0x118   : > { %v715_v14 = vmul.f32 %v710_v43, %v701_v23  ;;  %v716_v39 = vmul.f32 %v714_v41, %v701_v23 }
 0x119   : > { %v753_v30 = vpop.permute.xlu0 %752 }
 0x11a   : > { %v719_v55 = vadd.f32 %v715_v14, %v695_v47  ;;  %v720_v52 = vadd.f32 %v716_v39, %v696_v17  ;;  %1530 = vset.pattern.permute.xlu1 %v2301_v5  ;;  %v765_v63 = vmul.f32 %v758_v28, %v753_v30  ;;  %v766_v1 = vmul.f32 %v762_v27, %v753_v30 }
 0x11b   : > { %1180 = vperm.xlu1 %1530, %v1691_v21   ;;  %v705_v3 = vpop.permute.xlu1 %704 }
 0x11c   : > { %v717_v2 = vmul.f32 %v710_v43, %v705_v3  ;;  %v718_v19 = vmul.f32 %v714_v41, %v705_v3  ;;  %v743_v53 = vadd.f32 %v739_v34, %v719_v55  ;;  %v744_v42 = vadd.f32 %v740_v13, %v720_v52 }
 0x11d   : > { %v797_v52 = vpop.permute.xlu0 %796 }
 0x11e   : > { %v721_v6 = vadd.f32 %v717_v2, %v697_v49  ;;  %v722_v31 = vadd.f32 %v718_v19, %v698_v24  ;;  %v812_v3 = vmul.f32 %v810_v18, %v797_v52  ;;  %v1573_v49 = vmov 18  }
 0x11f   : > { %1531 = vset.pattern.permute.xlu1 %v2291_v11 }
 0x120   : > { %967 = vperm.xlu1 %1531, %v1682_v20   ;;  %v729_v44 = vpop.permute.xlu1 %728  ;;  %v1572_v20 = vmov 16  }
 0x121   : > { %v741_v7 = vmul.f32 %v734_v61, %v729_v44  ;;  %v742_v40 = vmul.f32 %v738_v22, %v729_v44  ;;  %v782_v61 = vrot.slane %v2038_v51, %v1784_v56  ;;  %v786_v22 = vrot.slane %v2040_v4, %v1784_v56 }
 0x122   : > { %v834_v44 = vrot.slane %v2040_v4, %v1829_v37 }
 0x123   : > { %v745_v38 = vadd.f32 %v741_v7, %v721_v6  ;;  %v746_v36 = vadd.f32 %v742_v40, %v722_v31  ;;  %v1574_v7 = vmov 19  }
 0x124   : > { %1533 = vset.pattern.permute.xlu1 %v2290_v62  ;;  %v806_v62 = vrot.slane %v2038_v51, %v1821_v10 }
 0x125   : > { %1212 = vperm.xlu1 %1533, %v1691_v21   ;;  %v749_v47 = vpop.permute.xlu1 %748  ;;  %v769_v17 = vadd.f32 %v765_v63, %v745_v38  ;;  %v770_v43 = vadd.f32 %v766_v1, %v746_v36 }
 0x126   : > { %v763_v41 = vmul.f32 %v758_v28, %v749_v47  ;;  %v764_v23 = vmul.f32 %v762_v27, %v749_v47  ;;  %v811_v13 = vmul.f32 %v806_v62, %v797_v52  ;;  %v825_v28 = vpop.permute.xlu0 %824  ;;  %v830_v27 = vrot.slane %v2038_v51, %v1829_v37 }
 0x127   : > { %v838_v47 = vmul.f32 %v834_v44, %v825_v28 }
 0x128   : > { %v767_v14 = vadd.f32 %v763_v41, %v743_v53  ;;  %v768_v39 = vadd.f32 %v764_v23, %v744_v42  ;;  %v837_v1 = vmul.f32 %v830_v27, %v825_v28 }
 0x129   : > { %1534 = vset.pattern.permute.xlu1 %v1572_v20 }
 0x12a   : > { %1228 = vperm.xlu1 %1534, %v1691_v21   ;;  %v773_v15 = vpop.permute.xlu1 %772 }
 0x12b   : > { %v787_v46 = vmul.f32 %v782_v61, %v773_v15  ;;  %v788_v55 = vmul.f32 %v786_v22, %v773_v15  ;;  %v854_v15 = vrot.slane %v2038_v51, %v1843_v59 }
 0x12d   : > { %v791_v5 = vadd.f32 %v787_v46, %v767_v14  ;;  %v792_v34 = vadd.f32 %v788_v55, %v768_v39  ;;  %v858_v46 = vrot.slane %v2040_v4, %v1843_v59  ;;  %v1576_v55 = vmov 22  }
 0x12e   : > { %1536 = vset.pattern.permute.xlu1 %v1573_v49  ;;  %v777_v24 = vpop.permute.xlu1 %776 }
 0x12f   : > { %v789_v2 = vmul.f32 %v782_v61, %v777_v24  ;;  %v790_v19 = vmul.f32 %v786_v22, %v777_v24  ;;  %1260 = vperm.xlu1 %1536, %v1691_v21   ;;  %v815_v53 = vadd.f32 %v811_v13, %v791_v5  ;;  %v816_v42 = vadd.f32 %v812_v3, %v792_v34 }
 0x131   : > { %v793_v6 = vadd.f32 %v789_v2, %v769_v17  ;;  %v794_v31 = vadd.f32 %v790_v19, %v770_v43  ;;  %v869_v17 = vpop.permute.xlu0 %868  ;;  %v1575_v43 = vmov 21  }
 0x133   : > { %1537 = vset.pattern.permute.xlu1 %v1574_v7  ;;  %v801_v40 = vpop.permute.xlu1 %800 }
 0x134   : > { %v813_v30 = vmul.f32 %v806_v62, %v801_v40  ;;  %v814_v38 = vmul.f32 %v810_v18, %v801_v40  ;;  %1276 = vperm.xlu1 %1537, %v1691_v21   ;;  %v878_v62 = vrot.slane %v2038_v51, %v1846_v60  ;;  %v882_v18 = vrot.slane %v2040_v4, %v1846_v60 }
 0x135   : > { %v2146_v5 = vpop.permute.xlu0 %896 }
 0x136   : > { %v817_v36 = vadd.f32 %v813_v30, %v793_v6  ;;  %v818_v63 = vadd.f32 %v814_v38, %v794_v31  ;;  %v883_v3 = vmul.f32 %v878_v62, %v869_v17  ;;  %v884_v49 = vmul.f32 %v882_v18, %v869_v17 }
 0x138   : > { %1539 = vset.pattern.permute.xlu1 %v1575_v43  ;;  %v821_v41 = vpop.permute.xlu1 %820  ;;  %v841_v23 = vadd.f32 %v837_v1, %v817_v36  ;;  %v842_v14 = vadd.f32 %v838_v47, %v818_v63 }
 0x139   : > { %v835_v39 = vmul.f32 %v830_v27, %v821_v41  ;;  %v836_v20 = vmul.f32 %v834_v44, %v821_v41  ;;  %1308 = vperm.xlu1 %1539, %v1691_v21   ;;  %v920_v6 = vpop.permute.xlu0 %919 }
 0x13b   : > { %v839_v61 = vadd.f32 %v835_v39, %v815_v53  ;;  %v840_v22 = vadd.f32 %v836_v20, %v816_v42  ;;  %v922_v39 = vmul.f32 %v920_v6, %v1935_v45  ;;  %v2302_v20 = vld [vmem:[#allocation2_spill] sm:$0xff] }
 0x13d   : > { %1540 = vset.pattern.permute.xlu1 %v1576_v55  ;;  %v845_v52 = vpop.permute.xlu1 %844  ;;  %v1005_v38 = vpop.permute.xlu0 %1004 }
 0x13e   : > { %v859_v34 = vmul.f32 %v854_v15, %v845_v52  ;;  %v860_v13 = vmul.f32 %v858_v46, %v845_v52  ;;  %1324 = vperm.xlu1 %1540, %v1691_v21  }
 0x140   : > { %v863_v24 = vadd.f32 %v859_v34, %v839_v61  ;;  %v864_v2 = vadd.f32 %v860_v13, %v840_v22  ;;  %v923_v61 = vmul.f32 %v920_v6, %v2302_v20  ;;  %v2303_v34 = vld [vmem:[#allocation3_spill] sm:$0xff] }
 0x141   : > { %v849_v19 = vpop.permute.xlu1 %848  ;;  %v944_v63 = vpop.permute.xlu0 %943 }
 0x142   : > { %v861_v53 = vmul.f32 %v854_v15, %v849_v19  ;;  %v862_v42 = vmul.f32 %v858_v46, %v849_v19  ;;  %1542 = vset.pattern.permute.xlu1 %v2291_v11  ;;  %v887_v51 = vadd.f32 %v883_v3, %v863_v24  ;;  %v888_v4 = vadd.f32 %v884_v49, %v864_v2 }
 0x143   : > { %1356 = vperm.xlu1 %1542, %v1691_v21   ;;  %v946_v45 = vmul.f32 %v944_v63, %v1974_v26  ;;  %v947_v3 = vmul.f32 %v944_v63, %v1978_v58 }
 0x144   : > { %v865_v31 = vadd.f32 %v861_v53, %v841_v23  ;;  %v866_v28 = vadd.f32 %v862_v42, %v842_v14 }
 0x145   : > { %v2155_v47 = vpop.permute.xlu0 %1052 }
 0x146   : > { %v873_v27 = vpop.permute.xlu1 %872 }
 0x147   : > { %v885_v44 = vmul.f32 %v878_v62, %v873_v27  ;;  %v886_v7 = vmul.f32 %v882_v18, %v873_v27 }
 0x149   : > { %v2151_v40 = vadd.f32 %v885_v44, %v865_v31  ;;  %v2153_v30 = vadd.f32 %v886_v7, %v866_v28  ;;  %v2163_v22 = vpop.permute.xlu0 %1100 }
 0x14b   : > { %v893_v36 = vpop.permute.xlu1 %892 }
 0x14c   : > { %v899_v19 = vadd.f32 %v893_v36, %v887_v51 }
 0x14d   : > { %v952_v55 = vpop.permute.xlu0 %951 }
 0x14e   : > { %v954_v2 = vmul.f32 %v952_v55, %v1998_v0  ;;  %v980_v28 = vrot.slane %v899_v19, %v1732_v32  ;;  %v994_v58 = vrot.slane %v899_v19, %v1735_v33 }
 0x150   : > { %v906_v1 = vpop.permute.xlu1 %905 }
 0x151   : > { %v908_v17 = vmul.f32 %v906_v1, %v1909_v16  ;;  %v909_v21 = vmul.f32 %v906_v1, %v1913_v12 }
 0x155   : > { %v912_v11 = vpop.permute.xlu1 %911 }
 0x156   : > { %v914_v43 = vmul.f32 %v912_v11, %v1917_v48  ;;  %v915_v41 = vmul.f32 %v912_v11, %v1921_v57 }
 0x158   : > { %v916_v23 = vadd.f32 %v914_v43, %v908_v17  ;;  %v917_v14 = vadd.f32 %v915_v41, %v909_v21  ;;  %v1026_v43 = vrot.slane %v899_v19, %v1784_v56 }
 0x15a   : > { %v928_v62 = vpop.permute.xlu1 %927  ;;  %v924_v18 = vadd.f32 %v922_v39, %v916_v23  ;;  %v925_v15 = vadd.f32 %v923_v61, %v917_v14  ;;  %v1042_v61 = vrot.slane %v899_v19, %v1821_v10 }
 0x15b   : > { %v930_v46 = vmul.f32 %v928_v62, %v1943_v25  ;;  %v931_v16 = vmul.f32 %v928_v62, %v1947_v29  ;;  %v955_v25 = vmul.f32 %v952_v55, %v2002_v9  ;;  %v900_v29 = vadd.f32 %v893_v36, %v888_v4 }
 0x15c   : > { %v1010_v9 = vrot.slane %v899_v19, %v1780_v54 }
 0x15d   : > { %v932_v48 = vadd.f32 %v930_v46, %v924_v18  ;;  %v933_v52 = vadd.f32 %v931_v16, %v925_v15  ;;  %v984_v26 = vrot.slane %v900_v29, %v1732_v32  ;;  %v998_v27 = vrot.slane %v900_v29, %v1735_v33 }
 0x15e   : > { %v1014_v51 = vrot.slane %v900_v29, %v1780_v54  ;;  %v1015_v17 = vmul.f32 %v1010_v9, %v1005_v38  ;;  %v1030_v41 = vrot.slane %v900_v29, %v1784_v56  ;;  %v1046_v62 = vrot.slane %v900_v29, %v1821_v10 }
 0x15f   : > { %v936_v12 = vpop.permute.xlu1 %935  ;;  %v1058_v15 = vrot.slane %v899_v19, %v1829_v37  ;;  %v1062_v46 = vrot.slane %v900_v29, %v1829_v37 }
 0x160   : > { %v938_v57 = vmul.f32 %v936_v12, %v1954_v8  ;;  %v939_v13 = vmul.f32 %v936_v12, %v2303_v34  ;;  %v1016_v21 = vmul.f32 %v1014_v51, %v1005_v38  ;;  %v2195_v34 = vadd.f32 %v2146_v5, %v2153_v30 }
 0x162   : > { %v940_v49 = vadd.f32 %v938_v57, %v932_v48  ;;  %v941_v24 = vadd.f32 %v939_v13, %v933_v52  ;;  %v2191_v57 = vadd.f32 %v2146_v5, %v2151_v40  ;;  %v1090_v40 = vrot.slane %v899_v19, %v1846_v60 }
 0x163   : > { %v1110_v30 = vrot.slane %v2195_v34, %v1732_v32 }
 0x164   : > { %v948_v53 = vadd.f32 %v946_v45, %v940_v49  ;;  %v949_v42 = vadd.f32 %v947_v3, %v941_v24  ;;  %v975_v6 = vpop.permute.xlu1 %974  ;;  %v1063_v45 = vmul.f32 %v1058_v15, %v2155_v47  ;;  %v1064_v3 = vmul.f32 %v1062_v46, %v2155_v47 }
 0x165   : > { %v985_v4 = vmul.f32 %v980_v28, %v975_v6  ;;  %v986_v44 = vmul.f32 %v984_v26, %v975_v6  ;;  %v1074_v49 = vrot.slane %v899_v19, %v1843_v59  ;;  %v1078_v24 = vrot.slane %v900_v29, %v1843_v59 }
 0x166   : > { %v2173_v31 = vadd.f32 %v954_v2, %v948_v53  ;;  %v2175_v8 = vadd.f32 %v955_v25, %v949_v42  ;;  %v1094_v6 = vrot.slane %v900_v29, %v1846_v60  ;;  %v1106_v5 = vrot.slane %v2191_v57, %v1732_v32 }
 0x167   : > { %v1122_v19 = vrot.slane %v2191_v57, %v1735_v33  ;;  %v1126_v29 = vrot.slane %v2195_v34, %v1735_v33 }
 0x168   : > { %v1111_v51 = vmul.f32 %v1106_v5, %v2163_v22 }
 0x169   : > { %v989_v0 = vpop.permute.xlu1 %988 }
 0x16a   : > { %v999_v7 = vmul.f32 %v994_v58, %v989_v0  ;;  %v1000_v36 = vmul.f32 %v998_v27, %v989_v0 }
 0x16c   : > { %v1001_v63 = vadd.f32 %v999_v7, %v985_v4  ;;  %v1002_v1 = vadd.f32 %v1000_v36, %v986_v44  ;;  %v1112_v4 = vmul.f32 %v1110_v30, %v2163_v22 }
 0x16e   : > { %v1021_v11 = vpop.permute.xlu1 %1020  ;;  %v1017_v23 = vadd.f32 %v1015_v17, %v1001_v63  ;;  %v1018_v14 = vadd.f32 %v1016_v21, %v1002_v1  ;;  %v1138_v21 = vrot.slane %v2191_v57, %v1780_v54 }
 0x16f   : > { %v1031_v39 = vmul.f32 %v1026_v43, %v1021_v11  ;;  %v1032_v20 = vmul.f32 %v1030_v41, %v1021_v11  ;;  %v1142_v43 = vrot.slane %v2195_v34, %v1780_v54 }
 0x171   : > { %v1033_v16 = vadd.f32 %v1031_v39, %v1017_v23  ;;  %v1034_v12 = vadd.f32 %v1032_v20, %v1018_v14  ;;  %v1170_v20 = vrot.slane %v2191_v57, %v1821_v10 }
 0x173   : > { %v1037_v18 = vpop.permute.xlu1 %1036 }
 0x174   : > { %v1047_v38 = vmul.f32 %v1042_v61, %v1037_v18  ;;  %v1048_v55 = vmul.f32 %v1046_v62, %v1037_v18  ;;  %v1174_v61 = vrot.slane %v2195_v34, %v1821_v10  ;;  %v1154_v62 = vrot.slane %v2191_v57, %v1784_v56 }
 0x175   : > { %v1158_v18 = vrot.slane %v2195_v34, %v1784_v56 }
 0x176   : > { %v1049_v48 = vadd.f32 %v1047_v38, %v1033_v16  ;;  %v1050_v52 = vadd.f32 %v1048_v55, %v1034_v12  ;;  %v1165_v12 = vpop.permute.xlu0 %1164 }
 0x177   : > { %v1175_v38 = vmul.f32 %v1170_v20, %v1165_v12  ;;  %v1176_v55 = vmul.f32 %v1174_v61, %v1165_v12 }
 0x178   : > { %v1069_v13 = vpop.permute.xlu1 %1068  ;;  %v1065_v2 = vadd.f32 %v1063_v45, %v1049_v48  ;;  %v1066_v25 = vadd.f32 %v1064_v3, %v1050_v52 }
 0x179   : > { %v1079_v53 = vmul.f32 %v1074_v49, %v1069_v13  ;;  %v1080_v42 = vmul.f32 %v1078_v24, %v1069_v13  ;;  %v1202_v49 = vrot.slane %v2191_v57, %v1843_v59  ;;  %v1206_v24 = vrot.slane %v2195_v34, %v1843_v59 }
 0x17b   : > { %v1081_v47 = vadd.f32 %v1079_v53, %v1065_v2  ;;  %v1082_v26 = vadd.f32 %v1080_v42, %v1066_v25  ;;  %v1186_v2 = vrot.slane %v2191_v57, %v1829_v37  ;;  %v1190_v25 = vrot.slane %v2195_v34, %v1829_v37  ;;  %v1197_v53 = vpop.permute.xlu0 %1196 }
 0x17c   : > { %v1207_v5 = vmul.f32 %v1202_v49, %v1197_v53  ;;  %v1208_v30 = vmul.f32 %v1206_v24, %v1197_v53 }
 0x17d   : > { %v1085_v28 = vpop.permute.xlu1 %1084 }
 0x17e   : > { %v1095_v58 = vmul.f32 %v1090_v40, %v1085_v28  ;;  %v1096_v27 = vmul.f32 %v1094_v6, %v1085_v28 }
 0x180   : > { %v1097_v0 = vadd.f32 %v1095_v58, %v1081_v47  ;;  %v1098_v9 = vadd.f32 %v1096_v27, %v1082_v26 }
 0x182   : > { %v1117_v44 = vpop.permute.xlu1 %1116  ;;  %v1113_v7 = vadd.f32 %v1111_v51, %v1097_v0  ;;  %v1114_v36 = vadd.f32 %v1112_v4, %v1098_v9 }
 0x183   : > { %v1127_v63 = vmul.f32 %v1122_v19, %v1117_v44  ;;  %v1128_v1 = vmul.f32 %v1126_v29, %v1117_v44  ;;  %v1218_v19 = vrot.slane %v2191_v57, %v1846_v60  ;;  %v1222_v29 = vrot.slane %v2195_v34, %v1846_v60 }
 0x185   : > { %v1129_v11 = vadd.f32 %v1127_v63, %v1113_v7  ;;  %v1130_v17 = vadd.f32 %v1128_v1, %v1114_v36 }
 0x187   : > { %v1133_v22 = vpop.permute.xlu1 %1132 }
 0x188   : > { %v1143_v41 = vmul.f32 %v1138_v21, %v1133_v22  ;;  %v1144_v23 = vmul.f32 %v1142_v43, %v1133_v22  ;;  %v1245_v22 = vpop.permute.xlu0 %1244 }
 0x18a   : > { %v1145_v14 = vadd.f32 %v1143_v41, %v1129_v11  ;;  %v1146_v39 = vadd.f32 %v1144_v23, %v1130_v17 }
 0x18c   : > { %v1149_v15 = vpop.permute.xlu1 %1148 }
 0x18d   : > { %v1159_v46 = vmul.f32 %v1154_v62, %v1149_v15  ;;  %v1160_v16 = vmul.f32 %v1158_v18, %v1149_v15 }
 0x18f   : > { %v1161_v48 = vadd.f32 %v1159_v46, %v1145_v14  ;;  %v1162_v52 = vadd.f32 %v1160_v16, %v1146_v39 }
 0x191   : > { %v960_v13 = vpop.permute.xlu1 %959  ;;  %v1177_v45 = vadd.f32 %v1175_v38, %v1161_v48  ;;  %v1178_v3 = vadd.f32 %v1176_v55, %v1162_v52 }
 0x192   : > { %v962_v26 = vmul.f32 %v960_v13, %v2010_v50  ;;  %v963_v58 = vmul.f32 %v960_v13, %v2014_v35 }
 0x194   : > { %v964_v51 = vadd.f32 %v962_v26, %v2173_v31  ;;  %v965_v4 = vadd.f32 %v963_v58, %v2175_v8 }
 0x196   : > { %v1181_v42 = vpop.permute.xlu1 %1180 }
 0x197   : > { %v1191_v40 = vmul.f32 %v1186_v2, %v1181_v42  ;;  %v1192_v6 = vmul.f32 %v1190_v25, %v1181_v42 }
 0x199   : > { %v1193_v28 = vadd.f32 %v1191_v40, %v1177_v45  ;;  %v1194_v47 = vadd.f32 %v1192_v6, %v1178_v3  ;;  %v1293_v45 = vpop.permute.xlu0 %1292 }
 0x19b   : > { %v968_v27 = vpop.permute.xlu1 %967  ;;  %v1209_v0 = vadd.f32 %v1207_v5, %v1193_v28  ;;  %v1210_v9 = vadd.f32 %v1208_v30, %v1194_v47 }
 0x19c   : > { %v970_v44 = vadd.f32 %v968_v27, %v964_v51  ;;  %v971_v7 = vadd.f32 %v968_v27, %v965_v4 }
 0x19d   : > { %v1341_v58 = vpop.permute.xlu0 %1340 }
 0x19e   : > { %v1234_v11 = vrot.slane %v970_v44, %v1732_v32  ;;  %v1238_v17 = vrot.slane %v971_v7, %v1732_v32  ;;  %v1250_v31 = vrot.slane %v970_v44, %v1735_v33  ;;  %v1254_v8 = vrot.slane %v971_v7, %v1735_v33 }
 0x19f   : > { %v1266_v39 = vrot.slane %v970_v44, %v1780_v54  ;;  %v1270_v20 = vrot.slane %v971_v7, %v1780_v54  ;;  %v1298_v33 = vrot.slane %v970_v44, %v1821_v10  ;;  %v1302_v12 = vrot.slane %v971_v7, %v1821_v10 }
 0x1a0   : > { %v1213_v36 = vpop.permute.xlu1 %1212  ;;  %v1255_v23 = vmul.f32 %v1250_v31, %v1245_v22  ;;  %v1256_v14 = vmul.f32 %v1254_v8, %v1245_v22  ;;  %v1282_v38 = vrot.slane %v970_v44, %v1784_v56  ;;  %v1286_v55 = vrot.slane %v971_v7, %v1784_v56 }
 0x1a1   : > { %v1223_v63 = vmul.f32 %v1218_v19, %v1213_v36  ;;  %v1224_v50 = vmul.f32 %v1222_v29, %v1213_v36  ;;  %v1303_v54 = vmul.f32 %v1298_v33, %v1293_v45  ;;  %v1304_v3 = vmul.f32 %v1302_v12, %v1293_v45 }
 0x1a2   : > { %v1314_v2 = vrot.slane %v970_v44, %v1829_v37  ;;  %v1318_v25 = vrot.slane %v971_v7, %v1829_v37  ;;  %v1346_v30 = vrot.slane %v970_v44, %v1846_v60  ;;  %v1350_v28 = vrot.slane %v971_v7, %v1846_v60 }
 0x1a3   : > { %v1225_v1 = vadd.f32 %v1223_v63, %v1209_v0  ;;  %v1226_v35 = vadd.f32 %v1224_v50, %v1210_v9  ;;  %v1330_v47 = vrot.slane %v970_v44, %v1843_v59  ;;  %v1334_v26 = vrot.slane %v971_v7, %v1843_v59 }
 0x1a4   : > { %v1351_v9 = vmul.f32 %v1346_v30, %v1341_v58  ;;  %v1352_v51 = vmul.f32 %v1350_v28, %v1341_v58 }
 0x1a5   : > { %v1229_v21 = vpop.permute.xlu1 %1228 }
 0x1a6   : > { %v1239_v57 = vmul.f32 %v1234_v11, %v1229_v21  ;;  %v1240_v43 = vmul.f32 %v1238_v17, %v1229_v21 }
 0x1a8   : > { %v1241_v34 = vadd.f32 %v1239_v57, %v1225_v1  ;;  %v1242_v41 = vadd.f32 %v1240_v43, %v1226_v35 }
 0x1aa   : > { %v1261_v61 = vpop.permute.xlu1 %1260  ;;  %v1257_v62 = vadd.f32 %v1255_v23, %v1241_v34  ;;  %v1258_v18 = vadd.f32 %v1256_v14, %v1242_v41 }
 0x1ab   : > { %v1271_v32 = vmul.f32 %v1266_v39, %v1261_v61  ;;  %v1272_v15 = vmul.f32 %v1270_v20, %v1261_v61 }
 0x1ad   : > { %v1273_v46 = vadd.f32 %v1271_v32, %v1257_v62  ;;  %v1274_v16 = vadd.f32 %v1272_v15, %v1258_v18 }
 0x1af   : > { %v1277_v48 = vpop.permute.xlu1 %1276 }
 0x1b0   : > { %v1287_v52 = vmul.f32 %v1282_v38, %v1277_v48  ;;  %v1288_v13 = vmul.f32 %v1286_v55, %v1277_v48 }
 0x1b2   : > { %v1289_v49 = vadd.f32 %v1287_v52, %v1273_v46  ;;  %v1290_v24 = vadd.f32 %v1288_v13, %v1274_v16 }
 0x1b4   : > { %v1309_v53 = vpop.permute.xlu1 %1308  ;;  %v1305_v42 = vadd.f32 %v1303_v54, %v1289_v49  ;;  %v1306_v40 = vadd.f32 %v1304_v3, %v1290_v24 }
 0x1b5   : > { %v1319_v10 = vmul.f32 %v1314_v2, %v1309_v53  ;;  %v1320_v6 = vmul.f32 %v1318_v25, %v1309_v53 }
 0x1b7   : > { %v1321_v5 = vadd.f32 %v1319_v10, %v1305_v42  ;;  %v1322_v56 = vadd.f32 %v1320_v6, %v1306_v40 }
 0x1b9   : > { %v1325_v27 = vpop.permute.xlu1 %1324 }
 0x1ba   : > { %v1335_v0 = vmul.f32 %v1330_v47, %v1325_v27  ;;  %v1336_v37 = vmul.f32 %v1334_v26, %v1325_v27 }
 0x1bc   : > { %v1337_v4 = vadd.f32 %v1335_v0, %v1321_v5  ;;  %v1338_v19 = vadd.f32 %v1336_v37, %v1322_v56 }
 0x1be   : > { %v1357_v29 = vpop.permute.xlu1 %1356  ;;  %v1353_v36 = vadd.f32 %v1351_v9, %v1337_v4  ;;  %v1354_v63 = vadd.f32 %v1352_v51, %v1338_v19 }
 0x1c0   : > { %v1359_v60 = vadd.f32 %v1357_v29, %v1353_v36  ;;  %v1360_v44 = vadd.f32 %v1357_v29, %v1354_v63 }
 0x1c2   : > { %1361 = vst [vmem:[%s140_s6] sm:$0xff] %v1359_v60  ;;  %1362 = vst [vmem:[%s140_s6 + $0x8] sm:$0xff] %v1360_v44 }
 0x1c3 PF: > { %s12_s9 = sadd.s32 1, %s1550_s9  }
 0x1c4   : > { %p9_p4 = scmp.ge.s32.totalorder %s12_s9, 4  }
 0x1c6   :  { %11 = sbr.rel (!%p9_p4) target bundleno = 1 (0x1), region = 58 }

</bundles_post_ra>
